<compile_context>
chip_gen: v7x
topology: tpu7x:2x2x1
jax: 0.10.0
libtpu: 0.0.40
codegen_flags: <defaults>
</compile_context>

<pallas_src>
import numpy as np
import jax
import jax.numpy as jnp
from jax.experimental import pallas as pl
from jax.experimental.pallas import tpu as pltpu


# ----------------------------------------------------------------------------
# Layer schedule (matches the PyTorch nn.Sequential ordering)
# ----------------------------------------------------------------------------
_LAYER_ACTS = ("relu", "relu", "none", "relu", "relu", "sigmoid")

if hasattr(pl, "reciprocal"):
    def _recip(v):
        return pl.reciprocal(v, approx=True)      # EUP slot, keeps divide off VALU
else:                                             # fallback for older jax
    def _recip(v):
        return 1.0 / v


# ----------------------------------------------------------------------------
# In-kernel fused layer: OUT = act( sum_k (S_k @ X) @ M_k + bias_row )
# ----------------------------------------------------------------------------
def _layer(x, s_ref, m_ref, b_ref, act):
    """x: (Hin, Win*Cin) value.  s_ref: (kh, Hout, Hin) bf16 0/1 selection.
    m_ref: (kh, Win*Cin, Wout*Cout) bf16 lowered weights.  b_ref: (1, Wout*Cout) f32."""
    xb = x.astype(jnp.bfloat16)
    kh = s_ref.shape[0]
    acc = b_ref[...]                                        # (1, N) broadcasts over rows
    for k in range(kh):                                     # static unroll (kh = 3 or 7)
        rows = jnp.dot(s_ref[k], xb, preferred_element_type=jnp.float32)
        acc = acc + jnp.dot(rows.astype(jnp.bfloat16), m_ref[k],
                            preferred_element_type=jnp.float32)
    if act == "relu":
        acc = jnp.maximum(acc, 0.0)
    elif act == "sigmoid":
        acc = jnp.clip(_recip(1.0 + jnp.exp(-acc)), 0.0, 1.0)
    return acc


def _autoencoder_kernel(x_ref, *refs):
    """One image per grid step; all 6 layers fused, activations never leave VMEM."""
    o_ref = refs[-1]
    w_refs = refs[:-1]                                      # 6 x (S_stack, M_stack, bias)
    h = x_ref[0, 0, :, :]                                   # (28, 28) f32, Cin = 1
    for li, act in enumerate(_LAYER_ACTS):
        h = _layer(h, w_refs[3 * li], w_refs[3 * li + 1], w_refs[3 * li + 2], act)
    o_ref[0, 0, :, :] = h.astype(o_ref.dtype)               # (28, 28), Cout = 1


# ----------------------------------------------------------------------------
# Forward: single pallas_call, grid over batch
# ----------------------------------------------------------------------------
def autoencoder_forward(packed, x_nchw):
    n, _, hh, ww = x_nchw.shape

    def _const_spec(a):
        nd = a.ndim                                          # block == full array,
        return pl.BlockSpec(a.shape, lambda b, nd=nd: (0,) * nd)  # resident in VMEM

    in_specs = [pl.BlockSpec((1, 1, hh, ww), lambda b: (b, 0, 0, 0))]
    in_specs += [_const_spec(a) for a in packed]

    return pl.pallas_call(
        _autoencoder_kernel,
        out_shape=jax.ShapeDtypeStruct((n, 1, hh, ww), jnp.float32),
        grid=(n,),
        in_specs=in_specs,
        out_specs=pl.BlockSpec((1, 1, hh, ww), lambda b: (b, 0, 0, 0)),
        compiler_params=pltpu.CompilerParams(
            dimension_semantics=("parallel",),               # v7x: shard batch on 2 TCs
            vmem_limit_bytes=64 << 20),
    )(x_nchw, *packed)


# ----------------------------------------------------------------------------
# Host-side one-off weight lowering (PyTorch conv semantics -> (S_k, M_k, bias_row))
# ----------------------------------------------------------------------------
def _pack_conv(w, b, H, W, stride, padding):
    w = np.asarray(w, np.float32); b = np.asarray(b, np.float32)
    Cout, Cin, kh, kw = w.shape
    Ho = (H + 2 * padding - kh) // stride + 1
    Wo = (W + 2 * padding - kw) // stride + 1
    S = np.zeros((kh, Ho, H), np.float32)
    M = np.zeros((kh, W * Cin, Wo * Cout), np.float32)
    for k in range(kh):
        for oy in range(Ho):
            iy = stride * oy + k - padding
            if 0 <= iy < H:
                S[k, oy, iy] = 1.0
        for ox in range(Wo):
            for kx in range(kw):
                ix = stride * ox + kx - padding
                if 0 <= ix < W:
                    M[k, ix * Cin:(ix + 1) * Cin, ox * Cout:(ox + 1) * Cout] = w[:, :, k, kx].T
    return S, M, np.tile(b, Wo)[None, :], Ho, Wo


def _pack_convT(w, b, H, W, stride, padding, output_padding):
    w = np.asarray(w, np.float32); b = np.asarray(b, np.float32)
    Cin, Cout, kh, kw = w.shape
    Ho = (H - 1) * stride - 2 * padding + kh + output_padding
    Wo = (W - 1) * stride - 2 * padding + kw + output_padding
    S = np.zeros((kh, Ho, H), np.float32)
    M = np.zeros((kh, W * Cin, Wo * Cout), np.float32)
    for k in range(kh):
        for oy in range(Ho):
            num = oy + padding - k
            if num % stride == 0:
                iy = num // stride
                if 0 <= iy < H:
                    S[k, oy, iy] = 1.0
        for ox in range(Wo):
            for ix in range(W):
                kx = ox + padding - stride * ix
                if 0 <= kx < kw:
                    M[k, ix * Cin:(ix + 1) * Cin, ox * Cout:(ox + 1) * Cout] = w[:, :, k, kx]
    return S, M, np.tile(b, Wo)[None, :], Ho, Wo


def pack_params(params):
    """Lower all 6 conv layers; S/M go to bf16 (MXU inputs), bias rows stay f32."""
    packed = []
    H = W = 28
    S, M, B, H, W = _pack_conv(params["e1_w"], params["e1_b"], H, W, 2, 1); packed += [S, M, B]
    S, M, B, H, W = _pack_conv(params["e2_w"], params["e2_b"], H, W, 2, 1); packed += [S, M, B]
    S, M, B, H, W = _pack_conv(params["e3_w"], params["e3_b"], H, W, 1, 0); packed += [S, M, B]
    S, M, B, H, W = _pack_convT(params["d1_w"], params["d1_b"], H, W, 1, 0, 0); packed += [S, M, B]
    S, M, B, H, W = _pack_convT(params["d2_w"], params["d2_b"], H, W, 2, 1, 1); packed += [S, M, B]
    S, M, B, H, W = _pack_convT(params["d3_w"], params["d3_b"], H, W, 2, 1, 1); packed += [S, M, B]
    out = []
    for i, a in enumerate(packed):
        out.append(jnp.asarray(a, jnp.float32 if i % 3 == 2 else jnp.bfloat16))
    return out


# ----------------------------------------------------------------------------
# Parameters (deterministic synthetic init, PyTorch shapes)
# ----------------------------------------------------------------------------
def init_params(key):
    def u(k, shape, fan_in):
        bound = 1.0 / np.sqrt(float(fan_in))
        return jax.random.uniform(k, shape, jnp.float32, -bound, bound)

    ks = jax.random.split(key, 12)
    p = {}
    p["e1_w"] = u(ks[0], (16, 1, 3, 3), 1 * 9);    p["e1_b"] = u(ks[1], (16,), 1 * 9)
    p["e2_w"] = u(ks[2], (32, 16, 3, 3), 16 * 9);  p["e2_b"] = u(ks[3], (32,), 16 * 9)
    p["e3_w"] = u(ks[4], (64, 32, 7, 7), 32 * 49); p["e3_b"] = u(ks[5], (64,), 32 * 49)
    p["d1_w"] = u(ks[6], (64, 32, 7, 7), 32 * 49); p["d1_b"] = u(ks[7], (32,), 32 * 49)
    p["d2_w"] = u(ks[8], (32, 16, 3, 3), 16 * 9);  p["d2_b"] = u(ks[9], (16,), 16 * 9)
    p["d3_w"] = u(ks[10], (16, 1, 3, 3), 1 * 9);   p["d3_b"] = u(ks[11], (1,), 1 * 9)
    return p


# ----------------------------------------------------------------------------
# Independent numpy reference (direct transcription of PyTorch semantics)
# ----------------------------------------------------------------------------
def _ref_conv2d(x, w, b, stride, padding):
    w = np.asarray(w, np.float32); b = np.asarray(b, np.float32)
    Cout, Cin, kh, kw = w.shape
    H, W, _ = x.shape
    Ho = (H + 2 * padding - kh) // stride + 1
    Wo = (W + 2 * padding - kw) // stride + 1
    xp = np.zeros((H + 2 * padding, W + 2 * padding, Cin), np.float32)
    xp[padding:padding + H, padding:padding + W] = x
    out = np.zeros((Ho, Wo, Cout), np.float32)
    for oy in range(Ho):
        for ox in range(Wo):
            patch = xp[oy * stride:oy * stride + kh, ox * stride:ox * stride + kw, :]
            out[oy, ox] = np.einsum('ijc,ocij->o', patch, w) + b
    return out


def _ref_convT2d(x, w, b, stride, padding, output_padding):
    w = np.asarray(w, np.float32); b = np.asarray(b, np.float32)
    Cin, Cout, kh, kw = w.shape
    H, W, _ = x.shape
    Ho = (H - 1) * stride - 2 * padding + kh + output_padding
    Wo = (W - 1) * stride - 2 * padding + kw + output_padding
    out = np.zeros((Ho, Wo, Cout), np.float32)
    for iy in range(H):
        for ix in range(W):
            for ky in range(kh):
                for kx in range(kw):
                    oy = iy * stride - padding + ky
                    ox = ix * stride - padding + kx
                    if 0 <= oy < Ho and 0 <= ox < Wo:
                        out[oy, ox] += x[iy, ix] @ w[:, :, ky, kx]
    return out + b


def reference_forward(params, x_nchw):
    x = np.asarray(x_nchw, np.float32)
    outs = []
    for i in range(x.shape[0]):
        h = np.transpose(x[i], (1, 2, 0))
        h = np.maximum(_ref_conv2d(h, params["e1_w"], params["e1_b"], 2, 1), 0)
        h = np.maximum(_ref_conv2d(h, params["e2_w"], params["e2_b"], 2, 1), 0)
        h = _ref_conv2d(h, params["e3_w"], params["e3_b"], 1, 0)
        h = np.maximum(_ref_convT2d(h, params["d1_w"], params["d1_b"], 1, 0, 0), 0)
        h = np.maximum(_ref_convT2d(h, params["d2_w"], params["d2_b"], 2, 1, 1), 0)
        h = _ref_convT2d(h, params["d3_w"], params["d3_b"], 2, 1, 1)
        outs.append(np.transpose(1.0 / (1.0 + np.exp(-h)), (2, 0, 1)))
    return np.stack(outs, 0)


if __name__ == "__main__":
    key = jax.random.PRNGKey(0)
    k_params, k_x = jax.random.split(key)
    params = init_params(k_params)
    packed = pack_params(params)            # one-off weight lowering (host side)

    # MNIST-sized input implied by the 7x7 bottleneck conv: (N, 1, 28, 28)
    x = jax.random.uniform(k_x, (2, 1, 28, 28), jnp.float32)

    fwd = jax.jit(autoencoder_forward)
    y = jax.block_until_ready(fwd(packed, x))

    assert y.shape == (2, 1, 28, 28), y.shape
    y_np = np.asarray(y)
    assert np.all(np.isfinite(y_np))
    assert np.all((y_np >= 0.0) & (y_np <= 1.0))            # sigmoid output range

    # Numerical check vs PyTorch-semantics reference (bf16 MXU tolerance).
    y_ref = reference_forward(params, x)
    max_err = float(np.max(np.abs(y_np - y_ref)))
    assert max_err < 5e-2, f"max abs error vs reference: {max_err}"

    print("KERNEL_OK")
</pallas_src>

<mosaic_0001>
module attributes {stable_mosaic.version = 11 : i64} {
  func.func @_autoencoder_kernel(%arg0: i32, %arg1: memref<1x1x28x28xf32, #tpu.memory_space<vmem>>, %arg2: memref<3x14x28xbf16, #tpu.memory_space<vmem>>, %arg3: memref<3x28x224xbf16, #tpu.memory_space<vmem>>, %arg4: memref<1x224xf32, #tpu.memory_space<vmem>>, %arg5: memref<3x7x14xbf16, #tpu.memory_space<vmem>>, %arg6: memref<3x224x224xbf16, #tpu.memory_space<vmem>>, %arg7: memref<1x224xf32, #tpu.memory_space<vmem>>, %arg8: memref<7x1x7xbf16, #tpu.memory_space<vmem>>, %arg9: memref<7x224x64xbf16, #tpu.memory_space<vmem>>, %arg10: memref<1x64xf32, #tpu.memory_space<vmem>>, %arg11: memref<7x7x1xbf16, #tpu.memory_space<vmem>>, %arg12: memref<7x64x224xbf16, #tpu.memory_space<vmem>>, %arg13: memref<1x224xf32, #tpu.memory_space<vmem>>, %arg14: memref<3x14x7xbf16, #tpu.memory_space<vmem>>, %arg15: memref<3x224x224xbf16, #tpu.memory_space<vmem>>, %arg16: memref<1x224xf32, #tpu.memory_space<vmem>>, %arg17: memref<3x28x14xbf16, #tpu.memory_space<vmem>>, %arg18: memref<3x224x28xbf16, #tpu.memory_space<vmem>>, %arg19: memref<1x28xf32, #tpu.memory_space<vmem>>, %arg20: memref<1x1x28x28xf32, #tpu.memory_space<vmem>>) attributes {dimension_semantics = [#tpu.dimension_semantics<parallel>], iteration_bounds = array<i64: 2>, scalar_prefetch = 0 : i64, scratch_operands = 0 : i64, tpu.core_type = #tpu.core_type<tc>, window_params = [{transform_indices = @transform_0, window_bounds = array<i64: 1, 1, 28, 28>}, {pipeline_mode = #tpu.pipeline_mode<synchronous>, transform_indices = @transform_1, window_bounds = array<i64: 3, 14, 28>}, {pipeline_mode = #tpu.pipeline_mode<synchronous>, transform_indices = @transform_2, window_bounds = array<i64: 3, 28, 224>}, {pipeline_mode = #tpu.pipeline_mode<synchronous>, transform_indices = @transform_3, window_bounds = array<i64: 1, 224>}, {pipeline_mode = #tpu.pipeline_mode<synchronous>, transform_indices = @transform_4, window_bounds = array<i64: 3, 7, 14>}, {pipeline_mode = #tpu.pipeline_mode<synchronous>, transform_indices = @transform_5, window_bounds = array<i64: 3, 224, 224>}, {pipeline_mode = #tpu.pipeline_mode<synchronous>, transform_indices = @transform_6, window_bounds = array<i64: 1, 224>}, {pipeline_mode = #tpu.pipeline_mode<synchronous>, transform_indices = @transform_7, window_bounds = array<i64: 7, 1, 7>}, {pipeline_mode = #tpu.pipeline_mode<synchronous>, transform_indices = @transform_8, window_bounds = array<i64: 7, 224, 64>}, {pipeline_mode = #tpu.pipeline_mode<synchronous>, transform_indices = @transform_9, window_bounds = array<i64: 1, 64>}, {pipeline_mode = #tpu.pipeline_mode<synchronous>, transform_indices = @transform_10, window_bounds = array<i64: 7, 7, 1>}, {pipeline_mode = #tpu.pipeline_mode<synchronous>, transform_indices = @transform_11, window_bounds = array<i64: 7, 64, 224>}, {pipeline_mode = #tpu.pipeline_mode<synchronous>, transform_indices = @transform_12, window_bounds = array<i64: 1, 224>}, {pipeline_mode = #tpu.pipeline_mode<synchronous>, transform_indices = @transform_13, window_bounds = array<i64: 3, 14, 7>}, {pipeline_mode = #tpu.pipeline_mode<synchronous>, transform_indices = @transform_14, window_bounds = array<i64: 3, 224, 224>}, {pipeline_mode = #tpu.pipeline_mode<synchronous>, transform_indices = @transform_15, window_bounds = array<i64: 1, 224>}, {pipeline_mode = #tpu.pipeline_mode<synchronous>, transform_indices = @transform_16, window_bounds = array<i64: 3, 28, 14>}, {pipeline_mode = #tpu.pipeline_mode<synchronous>, transform_indices = @transform_17, window_bounds = array<i64: 3, 224, 28>}, {pipeline_mode = #tpu.pipeline_mode<synchronous>, transform_indices = @transform_18, window_bounds = array<i64: 1, 28>}, {transform_indices = @transform_19, window_bounds = array<i64: 1, 1, 28, 28>}]} {
    %c0 = arith.constant 0 : index
    %c0_0 = arith.constant 0 : index
    %c0_1 = arith.constant 0 : index
    %c0_2 = arith.constant 0 : index
    %0 = vector.load %arg1[%c0, %c0_0, %c0_1, %c0_2] : memref<1x1x28x28xf32, #tpu.memory_space<vmem>>, vector<1x1x28x28xf32>
    %1 = vector.shape_cast %0 : vector<1x1x28x28xf32> to vector<28x28xf32>
    %2 = arith.truncf %1 : vector<28x28xf32> to vector<28x28xbf16>
    %c0_3 = arith.constant 0 : index
    %c0_4 = arith.constant 0 : index
    %3 = vector.load %arg4[%c0_3, %c0_4] : memref<1x224xf32, #tpu.memory_space<vmem>>, vector<1x224xf32>
    %c0_5 = arith.constant 0 : index
    %c0_6 = arith.constant 0 : index
    %c0_7 = arith.constant 0 : index
    %4 = vector.load %arg2[%c0_5, %c0_6, %c0_7] : memref<3x14x28xbf16, #tpu.memory_space<vmem>>, vector<1x14x28xbf16>
    %5 = vector.shape_cast %4 : vector<1x14x28xbf16> to vector<14x28xbf16>
    %cst = arith.constant dense<0.000000e+00> : vector<14x28xf32>
    %6 = tpu.matmul %5, %2, %cst {dimension_numbers = #tpu.dot_dimension_numbers<[1], [0], [0], [1], [0, 0, 1, 1], [], []>} : vector<14x28xbf16>, vector<28x28xbf16>, vector<14x28xf32> -> vector<14x28xf32>
    %7 = arith.truncf %6 : vector<14x28xf32> to vector<14x28xbf16>
    %c0_8 = arith.constant 0 : index
    %c0_9 = arith.constant 0 : index
    %c0_10 = arith.constant 0 : index
    %8 = vector.load %arg3[%c0_8, %c0_9, %c0_10] : memref<3x28x224xbf16, #tpu.memory_space<vmem>>, vector<1x28x224xbf16>
    %9 = vector.shape_cast %8 : vector<1x28x224xbf16> to vector<28x224xbf16>
    %cst_11 = arith.constant dense<0.000000e+00> : vector<14x224xf32>
    %10 = tpu.matmul %7, %9, %cst_11 {dimension_numbers = #tpu.dot_dimension_numbers<[1], [0], [0], [1], [0, 0, 1, 1], [], []>} : vector<14x28xbf16>, vector<28x224xbf16>, vector<14x224xf32> -> vector<14x224xf32>
    %11 = vector.broadcast %3 : vector<1x224xf32> to vector<14x224xf32>
    %12 = arith.addf %11, %10 : vector<14x224xf32>
    %c1 = arith.constant 1 : index
    %c0_12 = arith.constant 0 : index
    %c0_13 = arith.constant 0 : index
    %13 = vector.load %arg2[%c1, %c0_12, %c0_13] : memref<3x14x28xbf16, #tpu.memory_space<vmem>>, vector<1x14x28xbf16>
    %14 = vector.shape_cast %13 : vector<1x14x28xbf16> to vector<14x28xbf16>
    %cst_14 = arith.constant dense<0.000000e+00> : vector<14x28xf32>
    %15 = tpu.matmul %14, %2, %cst_14 {dimension_numbers = #tpu.dot_dimension_numbers<[1], [0], [0], [1], [0, 0, 1, 1], [], []>} : vector<14x28xbf16>, vector<28x28xbf16>, vector<14x28xf32> -> vector<14x28xf32>
    %16 = arith.truncf %15 : vector<14x28xf32> to vector<14x28xbf16>
    %c1_15 = arith.constant 1 : index
    %c0_16 = arith.constant 0 : index
    %c0_17 = arith.constant 0 : index
    %17 = vector.load %arg3[%c1_15, %c0_16, %c0_17] : memref<3x28x224xbf16, #tpu.memory_space<vmem>>, vector<1x28x224xbf16>
    %18 = vector.shape_cast %17 : vector<1x28x224xbf16> to vector<28x224xbf16>
    %cst_18 = arith.constant dense<0.000000e+00> : vector<14x224xf32>
    %19 = tpu.matmul %16, %18, %cst_18 {dimension_numbers = #tpu.dot_dimension_numbers<[1], [0], [0], [1], [0, 0, 1, 1], [], []>} : vector<14x28xbf16>, vector<28x224xbf16>, vector<14x224xf32> -> vector<14x224xf32>
    %20 = arith.addf %12, %19 : vector<14x224xf32>
    %c2 = arith.constant 2 : index
    %c0_19 = arith.constant 0 : index
    %c0_20 = arith.constant 0 : index
    %21 = vector.load %arg2[%c2, %c0_19, %c0_20] : memref<3x14x28xbf16, #tpu.memory_space<vmem>>, vector<1x14x28xbf16>
    %22 = vector.shape_cast %21 : vector<1x14x28xbf16> to vector<14x28xbf16>
    %cst_21 = arith.constant dense<0.000000e+00> : vector<14x28xf32>
    %23 = tpu.matmul %22, %2, %cst_21 {dimension_numbers = #tpu.dot_dimension_numbers<[1], [0], [0], [1], [0, 0, 1, 1], [], []>} : vector<14x28xbf16>, vector<28x28xbf16>, vector<14x28xf32> -> vector<14x28xf32>
    %24 = arith.truncf %23 : vector<14x28xf32> to vector<14x28xbf16>
    %c2_22 = arith.constant 2 : index
    %c0_23 = arith.constant 0 : index
    %c0_24 = arith.constant 0 : index
    %25 = vector.load %arg3[%c2_22, %c0_23, %c0_24] : memref<3x28x224xbf16, #tpu.memory_space<vmem>>, vector<1x28x224xbf16>
    %26 = vector.shape_cast %25 : vector<1x28x224xbf16> to vector<28x224xbf16>
    %cst_25 = arith.constant dense<0.000000e+00> : vector<14x224xf32>
    %27 = tpu.matmul %24, %26, %cst_25 {dimension_numbers = #tpu.dot_dimension_numbers<[1], [0], [0], [1], [0, 0, 1, 1], [], []>} : vector<14x28xbf16>, vector<28x224xbf16>, vector<14x224xf32> -> vector<14x224xf32>
    %28 = arith.addf %20, %27 : vector<14x224xf32>
    %cst_26 = arith.constant 0.000000e+00 : f32
    %29 = vector.broadcast %cst_26 : f32 to vector<14x224xf32>
    %30 = arith.maximumf %28, %29 : vector<14x224xf32>
    %31 = arith.truncf %30 : vector<14x224xf32> to vector<14x224xbf16>
    %c0_27 = arith.constant 0 : index
    %c0_28 = arith.constant 0 : index
    %32 = vector.load %arg7[%c0_27, %c0_28] : memref<1x224xf32, #tpu.memory_space<vmem>>, vector<1x224xf32>
    %c0_29 = arith.constant 0 : index
    %c0_30 = arith.constant 0 : index
    %c0_31 = arith.constant 0 : index
    %33 = vector.load %arg5[%c0_29, %c0_30, %c0_31] : memref<3x7x14xbf16, #tpu.memory_space<vmem>>, vector<1x7x14xbf16>
    %34 = vector.shape_cast %33 : vector<1x7x14xbf16> to vector<7x14xbf16>
    %cst_32 = arith.constant dense<0.000000e+00> : vector<7x224xf32>
    %35 = tpu.matmul %34, %31, %cst_32 {dimension_numbers = #tpu.dot_dimension_numbers<[1], [0], [0], [1], [0, 0, 1, 1], [], []>} : vector<7x14xbf16>, vector<14x224xbf16>, vector<7x224xf32> -> vector<7x224xf32>
    %36 = arith.truncf %35 : vector<7x224xf32> to vector<7x224xbf16>
    %c0_33 = arith.constant 0 : index
    %c0_34 = arith.constant 0 : index
    %c0_35 = arith.constant 0 : index
    %37 = vector.load %arg6[%c0_33, %c0_34, %c0_35] : memref<3x224x224xbf16, #tpu.memory_space<vmem>>, vector<1x224x224xbf16>
    %38 = vector.shape_cast %37 : vector<1x224x224xbf16> to vector<224x224xbf16>
    %cst_36 = arith.constant dense<0.000000e+00> : vector<7x224xf32>
    %39 = tpu.matmul %36, %38, %cst_36 {dimension_numbers = #tpu.dot_dimension_numbers<[1], [0], [0], [1], [0, 0, 1, 1], [], []>} : vector<7x224xbf16>, vector<224x224xbf16>, vector<7x224xf32> -> vector<7x224xf32>
    %40 = vector.broadcast %32 : vector<1x224xf32> to vector<7x224xf32>
    %41 = arith.addf %40, %39 : vector<7x224xf32>
    %c1_37 = arith.constant 1 : index
    %c0_38 = arith.constant 0 : index
    %c0_39 = arith.constant 0 : index
    %42 = vector.load %arg5[%c1_37, %c0_38, %c0_39] : memref<3x7x14xbf16, #tpu.memory_space<vmem>>, vector<1x7x14xbf16>
    %43 = vector.shape_cast %42 : vector<1x7x14xbf16> to vector<7x14xbf16>
    %cst_40 = arith.constant dense<0.000000e+00> : vector<7x224xf32>
    %44 = tpu.matmul %43, %31, %cst_40 {dimension_numbers = #tpu.dot_dimension_numbers<[1], [0], [0], [1], [0, 0, 1, 1], [], []>} : vector<7x14xbf16>, vector<14x224xbf16>, vector<7x224xf32> -> vector<7x224xf32>
    %45 = arith.truncf %44 : vector<7x224xf32> to vector<7x224xbf16>
    %c1_41 = arith.constant 1 : index
    %c0_42 = arith.constant 0 : index
    %c0_43 = arith.constant 0 : index
    %46 = vector.load %arg6[%c1_41, %c0_42, %c0_43] : memref<3x224x224xbf16, #tpu.memory_space<vmem>>, vector<1x224x224xbf16>
    %47 = vector.shape_cast %46 : vector<1x224x224xbf16> to vector<224x224xbf16>
    %cst_44 = arith.constant dense<0.000000e+00> : vector<7x224xf32>
    %48 = tpu.matmul %45, %47, %cst_44 {dimension_numbers = #tpu.dot_dimension_numbers<[1], [0], [0], [1], [0, 0, 1, 1], [], []>} : vector<7x224xbf16>, vector<224x224xbf16>, vector<7x224xf32> -> vector<7x224xf32>
    %49 = arith.addf %41, %48 : vector<7x224xf32>
    %c2_45 = arith.constant 2 : index
    %c0_46 = arith.constant 0 : index
    %c0_47 = arith.constant 0 : index
    %50 = vector.load %arg5[%c2_45, %c0_46, %c0_47] : memref<3x7x14xbf16, #tpu.memory_space<vmem>>, vector<1x7x14xbf16>
    %51 = vector.shape_cast %50 : vector<1x7x14xbf16> to vector<7x14xbf16>
    %cst_48 = arith.constant dense<0.000000e+00> : vector<7x224xf32>
    %52 = tpu.matmul %51, %31, %cst_48 {dimension_numbers = #tpu.dot_dimension_numbers<[1], [0], [0], [1], [0, 0, 1, 1], [], []>} : vector<7x14xbf16>, vector<14x224xbf16>, vector<7x224xf32> -> vector<7x224xf32>
    %53 = arith.truncf %52 : vector<7x224xf32> to vector<7x224xbf16>
    %c2_49 = arith.constant 2 : index
    %c0_50 = arith.constant 0 : index
    %c0_51 = arith.constant 0 : index
    %54 = vector.load %arg6[%c2_49, %c0_50, %c0_51] : memref<3x224x224xbf16, #tpu.memory_space<vmem>>, vector<1x224x224xbf16>
    %55 = vector.shape_cast %54 : vector<1x224x224xbf16> to vector<224x224xbf16>
    %cst_52 = arith.constant dense<0.000000e+00> : vector<7x224xf32>
    %56 = tpu.matmul %53, %55, %cst_52 {dimension_numbers = #tpu.dot_dimension_numbers<[1], [0], [0], [1], [0, 0, 1, 1], [], []>} : vector<7x224xbf16>, vector<224x224xbf16>, vector<7x224xf32> -> vector<7x224xf32>
    %57 = arith.addf %49, %56 : vector<7x224xf32>
    %cst_53 = arith.constant 0.000000e+00 : f32
    %58 = vector.broadcast %cst_53 : f32 to vector<7x224xf32>
    %59 = arith.maximumf %57, %58 : vector<7x224xf32>
    %60 = arith.truncf %59 : vector<7x224xf32> to vector<7x224xbf16>
    %c0_54 = arith.constant 0 : index
    %c0_55 = arith.constant 0 : index
    %61 = vector.load %arg10[%c0_54, %c0_55] : memref<1x64xf32, #tpu.memory_space<vmem>>, vector<1x64xf32>
    %c0_56 = arith.constant 0 : index
    %c0_57 = arith.constant 0 : index
    %c0_58 = arith.constant 0 : index
    %62 = vector.load %arg8[%c0_56, %c0_57, %c0_58] : memref<7x1x7xbf16, #tpu.memory_space<vmem>>, vector<1x1x7xbf16>
    %63 = vector.shape_cast %62 : vector<1x1x7xbf16> to vector<1x7xbf16>
    %cst_59 = arith.constant dense<0.000000e+00> : vector<1x224xf32>
    %64 = tpu.matmul %63, %60, %cst_59 {dimension_numbers = #tpu.dot_dimension_numbers<[1], [0], [0], [1], [0, 0, 1, 1], [], []>} : vector<1x7xbf16>, vector<7x224xbf16>, vector<1x224xf32> -> vector<1x224xf32>
    %65 = arith.truncf %64 : vector<1x224xf32> to vector<1x224xbf16>
    %c0_60 = arith.constant 0 : index
    %c0_61 = arith.constant 0 : index
    %c0_62 = arith.constant 0 : index
    %66 = vector.load %arg9[%c0_60, %c0_61, %c0_62] : memref<7x224x64xbf16, #tpu.memory_space<vmem>>, vector<1x224x64xbf16>
    %67 = vector.shape_cast %66 : vector<1x224x64xbf16> to vector<224x64xbf16>
    %cst_63 = arith.constant dense<0.000000e+00> : vector<1x64xf32>
    %68 = tpu.matmul %65, %67, %cst_63 {dimension_numbers = #tpu.dot_dimension_numbers<[1], [0], [0], [1], [0, 0, 1, 1], [], []>} : vector<1x224xbf16>, vector<224x64xbf16>, vector<1x64xf32> -> vector<1x64xf32>
    %69 = arith.addf %61, %68 : vector<1x64xf32>
    %c1_64 = arith.constant 1 : index
    %c0_65 = arith.constant 0 : index
    %c0_66 = arith.constant 0 : index
    %70 = vector.load %arg8[%c1_64, %c0_65, %c0_66] : memref<7x1x7xbf16, #tpu.memory_space<vmem>>, vector<1x1x7xbf16>
    %71 = vector.shape_cast %70 : vector<1x1x7xbf16> to vector<1x7xbf16>
    %cst_67 = arith.constant dense<0.000000e+00> : vector<1x224xf32>
    %72 = tpu.matmul %71, %60, %cst_67 {dimension_numbers = #tpu.dot_dimension_numbers<[1], [0], [0], [1], [0, 0, 1, 1], [], []>} : vector<1x7xbf16>, vector<7x224xbf16>, vector<1x224xf32> -> vector<1x224xf32>
    %73 = arith.truncf %72 : vector<1x224xf32> to vector<1x224xbf16>
    %c1_68 = arith.constant 1 : index
    %c0_69 = arith.constant 0 : index
    %c0_70 = arith.constant 0 : index
    %74 = vector.load %arg9[%c1_68, %c0_69, %c0_70] : memref<7x224x64xbf16, #tpu.memory_space<vmem>>, vector<1x224x64xbf16>
    %75 = vector.shape_cast %74 : vector<1x224x64xbf16> to vector<224x64xbf16>
    %cst_71 = arith.constant dense<0.000000e+00> : vector<1x64xf32>
    %76 = tpu.matmul %73, %75, %cst_71 {dimension_numbers = #tpu.dot_dimension_numbers<[1], [0], [0], [1], [0, 0, 1, 1], [], []>} : vector<1x224xbf16>, vector<224x64xbf16>, vector<1x64xf32> -> vector<1x64xf32>
    %77 = arith.addf %69, %76 : vector<1x64xf32>
    %c2_72 = arith.constant 2 : index
    %c0_73 = arith.constant 0 : index
    %c0_74 = arith.constant 0 : index
    %78 = vector.load %arg8[%c2_72, %c0_73, %c0_74] : memref<7x1x7xbf16, #tpu.memory_space<vmem>>, vector<1x1x7xbf16>
    %79 = vector.shape_cast %78 : vector<1x1x7xbf16> to vector<1x7xbf16>
    %cst_75 = arith.constant dense<0.000000e+00> : vector<1x224xf32>
    %80 = tpu.matmul %79, %60, %cst_75 {dimension_numbers = #tpu.dot_dimension_numbers<[1], [0], [0], [1], [0, 0, 1, 1], [], []>} : vector<1x7xbf16>, vector<7x224xbf16>, vector<1x224xf32> -> vector<1x224xf32>
    %81 = arith.truncf %80 : vector<1x224xf32> to vector<1x224xbf16>
    %c2_76 = arith.constant 2 : index
    %c0_77 = arith.constant 0 : index
    %c0_78 = arith.constant 0 : index
    %82 = vector.load %arg9[%c2_76, %c0_77, %c0_78] : memref<7x224x64xbf16, #tpu.memory_space<vmem>>, vector<1x224x64xbf16>
    %83 = vector.shape_cast %82 : vector<1x224x64xbf16> to vector<224x64xbf16>
    %cst_79 = arith.constant dense<0.000000e+00> : vector<1x64xf32>
    %84 = tpu.matmul %81, %83, %cst_79 {dimension_numbers = #tpu.dot_dimension_numbers<[1], [0], [0], [1], [0, 0, 1, 1], [], []>} : vector<1x224xbf16>, vector<224x64xbf16>, vector<1x64xf32> -> vector<1x64xf32>
    %85 = arith.addf %77, %84 : vector<1x64xf32>
    %c3 = arith.constant 3 : index
    %c0_80 = arith.constant 0 : index
    %c0_81 = arith.constant 0 : index
    %86 = vector.load %arg8[%c3, %c0_80, %c0_81] : memref<7x1x7xbf16, #tpu.memory_space<vmem>>, vector<1x1x7xbf16>
    %87 = vector.shape_cast %86 : vector<1x1x7xbf16> to vector<1x7xbf16>
    %cst_82 = arith.constant dense<0.000000e+00> : vector<1x224xf32>
    %88 = tpu.matmul %87, %60, %cst_82 {dimension_numbers = #tpu.dot_dimension_numbers<[1], [0], [0], [1], [0, 0, 1, 1], [], []>} : vector<1x7xbf16>, vector<7x224xbf16>, vector<1x224xf32> -> vector<1x224xf32>
    %89 = arith.truncf %88 : vector<1x224xf32> to vector<1x224xbf16>
    %c3_83 = arith.constant 3 : index
    %c0_84 = arith.constant 0 : index
    %c0_85 = arith.constant 0 : index
    %90 = vector.load %arg9[%c3_83, %c0_84, %c0_85] : memref<7x224x64xbf16, #tpu.memory_space<vmem>>, vector<1x224x64xbf16>
    %91 = vector.shape_cast %90 : vector<1x224x64xbf16> to vector<224x64xbf16>
    %cst_86 = arith.constant dense<0.000000e+00> : vector<1x64xf32>
    %92 = tpu.matmul %89, %91, %cst_86 {dimension_numbers = #tpu.dot_dimension_numbers<[1], [0], [0], [1], [0, 0, 1, 1], [], []>} : vector<1x224xbf16>, vector<224x64xbf16>, vector<1x64xf32> -> vector<1x64xf32>
    %93 = arith.addf %85, %92 : vector<1x64xf32>
    %c4 = arith.constant 4 : index
    %c0_87 = arith.constant 0 : index
    %c0_88 = arith.constant 0 : index
    %94 = vector.load %arg8[%c4, %c0_87, %c0_88] : memref<7x1x7xbf16, #tpu.memory_space<vmem>>, vector<1x1x7xbf16>
    %95 = vector.shape_cast %94 : vector<1x1x7xbf16> to vector<1x7xbf16>
    %cst_89 = arith.constant dense<0.000000e+00> : vector<1x224xf32>
    %96 = tpu.matmul %95, %60, %cst_89 {dimension_numbers = #tpu.dot_dimension_numbers<[1], [0], [0], [1], [0, 0, 1, 1], [], []>} : vector<1x7xbf16>, vector<7x224xbf16>, vector<1x224xf32> -> vector<1x224xf32>
    %97 = arith.truncf %96 : vector<1x224xf32> to vector<1x224xbf16>
    %c4_90 = arith.constant 4 : index
    %c0_91 = arith.constant 0 : index
    %c0_92 = arith.constant 0 : index
    %98 = vector.load %arg9[%c4_90, %c0_91, %c0_92] : memref<7x224x64xbf16, #tpu.memory_space<vmem>>, vector<1x224x64xbf16>
    %99 = vector.shape_cast %98 : vector<1x224x64xbf16> to vector<224x64xbf16>
    %cst_93 = arith.constant dense<0.000000e+00> : vector<1x64xf32>
    %100 = tpu.matmul %97, %99, %cst_93 {dimension_numbers = #tpu.dot_dimension_numbers<[1], [0], [0], [1], [0, 0, 1, 1], [], []>} : vector<1x224xbf16>, vector<224x64xbf16>, vector<1x64xf32> -> vector<1x64xf32>
    %101 = arith.addf %93, %100 : vector<1x64xf32>
    %c5 = arith.constant 5 : index
    %c0_94 = arith.constant 0 : index
    %c0_95 = arith.constant 0 : index
    %102 = vector.load %arg8[%c5, %c0_94, %c0_95] : memref<7x1x7xbf16, #tpu.memory_space<vmem>>, vector<1x1x7xbf16>
    %103 = vector.shape_cast %102 : vector<1x1x7xbf16> to vector<1x7xbf16>
    %cst_96 = arith.constant dense<0.000000e+00> : vector<1x224xf32>
    %104 = tpu.matmul %103, %60, %cst_96 {dimension_numbers = #tpu.dot_dimension_numbers<[1], [0], [0], [1], [0, 0, 1, 1], [], []>} : vector<1x7xbf16>, vector<7x224xbf16>, vector<1x224xf32> -> vector<1x224xf32>
    %105 = arith.truncf %104 : vector<1x224xf32> to vector<1x224xbf16>
    %c5_97 = arith.constant 5 : index
    %c0_98 = arith.constant 0 : index
    %c0_99 = arith.constant 0 : index
    %106 = vector.load %arg9[%c5_97, %c0_98, %c0_99] : memref<7x224x64xbf16, #tpu.memory_space<vmem>>, vector<1x224x64xbf16>
    %107 = vector.shape_cast %106 : vector<1x224x64xbf16> to vector<224x64xbf16>
    %cst_100 = arith.constant dense<0.000000e+00> : vector<1x64xf32>
    %108 = tpu.matmul %105, %107, %cst_100 {dimension_numbers = #tpu.dot_dimension_numbers<[1], [0], [0], [1], [0, 0, 1, 1], [], []>} : vector<1x224xbf16>, vector<224x64xbf16>, vector<1x64xf32> -> vector<1x64xf32>
    %109 = arith.addf %101, %108 : vector<1x64xf32>
    %c6 = arith.constant 6 : index
    %c0_101 = arith.constant 0 : index
    %c0_102 = arith.constant 0 : index
    %110 = vector.load %arg8[%c6, %c0_101, %c0_102] : memref<7x1x7xbf16, #tpu.memory_space<vmem>>, vector<1x1x7xbf16>
    %111 = vector.shape_cast %110 : vector<1x1x7xbf16> to vector<1x7xbf16>
    %cst_103 = arith.constant dense<0.000000e+00> : vector<1x224xf32>
    %112 = tpu.matmul %111, %60, %cst_103 {dimension_numbers = #tpu.dot_dimension_numbers<[1], [0], [0], [1], [0, 0, 1, 1], [], []>} : vector<1x7xbf16>, vector<7x224xbf16>, vector<1x224xf32> -> vector<1x224xf32>
    %113 = arith.truncf %112 : vector<1x224xf32> to vector<1x224xbf16>
    %c6_104 = arith.constant 6 : index
    %c0_105 = arith.constant 0 : index
    %c0_106 = arith.constant 0 : index
    %114 = vector.load %arg9[%c6_104, %c0_105, %c0_106] : memref<7x224x64xbf16, #tpu.memory_space<vmem>>, vector<1x224x64xbf16>
    %115 = vector.shape_cast %114 : vector<1x224x64xbf16> to vector<224x64xbf16>
    %cst_107 = arith.constant dense<0.000000e+00> : vector<1x64xf32>
    %116 = tpu.matmul %113, %115, %cst_107 {dimension_numbers = #tpu.dot_dimension_numbers<[1], [0], [0], [1], [0, 0, 1, 1], [], []>} : vector<1x224xbf16>, vector<224x64xbf16>, vector<1x64xf32> -> vector<1x64xf32>
    %117 = arith.addf %109, %116 : vector<1x64xf32>
    %118 = arith.truncf %117 : vector<1x64xf32> to vector<1x64xbf16>
    %c0_108 = arith.constant 0 : index
    %c0_109 = arith.constant 0 : index
    %119 = vector.load %arg13[%c0_108, %c0_109] : memref<1x224xf32, #tpu.memory_space<vmem>>, vector<1x224xf32>
    %c0_110 = arith.constant 0 : index
    %c0_111 = arith.constant 0 : index
    %c0_112 = arith.constant 0 : index
    %120 = vector.load %arg11[%c0_110, %c0_111, %c0_112] : memref<7x7x1xbf16, #tpu.memory_space<vmem>>, vector<1x7x1xbf16>
    %121 = vector.shape_cast %120 : vector<1x7x1xbf16> to vector<7x1xbf16>
    %cst_113 = arith.constant dense<0.000000e+00> : vector<7x64xf32>
    %122 = tpu.matmul %121, %118, %cst_113 {dimension_numbers = #tpu.dot_dimension_numbers<[1], [0], [0], [1], [0, 0, 1, 1], [], []>} : vector<7x1xbf16>, vector<1x64xbf16>, vector<7x64xf32> -> vector<7x64xf32>
    %123 = arith.truncf %122 : vector<7x64xf32> to vector<7x64xbf16>
    %c0_114 = arith.constant 0 : index
    %c0_115 = arith.constant 0 : index
    %c0_116 = arith.constant 0 : index
    %124 = vector.load %arg12[%c0_114, %c0_115, %c0_116] : memref<7x64x224xbf16, #tpu.memory_space<vmem>>, vector<1x64x224xbf16>
    %125 = vector.shape_cast %124 : vector<1x64x224xbf16> to vector<64x224xbf16>
    %cst_117 = arith.constant dense<0.000000e+00> : vector<7x224xf32>
    %126 = tpu.matmul %123, %125, %cst_117 {dimension_numbers = #tpu.dot_dimension_numbers<[1], [0], [0], [1], [0, 0, 1, 1], [], []>} : vector<7x64xbf16>, vector<64x224xbf16>, vector<7x224xf32> -> vector<7x224xf32>
    %127 = vector.broadcast %119 : vector<1x224xf32> to vector<7x224xf32>
    %128 = arith.addf %127, %126 : vector<7x224xf32>
    %c1_118 = arith.constant 1 : index
    %c0_119 = arith.constant 0 : index
    %c0_120 = arith.constant 0 : index
    %129 = vector.load %arg11[%c1_118, %c0_119, %c0_120] : memref<7x7x1xbf16, #tpu.memory_space<vmem>>, vector<1x7x1xbf16>
    %130 = vector.shape_cast %129 : vector<1x7x1xbf16> to vector<7x1xbf16>
    %cst_121 = arith.constant dense<0.000000e+00> : vector<7x64xf32>
    %131 = tpu.matmul %130, %118, %cst_121 {dimension_numbers = #tpu.dot_dimension_numbers<[1], [0], [0], [1], [0, 0, 1, 1], [], []>} : vector<7x1xbf16>, vector<1x64xbf16>, vector<7x64xf32> -> vector<7x64xf32>
    %132 = arith.truncf %131 : vector<7x64xf32> to vector<7x64xbf16>
    %c1_122 = arith.constant 1 : index
    %c0_123 = arith.constant 0 : index
    %c0_124 = arith.constant 0 : index
    %133 = vector.load %arg12[%c1_122, %c0_123, %c0_124] : memref<7x64x224xbf16, #tpu.memory_space<vmem>>, vector<1x64x224xbf16>
    %134 = vector.shape_cast %133 : vector<1x64x224xbf16> to vector<64x224xbf16>
    %cst_125 = arith.constant dense<0.000000e+00> : vector<7x224xf32>
    %135 = tpu.matmul %132, %134, %cst_125 {dimension_numbers = #tpu.dot_dimension_numbers<[1], [0], [0], [1], [0, 0, 1, 1], [], []>} : vector<7x64xbf16>, vector<64x224xbf16>, vector<7x224xf32> -> vector<7x224xf32>
    %136 = arith.addf %128, %135 : vector<7x224xf32>
    %c2_126 = arith.constant 2 : index
    %c0_127 = arith.constant 0 : index
    %c0_128 = arith.constant 0 : index
    %137 = vector.load %arg11[%c2_126, %c0_127, %c0_128] : memref<7x7x1xbf16, #tpu.memory_space<vmem>>, vector<1x7x1xbf16>
    %138 = vector.shape_cast %137 : vector<1x7x1xbf16> to vector<7x1xbf16>
    %cst_129 = arith.constant dense<0.000000e+00> : vector<7x64xf32>
    %139 = tpu.matmul %138, %118, %cst_129 {dimension_numbers = #tpu.dot_dimension_numbers<[1], [0], [0], [1], [0, 0, 1, 1], [], []>} : vector<7x1xbf16>, vector<1x64xbf16>, vector<7x64xf32> -> vector<7x64xf32>
    %140 = arith.truncf %139 : vector<7x64xf32> to vector<7x64xbf16>
    %c2_130 = arith.constant 2 : index
    %c0_131 = arith.constant 0 : index
    %c0_132 = arith.constant 0 : index
    %141 = vector.load %arg12[%c2_130, %c0_131, %c0_132] : memref<7x64x224xbf16, #tpu.memory_space<vmem>>, vector<1x64x224xbf16>
    %142 = vector.shape_cast %141 : vector<1x64x224xbf16> to vector<64x224xbf16>
    %cst_133 = arith.constant dense<0.000000e+00> : vector<7x224xf32>
    %143 = tpu.matmul %140, %142, %cst_133 {dimension_numbers = #tpu.dot_dimension_numbers<[1], [0], [0], [1], [0, 0, 1, 1], [], []>} : vector<7x64xbf16>, vector<64x224xbf16>, vector<7x224xf32> -> vector<7x224xf32>
    %144 = arith.addf %136, %143 : vector<7x224xf32>
    %c3_134 = arith.constant 3 : index
    %c0_135 = arith.constant 0 : index
    %c0_136 = arith.constant 0 : index
    %145 = vector.load %arg11[%c3_134, %c0_135, %c0_136] : memref<7x7x1xbf16, #tpu.memory_space<vmem>>, vector<1x7x1xbf16>
    %146 = vector.shape_cast %145 : vector<1x7x1xbf16> to vector<7x1xbf16>
    %cst_137 = arith.constant dense<0.000000e+00> : vector<7x64xf32>
    %147 = tpu.matmul %146, %118, %cst_137 {dimension_numbers = #tpu.dot_dimension_numbers<[1], [0], [0], [1], [0, 0, 1, 1], [], []>} : vector<7x1xbf16>, vector<1x64xbf16>, vector<7x64xf32> -> vector<7x64xf32>
    %148 = arith.truncf %147 : vector<7x64xf32> to vector<7x64xbf16>
    %c3_138 = arith.constant 3 : index
    %c0_139 = arith.constant 0 : index
    %c0_140 = arith.constant 0 : index
    %149 = vector.load %arg12[%c3_138, %c0_139, %c0_140] : memref<7x64x224xbf16, #tpu.memory_space<vmem>>, vector<1x64x224xbf16>
    %150 = vector.shape_cast %149 : vector<1x64x224xbf16> to vector<64x224xbf16>
    %cst_141 = arith.constant dense<0.000000e+00> : vector<7x224xf32>
    %151 = tpu.matmul %148, %150, %cst_141 {dimension_numbers = #tpu.dot_dimension_numbers<[1], [0], [0], [1], [0, 0, 1, 1], [], []>} : vector<7x64xbf16>, vector<64x224xbf16>, vector<7x224xf32> -> vector<7x224xf32>
    %152 = arith.addf %144, %151 : vector<7x224xf32>
    %c4_142 = arith.constant 4 : index
    %c0_143 = arith.constant 0 : index
    %c0_144 = arith.constant 0 : index
    %153 = vector.load %arg11[%c4_142, %c0_143, %c0_144] : memref<7x7x1xbf16, #tpu.memory_space<vmem>>, vector<1x7x1xbf16>
    %154 = vector.shape_cast %153 : vector<1x7x1xbf16> to vector<7x1xbf16>
    %cst_145 = arith.constant dense<0.000000e+00> : vector<7x64xf32>
    %155 = tpu.matmul %154, %118, %cst_145 {dimension_numbers = #tpu.dot_dimension_numbers<[1], [0], [0], [1], [0, 0, 1, 1], [], []>} : vector<7x1xbf16>, vector<1x64xbf16>, vector<7x64xf32> -> vector<7x64xf32>
    %156 = arith.truncf %155 : vector<7x64xf32> to vector<7x64xbf16>
    %c4_146 = arith.constant 4 : index
    %c0_147 = arith.constant 0 : index
    %c0_148 = arith.constant 0 : index
    %157 = vector.load %arg12[%c4_146, %c0_147, %c0_148] : memref<7x64x224xbf16, #tpu.memory_space<vmem>>, vector<1x64x224xbf16>
    %158 = vector.shape_cast %157 : vector<1x64x224xbf16> to vector<64x224xbf16>
    %cst_149 = arith.constant dense<0.000000e+00> : vector<7x224xf32>
    %159 = tpu.matmul %156, %158, %cst_149 {dimension_numbers = #tpu.dot_dimension_numbers<[1], [0], [0], [1], [0, 0, 1, 1], [], []>} : vector<7x64xbf16>, vector<64x224xbf16>, vector<7x224xf32> -> vector<7x224xf32>
    %160 = arith.addf %152, %159 : vector<7x224xf32>
    %c5_150 = arith.constant 5 : index
    %c0_151 = arith.constant 0 : index
    %c0_152 = arith.constant 0 : index
    %161 = vector.load %arg11[%c5_150, %c0_151, %c0_152] : memref<7x7x1xbf16, #tpu.memory_space<vmem>>, vector<1x7x1xbf16>
    %162 = vector.shape_cast %161 : vector<1x7x1xbf16> to vector<7x1xbf16>
    %cst_153 = arith.constant dense<0.000000e+00> : vector<7x64xf32>
    %163 = tpu.matmul %162, %118, %cst_153 {dimension_numbers = #tpu.dot_dimension_numbers<[1], [0], [0], [1], [0, 0, 1, 1], [], []>} : vector<7x1xbf16>, vector<1x64xbf16>, vector<7x64xf32> -> vector<7x64xf32>
    %164 = arith.truncf %163 : vector<7x64xf32> to vector<7x64xbf16>
    %c5_154 = arith.constant 5 : index
    %c0_155 = arith.constant 0 : index
    %c0_156 = arith.constant 0 : index
    %165 = vector.load %arg12[%c5_154, %c0_155, %c0_156] : memref<7x64x224xbf16, #tpu.memory_space<vmem>>, vector<1x64x224xbf16>
    %166 = vector.shape_cast %165 : vector<1x64x224xbf16> to vector<64x224xbf16>
    %cst_157 = arith.constant dense<0.000000e+00> : vector<7x224xf32>
    %167 = tpu.matmul %164, %166, %cst_157 {dimension_numbers = #tpu.dot_dimension_numbers<[1], [0], [0], [1], [0, 0, 1, 1], [], []>} : vector<7x64xbf16>, vector<64x224xbf16>, vector<7x224xf32> -> vector<7x224xf32>
    %168 = arith.addf %160, %167 : vector<7x224xf32>
    %c6_158 = arith.constant 6 : index
    %c0_159 = arith.constant 0 : index
    %c0_160 = arith.constant 0 : index
    %169 = vector.load %arg11[%c6_158, %c0_159, %c0_160] : memref<7x7x1xbf16, #tpu.memory_space<vmem>>, vector<1x7x1xbf16>
    %170 = vector.shape_cast %169 : vector<1x7x1xbf16> to vector<7x1xbf16>
    %cst_161 = arith.constant dense<0.000000e+00> : vector<7x64xf32>
    %171 = tpu.matmul %170, %118, %cst_161 {dimension_numbers = #tpu.dot_dimension_numbers<[1], [0], [0], [1], [0, 0, 1, 1], [], []>} : vector<7x1xbf16>, vector<1x64xbf16>, vector<7x64xf32> -> vector<7x64xf32>
    %172 = arith.truncf %171 : vector<7x64xf32> to vector<7x64xbf16>
    %c6_162 = arith.constant 6 : index
    %c0_163 = arith.constant 0 : index
    %c0_164 = arith.constant 0 : index
    %173 = vector.load %arg12[%c6_162, %c0_163, %c0_164] : memref<7x64x224xbf16, #tpu.memory_space<vmem>>, vector<1x64x224xbf16>
    %174 = vector.shape_cast %173 : vector<1x64x224xbf16> to vector<64x224xbf16>
    %cst_165 = arith.constant dense<0.000000e+00> : vector<7x224xf32>
    %175 = tpu.matmul %172, %174, %cst_165 {dimension_numbers = #tpu.dot_dimension_numbers<[1], [0], [0], [1], [0, 0, 1, 1], [], []>} : vector<7x64xbf16>, vector<64x224xbf16>, vector<7x224xf32> -> vector<7x224xf32>
    %176 = arith.addf %168, %175 : vector<7x224xf32>
    %cst_166 = arith.constant 0.000000e+00 : f32
    %177 = vector.broadcast %cst_166 : f32 to vector<7x224xf32>
    %178 = arith.maximumf %176, %177 : vector<7x224xf32>
    %179 = arith.truncf %178 : vector<7x224xf32> to vector<7x224xbf16>
    %c0_167 = arith.constant 0 : index
    %c0_168 = arith.constant 0 : index
    %180 = vector.load %arg16[%c0_167, %c0_168] : memref<1x224xf32, #tpu.memory_space<vmem>>, vector<1x224xf32>
    %c0_169 = arith.constant 0 : index
    %c0_170 = arith.constant 0 : index
    %c0_171 = arith.constant 0 : index
    %181 = vector.load %arg14[%c0_169, %c0_170, %c0_171] : memref<3x14x7xbf16, #tpu.memory_space<vmem>>, vector<1x14x7xbf16>
    %182 = vector.shape_cast %181 : vector<1x14x7xbf16> to vector<14x7xbf16>
    %cst_172 = arith.constant dense<0.000000e+00> : vector<14x224xf32>
    %183 = tpu.matmul %182, %179, %cst_172 {dimension_numbers = #tpu.dot_dimension_numbers<[1], [0], [0], [1], [0, 0, 1, 1], [], []>} : vector<14x7xbf16>, vector<7x224xbf16>, vector<14x224xf32> -> vector<14x224xf32>
    %184 = arith.truncf %183 : vector<14x224xf32> to vector<14x224xbf16>
    %c0_173 = arith.constant 0 : index
    %c0_174 = arith.constant 0 : index
    %c0_175 = arith.constant 0 : index
    %185 = vector.load %arg15[%c0_173, %c0_174, %c0_175] : memref<3x224x224xbf16, #tpu.memory_space<vmem>>, vector<1x224x224xbf16>
    %186 = vector.shape_cast %185 : vector<1x224x224xbf16> to vector<224x224xbf16>
    %cst_176 = arith.constant dense<0.000000e+00> : vector<14x224xf32>
    %187 = tpu.matmul %184, %186, %cst_176 {dimension_numbers = #tpu.dot_dimension_numbers<[1], [0], [0], [1], [0, 0, 1, 1], [], []>} : vector<14x224xbf16>, vector<224x224xbf16>, vector<14x224xf32> -> vector<14x224xf32>
    %188 = vector.broadcast %180 : vector<1x224xf32> to vector<14x224xf32>
    %189 = arith.addf %188, %187 : vector<14x224xf32>
    %c1_177 = arith.constant 1 : index
    %c0_178 = arith.constant 0 : index
    %c0_179 = arith.constant 0 : index
    %190 = vector.load %arg14[%c1_177, %c0_178, %c0_179] : memref<3x14x7xbf16, #tpu.memory_space<vmem>>, vector<1x14x7xbf16>
    %191 = vector.shape_cast %190 : vector<1x14x7xbf16> to vector<14x7xbf16>
    %cst_180 = arith.constant dense<0.000000e+00> : vector<14x224xf32>
    %192 = tpu.matmul %191, %179, %cst_180 {dimension_numbers = #tpu.dot_dimension_numbers<[1], [0], [0], [1], [0, 0, 1, 1], [], []>} : vector<14x7xbf16>, vector<7x224xbf16>, vector<14x224xf32> -> vector<14x224xf32>
    %193 = arith.truncf %192 : vector<14x224xf32> to vector<14x224xbf16>
    %c1_181 = arith.constant 1 : index
    %c0_182 = arith.constant 0 : index
    %c0_183 = arith.constant 0 : index
    %194 = vector.load %arg15[%c1_181, %c0_182, %c0_183] : memref<3x224x224xbf16, #tpu.memory_space<vmem>>, vector<1x224x224xbf16>
    %195 = vector.shape_cast %194 : vector<1x224x224xbf16> to vector<224x224xbf16>
    %cst_184 = arith.constant dense<0.000000e+00> : vector<14x224xf32>
    %196 = tpu.matmul %193, %195, %cst_184 {dimension_numbers = #tpu.dot_dimension_numbers<[1], [0], [0], [1], [0, 0, 1, 1], [], []>} : vector<14x224xbf16>, vector<224x224xbf16>, vector<14x224xf32> -> vector<14x224xf32>
    %197 = arith.addf %189, %196 : vector<14x224xf32>
    %c2_185 = arith.constant 2 : index
    %c0_186 = arith.constant 0 : index
    %c0_187 = arith.constant 0 : index
    %198 = vector.load %arg14[%c2_185, %c0_186, %c0_187] : memref<3x14x7xbf16, #tpu.memory_space<vmem>>, vector<1x14x7xbf16>
    %199 = vector.shape_cast %198 : vector<1x14x7xbf16> to vector<14x7xbf16>
    %cst_188 = arith.constant dense<0.000000e+00> : vector<14x224xf32>
    %200 = tpu.matmul %199, %179, %cst_188 {dimension_numbers = #tpu.dot_dimension_numbers<[1], [0], [0], [1], [0, 0, 1, 1], [], []>} : vector<14x7xbf16>, vector<7x224xbf16>, vector<14x224xf32> -> vector<14x224xf32>
    %201 = arith.truncf %200 : vector<14x224xf32> to vector<14x224xbf16>
    %c2_189 = arith.constant 2 : index
    %c0_190 = arith.constant 0 : index
    %c0_191 = arith.constant 0 : index
    %202 = vector.load %arg15[%c2_189, %c0_190, %c0_191] : memref<3x224x224xbf16, #tpu.memory_space<vmem>>, vector<1x224x224xbf16>
    %203 = vector.shape_cast %202 : vector<1x224x224xbf16> to vector<224x224xbf16>
    %cst_192 = arith.constant dense<0.000000e+00> : vector<14x224xf32>
    %204 = tpu.matmul %201, %203, %cst_192 {dimension_numbers = #tpu.dot_dimension_numbers<[1], [0], [0], [1], [0, 0, 1, 1], [], []>} : vector<14x224xbf16>, vector<224x224xbf16>, vector<14x224xf32> -> vector<14x224xf32>
    %205 = arith.addf %197, %204 : vector<14x224xf32>
    %cst_193 = arith.constant 0.000000e+00 : f32
    %206 = vector.broadcast %cst_193 : f32 to vector<14x224xf32>
    %207 = arith.maximumf %205, %206 : vector<14x224xf32>
    %208 = arith.truncf %207 : vector<14x224xf32> to vector<14x224xbf16>
    %c0_194 = arith.constant 0 : index
    %c0_195 = arith.constant 0 : index
    %209 = vector.load %arg19[%c0_194, %c0_195] : memref<1x28xf32, #tpu.memory_space<vmem>>, vector<1x28xf32>
    %c0_196 = arith.constant 0 : index
    %c0_197 = arith.constant 0 : index
    %c0_198 = arith.constant 0 : index
    %210 = vector.load %arg17[%c0_196, %c0_197, %c0_198] : memref<3x28x14xbf16, #tpu.memory_space<vmem>>, vector<1x28x14xbf16>
    %211 = vector.shape_cast %210 : vector<1x28x14xbf16> to vector<28x14xbf16>
    %cst_199 = arith.constant dense<0.000000e+00> : vector<28x224xf32>
    %212 = tpu.matmul %211, %208, %cst_199 {dimension_numbers = #tpu.dot_dimension_numbers<[1], [0], [0], [1], [0, 0, 1, 1], [], []>} : vector<28x14xbf16>, vector<14x224xbf16>, vector<28x224xf32> -> vector<28x224xf32>
    %213 = arith.truncf %212 : vector<28x224xf32> to vector<28x224xbf16>
    %c0_200 = arith.constant 0 : index
    %c0_201 = arith.constant 0 : index
    %c0_202 = arith.constant 0 : index
    %214 = vector.load %arg18[%c0_200, %c0_201, %c0_202] : memref<3x224x28xbf16, #tpu.memory_space<vmem>>, vector<1x224x28xbf16>
    %215 = vector.shape_cast %214 : vector<1x224x28xbf16> to vector<224x28xbf16>
    %cst_203 = arith.constant dense<0.000000e+00> : vector<28x28xf32>
    %216 = tpu.matmul %213, %215, %cst_203 {dimension_numbers = #tpu.dot_dimension_numbers<[1], [0], [0], [1], [0, 0, 1, 1], [], []>} : vector<28x224xbf16>, vector<224x28xbf16>, vector<28x28xf32> -> vector<28x28xf32>
    %217 = vector.broadcast %209 : vector<1x28xf32> to vector<28x28xf32>
    %218 = arith.addf %217, %216 : vector<28x28xf32>
    %c1_204 = arith.constant 1 : index
    %c0_205 = arith.constant 0 : index
    %c0_206 = arith.constant 0 : index
    %219 = vector.load %arg17[%c1_204, %c0_205, %c0_206] : memref<3x28x14xbf16, #tpu.memory_space<vmem>>, vector<1x28x14xbf16>
    %220 = vector.shape_cast %219 : vector<1x28x14xbf16> to vector<28x14xbf16>
    %cst_207 = arith.constant dense<0.000000e+00> : vector<28x224xf32>
    %221 = tpu.matmul %220, %208, %cst_207 {dimension_numbers = #tpu.dot_dimension_numbers<[1], [0], [0], [1], [0, 0, 1, 1], [], []>} : vector<28x14xbf16>, vector<14x224xbf16>, vector<28x224xf32> -> vector<28x224xf32>
    %222 = arith.truncf %221 : vector<28x224xf32> to vector<28x224xbf16>
    %c1_208 = arith.constant 1 : index
    %c0_209 = arith.constant 0 : index
    %c0_210 = arith.constant 0 : index
    %223 = vector.load %arg18[%c1_208, %c0_209, %c0_210] : memref<3x224x28xbf16, #tpu.memory_space<vmem>>, vector<1x224x28xbf16>
    %224 = vector.shape_cast %223 : vector<1x224x28xbf16> to vector<224x28xbf16>
    %cst_211 = arith.constant dense<0.000000e+00> : vector<28x28xf32>
    %225 = tpu.matmul %222, %224, %cst_211 {dimension_numbers = #tpu.dot_dimension_numbers<[1], [0], [0], [1], [0, 0, 1, 1], [], []>} : vector<28x224xbf16>, vector<224x28xbf16>, vector<28x28xf32> -> vector<28x28xf32>
    %226 = arith.addf %218, %225 : vector<28x28xf32>
    %c2_212 = arith.constant 2 : index
    %c0_213 = arith.constant 0 : index
    %c0_214 = arith.constant 0 : index
    %227 = vector.load %arg17[%c2_212, %c0_213, %c0_214] : memref<3x28x14xbf16, #tpu.memory_space<vmem>>, vector<1x28x14xbf16>
    %228 = vector.shape_cast %227 : vector<1x28x14xbf16> to vector<28x14xbf16>
    %cst_215 = arith.constant dense<0.000000e+00> : vector<28x224xf32>
    %229 = tpu.matmul %228, %208, %cst_215 {dimension_numbers = #tpu.dot_dimension_numbers<[1], [0], [0], [1], [0, 0, 1, 1], [], []>} : vector<28x14xbf16>, vector<14x224xbf16>, vector<28x224xf32> -> vector<28x224xf32>
    %230 = arith.truncf %229 : vector<28x224xf32> to vector<28x224xbf16>
    %c2_216 = arith.constant 2 : index
    %c0_217 = arith.constant 0 : index
    %c0_218 = arith.constant 0 : index
    %231 = vector.load %arg18[%c2_216, %c0_217, %c0_218] : memref<3x224x28xbf16, #tpu.memory_space<vmem>>, vector<1x224x28xbf16>
    %232 = vector.shape_cast %231 : vector<1x224x28xbf16> to vector<224x28xbf16>
    %cst_219 = arith.constant dense<0.000000e+00> : vector<28x28xf32>
    %233 = tpu.matmul %230, %232, %cst_219 {dimension_numbers = #tpu.dot_dimension_numbers<[1], [0], [0], [1], [0, 0, 1, 1], [], []>} : vector<28x224xbf16>, vector<224x28xbf16>, vector<28x28xf32> -> vector<28x28xf32>
    %234 = arith.addf %226, %233 : vector<28x28xf32>
    %cst_220 = arith.constant 0.000000e+00 : f32
    %235 = vector.broadcast %cst_220 : f32 to vector<28x28xf32>
    %236 = arith.subf %235, %234 : vector<28x28xf32>
    %237 = math.exp %236 : vector<28x28xf32>
    %cst_221 = arith.constant 1.000000e+00 : f32
    %238 = vector.broadcast %cst_221 : f32 to vector<28x28xf32>
    %239 = arith.addf %238, %237 : vector<28x28xf32>
    %240 = tpu.reciprocal %239 {approx = true} : vector<28x28xf32> -> vector<28x28xf32>
    %cst_222 = arith.constant 0.000000e+00 : f32
    %cst_223 = arith.constant 1.000000e+00 : f32
    %241 = vector.broadcast %cst_222 : f32 to vector<28x28xf32>
    %242 = arith.maximumf %241, %240 : vector<28x28xf32>
    %243 = vector.broadcast %cst_223 : f32 to vector<28x28xf32>
    %244 = arith.minimumf %243, %242 : vector<28x28xf32>
    %c0_224 = arith.constant 0 : index
    %c0_225 = arith.constant 0 : index
    %c0_226 = arith.constant 0 : index
    %c0_227 = arith.constant 0 : index
    %245 = vector.load %arg20[%c0_224, %c0_225, %c0_226, %c0_227] : memref<1x1x28x28xf32, #tpu.memory_space<vmem>>, vector<1x1x28x28xf32>
    %246 = vector.shape_cast %245 : vector<1x1x28x28xf32> to vector<28x28xf32>
    %247 = vector.shape_cast %244 : vector<28x28xf32> to vector<1x1x28x28xf32>
    tpu.vector_store %arg20[%c0_224, %c0_225, %c0_226, %c0_227], %247 {strides = array<i32>} : memref<1x1x28x28xf32, #tpu.memory_space<vmem>>, vector<1x1x28x28xf32>,
    return
  }
  func.func @transform_0(%arg0: i32) -> (i32, i32, i32, i32) {
    %c0_i32 = arith.constant 0 : i32
    %c0_i32_0 = arith.constant 0 : i32
    %c0_i32_1 = arith.constant 0 : i32
    %c0_i32_2 = arith.constant 0 : i32
    return %arg0, %c0_i32, %c0_i32_0, %c0_i32_1 : i32, i32, i32, i32
  }
  func.func @transform_1(%arg0: i32) -> (i32, i32, i32) {
    %c0_i32 = arith.constant 0 : i32
    %c0_i32_0 = arith.constant 0 : i32
    %c0_i32_1 = arith.constant 0 : i32
    %c0_i32_2 = arith.constant 0 : i32
    return %c0_i32, %c0_i32_0, %c0_i32_1 : i32, i32, i32
  }
  func.func @transform_2(%arg0: i32) -> (i32, i32, i32) {
    %c0_i32 = arith.constant 0 : i32
    %c0_i32_0 = arith.constant 0 : i32
    %c0_i32_1 = arith.constant 0 : i32
    %c0_i32_2 = arith.constant 0 : i32
    return %c0_i32, %c0_i32_0, %c0_i32_1 : i32, i32, i32
  }
  func.func @transform_3(%arg0: i32) -> (i32, i32) {
    %c0_i32 = arith.constant 0 : i32
    %c0_i32_0 = arith.constant 0 : i32
    %c0_i32_1 = arith.constant 0 : i32
    return %c0_i32, %c0_i32_0 : i32, i32
  }
  func.func @transform_4(%arg0: i32) -> (i32, i32, i32) {
    %c0_i32 = arith.constant 0 : i32
    %c0_i32_0 = arith.constant 0 : i32
    %c0_i32_1 = arith.constant 0 : i32
    %c0_i32_2 = arith.constant 0 : i32
    return %c0_i32, %c0_i32_0, %c0_i32_1 : i32, i32, i32
  }
  func.func @transform_5(%arg0: i32) -> (i32, i32, i32) {
    %c0_i32 = arith.constant 0 : i32
    %c0_i32_0 = arith.constant 0 : i32
    %c0_i32_1 = arith.constant 0 : i32
    %c0_i32_2 = arith.constant 0 : i32
    return %c0_i32, %c0_i32_0, %c0_i32_1 : i32, i32, i32
  }
  func.func @transform_6(%arg0: i32) -> (i32, i32) {
    %c0_i32 = arith.constant 0 : i32
    %c0_i32_0 = arith.constant 0 : i32
    %c0_i32_1 = arith.constant 0 : i32
    return %c0_i32, %c0_i32_0 : i32, i32
  }
  func.func @transform_7(%arg0: i32) -> (i32, i32, i32) {
    %c0_i32 = arith.constant 0 : i32
    %c0_i32_0 = arith.constant 0 : i32
    %c0_i32_1 = arith.constant 0 : i32
    %c0_i32_2 = arith.constant 0 : i32
    return %c0_i32, %c0_i32_0, %c0_i32_1 : i32, i32, i32
  }
  func.func @transform_8(%arg0: i32) -> (i32, i32, i32) {
    %c0_i32 = arith.constant 0 : i32
    %c0_i32_0 = arith.constant 0 : i32
    %c0_i32_1 = arith.constant 0 : i32
    %c0_i32_2 = arith.constant 0 : i32
    return %c0_i32, %c0_i32_0, %c0_i32_1 : i32, i32, i32
  }
  func.func @transform_9(%arg0: i32) -> (i32, i32) {
    %c0_i32 = arith.constant 0 : i32
    %c0_i32_0 = arith.constant 0 : i32
    %c0_i32_1 = arith.constant 0 : i32
    return %c0_i32, %c0_i32_0 : i32, i32
  }
  func.func @transform_10(%arg0: i32) -> (i32, i32, i32) {
    %c0_i32 = arith.constant 0 : i32
    %c0_i32_0 = arith.constant 0 : i32
    %c0_i32_1 = arith.constant 0 : i32
    %c0_i32_2 = arith.constant 0 : i32
    return %c0_i32, %c0_i32_0, %c0_i32_1 : i32, i32, i32
  }
  func.func @transform_11(%arg0: i32) -> (i32, i32, i32) {
    %c0_i32 = arith.constant 0 : i32
    %c0_i32_0 = arith.constant 0 : i32
    %c0_i32_1 = arith.constant 0 : i32
    %c0_i32_2 = arith.constant 0 : i32
    return %c0_i32, %c0_i32_0, %c0_i32_1 : i32, i32, i32
  }
  func.func @transform_12(%arg0: i32) -> (i32, i32) {
    %c0_i32 = arith.constant 0 : i32
    %c0_i32_0 = arith.constant 0 : i32
    %c0_i32_1 = arith.constant 0 : i32
    return %c0_i32, %c0_i32_0 : i32, i32
  }
  func.func @transform_13(%arg0: i32) -> (i32, i32, i32) {
    %c0_i32 = arith.constant 0 : i32
    %c0_i32_0 = arith.constant 0 : i32
    %c0_i32_1 = arith.constant 0 : i32
    %c0_i32_2 = arith.constant 0 : i32
    return %c0_i32, %c0_i32_0, %c0_i32_1 : i32, i32, i32
  }
  func.func @transform_14(%arg0: i32) -> (i32, i32, i32) {
    %c0_i32 = arith.constant 0 : i32
    %c0_i32_0 = arith.constant 0 : i32
    %c0_i32_1 = arith.constant 0 : i32
    %c0_i32_2 = arith.constant 0 : i32
    return %c0_i32, %c0_i32_0, %c0_i32_1 : i32, i32, i32
  }
  func.func @transform_15(%arg0: i32) -> (i32, i32) {
    %c0_i32 = arith.constant 0 : i32
    %c0_i32_0 = arith.constant 0 : i32
    %c0_i32_1 = arith.constant 0 : i32
    return %c0_i32, %c0_i32_0 : i32, i32
  }
  func.func @transform_16(%arg0: i32) -> (i32, i32, i32) {
    %c0_i32 = arith.constant 0 : i32
    %c0_i32_0 = arith.constant 0 : i32
    %c0_i32_1 = arith.constant 0 : i32
    %c0_i32_2 = arith.constant 0 : i32
    return %c0_i32, %c0_i32_0, %c0_i32_1 : i32, i32, i32
  }
  func.func @transform_17(%arg0: i32) -> (i32, i32, i32) {
    %c0_i32 = arith.constant 0 : i32
    %c0_i32_0 = arith.constant 0 : i32
    %c0_i32_1 = arith.constant 0 : i32
    %c0_i32_2 = arith.constant 0 : i32
    return %c0_i32, %c0_i32_0, %c0_i32_1 : i32, i32, i32
  }
  func.func @transform_18(%arg0: i32) -> (i32, i32) {
    %c0_i32 = arith.constant 0 : i32
    %c0_i32_0 = arith.constant 0 : i32
    %c0_i32_1 = arith.constant 0 : i32
    return %c0_i32, %c0_i32_0 : i32, i32
  }
  func.func @transform_19(%arg0: i32) -> (i32, i32, i32, i32) {
    %c0_i32 = arith.constant 0 : i32
    %c0_i32_0 = arith.constant 0 : i32
    %c0_i32_1 = arith.constant 0 : i32
    %c0_i32_2 = arith.constant 0 : i32
    return %arg0, %c0_i32, %c0_i32_0, %c0_i32_1 : i32, i32, i32, i32
  }
}

</mosaic_0001>

<bundles_post_ra>
// kernel: autoencoder_forward.1
= control target key start
LH: loop header
LB: loop body
LE: loop exit
PB: predicated region body
PF: predicated region fallthrough
CT: control target
= control target key end

     0   :  { %s9753_s0 = inlined_call_operand.hbm [shape: f32[2,1,28,28], index: 0, kind: input, shape index: {}]   ;;  %s9754_s1 = inlined_call_operand.hbm [shape: bf16[3,14,28], index: 1, kind: input, shape index: {}]   ;;  %s9755_s2 = inlined_call_operand.hbm [shape: bf16[3,28,224], index: 2, kind: input, shape index: {}]   ;;  %s9756_s3 = inlined_call_operand.hbm [shape: f32[1,224], index: 3, kind: input, shape index: {}]   ;;  %s9757_s4 = inlined_call_operand.hbm [shape: bf16[3,7,14], index: 4, kind: input, shape index: {}]   ;;  %s9758_s5 = inlined_call_operand.hbm [shape: bf16[3,224,224], index: 5, kind: input, shape index: {}]   ;;  %s9759_s6 = inlined_call_operand.hbm [shape: f32[1,224], index: 6, kind: input, shape index: {}]   ;;  %s9760_s7 = inlined_call_operand.hbm [shape: bf16[7,1,7], index: 7, kind: input, shape index: {}]   ;;  %s9761_s8 = inlined_call_operand.hbm [shape: bf16[7,224,64], index: 8, kind: input, shape index: {}]   ;;  %s9762_s9 = inlined_call_operand.hbm [shape: f32[1,64], index: 9, kind: input, shape index: {}]   ;;  %s9763_s10 = inlined_call_operand.hbm [shape: bf16[7,7,1], index: 10, kind: input, shape index: {}]   ;;  %s9764_s11 = inlined_call_operand.hbm [shape: bf16[7,64,224], index: 11, kind: input, shape index: {}]   ;;  %s9765_s12 = inlined_call_operand.hbm [shape: f32[1,224], index: 12, kind: input, shape index: {}]   ;;  %s9766_s13 = inlined_call_operand.hbm [shape: bf16[3,14,7], index: 13, kind: input, shape index: {}]   ;;  %s9767_s14 = inlined_call_operand.hbm [shape: bf16[3,224,224], index: 14, kind: input, shape index: {}]   ;;  %s9768_s15 = inlined_call_operand.hbm [shape: f32[1,224], index: 15, kind: input, shape index: {}]   ;;  %s9769_s16 = inlined_call_operand.hbm [shape: bf16[3,28,14], index: 16, kind: input, shape index: {}]   ;;  %s9770_s17 = inlined_call_operand.hbm [shape: bf16[3,224,28], index: 17, kind: input, shape index: {}]   ;;  %s9771_s18 = inlined_call_operand.hbm [shape: f32[1,28], index: 18, kind: input, shape index: {}]   ;;  %s9772_s19 = inlined_call_operand.hbm [shape: f32[2,1,28,28], index: 19, kind: output, shape index: {}]  }
   0x1   :  { %9803 = sst [smem:[#allocation50_spill]] %s9753_s0 }
   0x2   :  { %9804 = sst [smem:[#allocation51_spill]] %s9754_s1 }
   0x3   :  { %9805 = sst [smem:[#allocation52_spill]] %s9755_s2 }
   0x4   :  { %9806 = sst [smem:[#allocation53_spill]] %s9756_s3 }
   0x5   :  { %9807 = sst [smem:[#allocation54_spill]] %s9757_s4 }
   0x6   :  { %9808 = sst [smem:[#allocation55_spill]] %s9758_s5 }
   0x7   :  { %9809 = sst [smem:[#allocation56_spill]] %s9759_s6 }
   0x8   :  { %9810 = sst [smem:[#allocation57_spill]] %s9767_s14 }
   0x9   :  { %9811 = sst [smem:[#allocation58_spill]] %s9769_s16 }
   0xa   :  { %9812 = sst [smem:[#allocation59_spill]] %s9771_s18 }
   0xb   :  { %9813 = sst [smem:[#allocation60_spill]] %s9772_s19 }
   0xc   :  { %24 = vsyncpa [#allocation3], 0 }
   0xd   :  { %26 = vsyncpa [#allocation3 + $0x1], 0 }
   0xe   :  { %27 = vsyncpa [#allocation6], 0 }
   0xf   :  { %28 = vsyncpa [#allocation9], 0 }
  0x10   :  { %29 = vsyncpa [#allocation12], 0 }
  0x11   :  { %30 = vsyncpa [#allocation15], 0 }
  0x12   :  { %31 = vsyncpa [#allocation18], 0 }
  0x13   :  { %32 = vsyncpa [#allocation21], 0 }
  0x14   :  { %33 = vsyncpa [#allocation24], 0 }
  0x15   :  { %34 = vsyncpa [#allocation27], 0 }
  0x16   :  { %35 = vsyncpa [#allocation30], 0 }
  0x17   :  { %36 = vsyncpa [#allocation4], 0 }
  0x18   :  { %38 = vsyncpa [#allocation4 + $0x1], 0  ;;  %s8688_s0 = smov 0   ;;  %s8690_s30 = smov 0  }
  0x19   :  { %s8692_s20 = smov 0   ;;  %s8694_s21 = smov 0  }
  0x1a LB: > { %9814 = sst [smem:[#allocation44_spill]] %s8542_s0  ;;  %s8556_s1 = smov [#allocation5]   ;;  %s8554_s21 = sphi %s8694_s21, %s9881_s21   ;;  %s8550_s20 = sphi %s8692_s20, %s9880_s20   ;;  %s8546_s30 = sphi %s8690_s30, %s9879_s30   ;;  %s8542_s0 = sphi %s8688_s0, %s9878_s0  }
  0x1b   : > { %9815 = sst [smem:[#allocation45_spill]] %s8546_s30  ;;  %s491_s22 = sshll.u32 %s8556_s1, 4  ;;  %s8714_s22 = int_to_ptr.vmem [resolvable:$true] %s491_s22 }
  0x1c   : > { %9816 = sst [smem:[#allocation46_spill]] %s8550_s20  ;;  %s8709_s2 = sadd.s32 4294967295, %s8554_s21  }
  0x1d   : > { %9817 = sst [smem:[#allocation47_spill]] %s8554_s21  ;;  %p6461_p0 = scmp.ge.s32.totalorder %s8554_s21, 1 }
  0x1e   : > { %9818 = sst [smem:[#allocation48_spill]] %s8709_s2  ;;  %p9789_p1 = scmp.eq.s32.totalorder %s8709_s2, 0 }
  0x1f   : > { %p479_p2 = scmp.lt.s32.totalorder %s8554_s21, 3  ;;  %s8557_s24 = smov [#allocation8]  }
  0x20   : > { %s518_s25 = sshll.u32 %s8557_s24, 4  ;;  %s8558_s26 = smov [#allocation11]   ;;  %s8729_s25 = int_to_ptr.vmem [resolvable:$true] %s518_s25 }
  0x21   : > { %p8716_p3 = pnand %p6461_p0, %p479_p2  ;;  %s8731_s27 = sshll.u32 %s8558_s26, 4  ;;  %s542_s27 = int_to_ptr.vmem [resolvable:$true] %s8731_s27 }
  0x22   : > { %s9822_s1 = sld [smem:[#allocation51_spill]] }
  0x23   : > { %s9819_s23 = scalar_select %p8716_p3, 1, 0 }
  0x24   : > { %p7233_p5 = pneg %p8716_p3 }
  0x25   : > { %9820 = sst [smem:[#allocation49_spill]] %s9819_s23 }
  0x26   : > { %p8725_p6 = pnand %p7233_p5, %p9789_p1 }
  0x28   : > { %s7918_s19 = scalar_lea.hbm %s9822_s1, 384  ;;  %p8741_p8 = pneg %p8725_p6 }
  0x29   : > { %p7919_p7 = scmp.ne.s32.totalorder %s9822_s1, %s7918_s19  ;;  %p7925_p11 = scmp.lt.u32.totalorder %s7918_s19, %s9822_s1 }
  0x2b   : > { %p7921_p9 = pnand %p8741_p8, %p7919_p7 }
  0x2d   : > { %p7922_p10 = pneg %p7921_p9 }
  0x2f   : > { %p7927_p12 = pnand %p7925_p11, %p7922_p10 }
  0x31   : > { %7930 = shalt.err (!%p7927_p12)
}
  0x32   : > { %s7931_s0 = scalar_lea.vmem %s8714_s22, 384  ;;  %p7939_p5 = scmp.lt.s32.totalorder %s8714_s22, %s8714_s22 }
  0x33   : > { %p7932_p13 = scmp.ne.s32.totalorder %s8714_s22, %s7931_s0  ;;  %p7940_p4 = scmp.lt.s32.totalorder %s7931_s0, %s7931_s0 }
  0x35   : > { %p7934_p0 = pnand %p7932_p13, %p8741_p8  ;;  %p7941_p7 = por %p7940_p4, %p7939_p5 }
  0x37   : > { %p7935_p2 = pneg %p7934_p0 }
  0x39   : > { %p7942_p9 = pnand %p7941_p7, %p7935_p2 }
  0x3b   : > { %7945 = shalt.err (!%p7942_p9)
}
  0x3c   : > { %s9791_s23 = smov 64   ;;  %s9793_s19 = smov 4  }
  0x3d   : > { %7236 = dma.hbm_to_vmem [thread:$0]  (!%p8725_p6), %s9822_s1, 384, %s8714_s22, [#allocation6], %s9791_s23, %s9791_s23, %s9793_s19  }
  0x3e   : > { %s9824_s30 = sld [smem:[#allocation53_spill]] }
  0x44   : > { %s9825_s18 = smov %s9824_s30  ;;  %s7946_s0 = scalar_lea.hbm %s9824_s30, 32 }
  0x45   : > { %p7947_p4 = scmp.ne.s32.totalorder %s9825_s18, %s7946_s0  ;;  %p7953_p12 = scmp.lt.u32.totalorder %s7946_s0, %s9825_s18 }
  0x47   : > { %p7949_p10 = pnand %p7947_p4, %p8741_p8 }
  0x49   : > { %p7950_p11 = pneg %p7949_p10 }
  0x4b   : > { %p7955_p13 = pnand %p7953_p12, %p7950_p11 }
  0x4d   : > { %7958 = shalt.err (!%p7955_p13)
}
  0x4e   : > { %s7959_s22 = scalar_lea.vmem %s8729_s25, 32  ;;  %p7967_p7 = scmp.lt.s32.totalorder %s8729_s25, %s8729_s25 }
  0x4f   : > { %p7960_p0 = scmp.ne.s32.totalorder %s8729_s25, %s7959_s22  ;;  %p7968_p9 = scmp.lt.s32.totalorder %s7959_s22, %s7959_s22 }
  0x51   : > { %p7962_p2 = pnand %p7960_p0, %p8741_p8  ;;  %p7969_p4 = por %p7968_p9, %p7967_p7 }
  0x53   : > { %p7963_p5 = pneg %p7962_p2 }
  0x55   : > { %p7970_p10 = pnand %p7969_p4, %p7963_p5 }
  0x57   : > { %7973 = shalt.err (!%p7970_p10)
}
  0x58   : > { %7242 = dma.hbm_to_vmem [thread:$0]  (!%p8725_p6), %s9825_s18, 32, %s8729_s25, [#allocation9]  }
  0x59   : > { %s9826_s5 = sld [smem:[#allocation55_spill]] }
  0x5f   : > { %s7974_s21 = scalar_lea.hbm %s9826_s5, 10752 }
  0x60   : > { %p7975_p11 = scmp.ne.s32.totalorder %s9826_s5, %s7974_s21  ;;  %p7981_p0 = scmp.lt.u32.totalorder %s7974_s21, %s9826_s5 }
  0x62   : > { %p7977_p12 = pnand %p7975_p11, %p8741_p8 }
  0x64   : > { %p7978_p13 = pneg %p7977_p12 }
  0x66   : > { %p7983_p2 = pnand %p7981_p0, %p7978_p13 }
  0x68   : > { %7986 = shalt.err (!%p7983_p2)
}
  0x69   : > { %s7987_s0 = scalar_lea.vmem %s542_s27, 10752  ;;  %p7995_p4 = scmp.lt.s32.totalorder %s542_s27, %s542_s27 }
  0x6a   : > { %p7988_p5 = scmp.ne.s32.totalorder %s542_s27, %s7987_s0  ;;  %p7996_p10 = scmp.lt.s32.totalorder %s7987_s0, %s7987_s0 }
  0x6c   : > { %p7990_p7 = pnand %p7988_p5, %p8741_p8  ;;  %p7997_p1 = por %p7996_p10, %p7995_p4 }
  0x6e   : > { %p7991_p9 = pneg %p7990_p7 }
  0x70   : > { %p7998_p3 = pnand %p7997_p1, %p7991_p9 }
  0x72   : > { %8001 = shalt.err (!%p7998_p3)
}
  0x73   : > { %s9795_s25 = smov 128   ;;  %s9797_s22 = smov 8  }
  0x74   : > { %7248 = dma.hbm_to_vmem [thread:$0]  (!%p8725_p6), %s9826_s5, 10752, %s542_s27, [#allocation12], %s9795_s25, %s9795_s25, %s9797_s22  }
  0x75   : > { %s8563_s30 = smov [#allocation14]   ;;  %s8002_s28 = scalar_lea.hbm %s9760_s7, 112 }
  0x76   : > { %s565_s20 = sshll.u32 %s8563_s30, 4  ;;  %p8003_p1 = scmp.ne.s32.totalorder %s9760_s7, %s8002_s28  ;;  %s566_s20 = int_to_ptr.vmem [resolvable:$true] %s565_s20 }
  0x77   : > { %p8009_p12 = scmp.lt.u32.totalorder %s8002_s28, %s9760_s7 }
  0x78   : > { %p8005_p3 = pnand %p8003_p1, %p8741_p8 }
  0x7a   : > { %p8006_p11 = pneg %p8005_p3 }
  0x7c   : > { %p8011_p13 = pnand %p8009_p12, %p8006_p11 }
  0x7e   : > { %8014 = shalt.err (!%p8011_p13)
}
  0x7f   : > { %s8015_s27 = scalar_lea.vmem %s566_s20, 112  ;;  %s8022_s14 = scalar_lea.vmem %s566_s20, 128 }
  0x80   : > { %p8016_p0 = scmp.ne.s32.totalorder %s566_s20, %s8015_s27  ;;  %p8023_p7 = scmp.lt.s32.totalorder %s566_s20, %s566_s20 }
  0x81   : > { %p8024_p9 = scmp.lt.s32.totalorder %s8022_s14, %s8015_s27 }
  0x82   : > { %p8018_p2 = pnand %p8016_p0, %p8741_p8 }
  0x83   : > { %p8025_p4 = por %p8024_p9, %p8023_p7 }
  0x84   : > { %p8019_p5 = pneg %p8018_p2 }
  0x86   : > { %p8026_p10 = pnand %p8025_p4, %p8019_p5 }
  0x88   : > { %8029 = shalt.err (!%p8026_p10)
}
  0x89   : > { %s8564_s16 = smov 16   ;;  %s8565_s30 = smov 1  }
  0x8a   : > { %7254 = dma.hbm_to_vmem [thread:$0]  (!%p8725_p6), %s9760_s7, 112, %s566_s20, [#allocation15], %s8564_s16, %s8564_s16, %s8565_s30  }
  0x8b   : > { %s8566_s2 = smov [#allocation17]   ;;  %s8567_s29 = smov [#allocation20]  }
  0x8c   : > { %s592_s28 = sshll.u32 %s8566_s2, 4  ;;  %s615_s26 = sshll.u32 %s8567_s29, 4  ;;  %s593_s28 = int_to_ptr.vmem [resolvable:$true] %s592_s28  ;;  %s8828_s26 = int_to_ptr.vmem [resolvable:$true] %s615_s26 }
  0x8d   : > { %s8030_s14 = scalar_lea.hbm %s9762_s9, 16 }
  0x8e   : > { %p8031_p1 = scmp.ne.s32.totalorder %s9762_s9, %s8030_s14  ;;  %p8037_p12 = scmp.lt.u32.totalorder %s8030_s14, %s9762_s9 }
  0x90   : > { %p8033_p3 = pnand %p8031_p1, %p8741_p8 }
  0x92   : > { %p8034_p11 = pneg %p8033_p3 }
  0x94   : > { %p8039_p13 = pnand %p8037_p12, %p8034_p11 }
  0x96   : > { %8042 = shalt.err (!%p8039_p13)
}
  0x97   : > { %s8043_s16 = scalar_lea.vmem %s593_s28, 16  ;;  %s8050_s30 = scalar_lea.vmem %s593_s28, 32 }
  0x98   : > { %p8044_p0 = scmp.ne.s32.totalorder %s593_s28, %s8043_s16  ;;  %p8051_p7 = scmp.lt.s32.totalorder %s593_s28, %s593_s28 }
  0x99   : > { %p8052_p9 = scmp.lt.s32.totalorder %s8050_s30, %s8043_s16 }
  0x9a   : > { %p8046_p2 = pnand %p8044_p0, %p8741_p8 }
  0x9b   : > { %p8053_p4 = por %p8052_p9, %p8051_p7 }
  0x9c   : > { %p8047_p5 = pneg %p8046_p2 }
  0x9e   : > { %p8054_p10 = pnand %p8053_p4, %p8047_p5 }
  0xa0   : > { %8057 = shalt.err (!%p8054_p10)
}
  0xa1   : > { %7260 = dma.hbm_to_vmem [thread:$0]  (!%p8725_p6), %s9762_s9, 16, %s593_s28, [#allocation18]  }
  0xa2   : > { %s8058_s29 = scalar_lea.hbm %s9764_s11, 7168 }
  0xa3   : > { %p8059_p1 = scmp.ne.s32.totalorder %s9764_s11, %s8058_s29  ;;  %p8065_p12 = scmp.lt.u32.totalorder %s8058_s29, %s9764_s11 }
  0xa5   : > { %p8061_p3 = pnand %p8059_p1, %p8741_p8 }
  0xa7   : > { %p8062_p11 = pneg %p8061_p3 }
  0xa9   : > { %p8067_p13 = pnand %p8065_p12, %p8062_p11 }
  0xab   : > { %8070 = shalt.err (!%p8067_p13)
}
  0xac   : > { %s8071_s28 = scalar_lea.vmem %s8828_s26, 7168  ;;  %p8079_p7 = scmp.lt.s32.totalorder %s8828_s26, %s8828_s26 }
  0xad   : > { %p8072_p0 = scmp.ne.s32.totalorder %s8828_s26, %s8071_s28  ;;  %p8080_p9 = scmp.lt.s32.totalorder %s8071_s28, %s8071_s28 }
  0xaf   : > { %p8074_p2 = pnand %p8072_p0, %p8741_p8  ;;  %p8081_p4 = por %p8080_p9, %p8079_p7 }
  0xb1   : > { %p8075_p5 = pneg %p8074_p2 }
  0xb3   : > { %p8082_p10 = pnand %p8081_p4, %p8075_p5 }
  0xb5   : > { %8085 = shalt.err (!%p8082_p10)
}
  0xb6   : > { %s9827_s20 = smov 128   ;;  %s8568_s19 = smov [#allocation23]  }
  0xb7   : > { %7266 = dma.hbm_to_vmem [thread:$0]  (!%p8725_p6), %s9764_s11, 7168, %s8828_s26, [#allocation21], %s9827_s20, %s9827_s20, %s9797_s22  }
  0xb8   : > { %s639_s25 = sshll.u32 %s8568_s19, 4  ;;  %s8569_s21 = smov [#allocation26]   ;;  %s640_s25 = int_to_ptr.vmem [resolvable:$true] %s639_s25 }
  0xb9   : > { %s666_s2 = sshll.u32 %s8569_s21, 4  ;;  %s8086_s27 = scalar_lea.hbm %s9766_s13, 384  ;;  %s8874_s2 = int_to_ptr.vmem [resolvable:$true] %s666_s2 }
  0xba   : > { %p8087_p1 = scmp.ne.s32.totalorder %s9766_s13, %s8086_s27  ;;  %p8093_p12 = scmp.lt.u32.totalorder %s8086_s27, %s9766_s13 }
  0xbc   : > { %p8089_p3 = pnand %p8087_p1, %p8741_p8 }
  0xbe   : > { %p8090_p11 = pneg %p8089_p3 }
  0xc0   : > { %p8095_p13 = pnand %p8093_p12, %p8090_p11 }
  0xc2   : > { %8098 = shalt.err (!%p8095_p13)
}
  0xc3   : > { %s8099_s16 = scalar_lea.vmem %s640_s25, 384  ;;  %p8107_p7 = scmp.lt.s32.totalorder %s640_s25, %s640_s25 }
  0xc4   : > { %p8100_p0 = scmp.ne.s32.totalorder %s640_s25, %s8099_s16  ;;  %p8108_p9 = scmp.lt.s32.totalorder %s8099_s16, %s8099_s16 }
  0xc6   : > { %p8102_p2 = pnand %p8100_p0, %p8741_p8  ;;  %p8109_p4 = por %p8108_p9, %p8107_p7 }
  0xc8   : > { %p8103_p5 = pneg %p8102_p2 }
  0xca   : > { %p8110_p10 = pnand %p8109_p4, %p8103_p5 }
  0xcc   : > { %8113 = shalt.err (!%p8110_p10)
}
  0xcd   : > { %s9828_s30 = smov 4   ;;  %s9829_s19 = smov 64  }
  0xce   : > { %7272 = dma.hbm_to_vmem [thread:$0]  (!%p8725_p6), %s9766_s13, 384, %s640_s25, [#allocation24], %s9829_s19, %s9829_s19, %s9828_s30  }
  0xcf   : > { %s8114_s14 = scalar_lea.hbm %s9768_s15, 32 }
  0xd0   : > { %p8115_p1 = scmp.ne.s32.totalorder %s9768_s15, %s8114_s14  ;;  %p8121_p12 = scmp.lt.u32.totalorder %s8114_s14, %s9768_s15 }
  0xd2   : > { %p8117_p3 = pnand %p8115_p1, %p8741_p8 }
  0xd4   : > { %p8118_p11 = pneg %p8117_p3 }
  0xd6   : > { %p8123_p13 = pnand %p8121_p12, %p8118_p11 }
  0xd8   : > { %8126 = shalt.err (!%p8123_p13)
}
  0xd9   : > { %s8127_s25 = scalar_lea.vmem %s8874_s2, 32  ;;  %p8135_p7 = scmp.lt.s32.totalorder %s8874_s2, %s8874_s2 }
  0xda   : > { %p8128_p0 = scmp.ne.s32.totalorder %s8874_s2, %s8127_s25  ;;  %p8136_p9 = scmp.lt.s32.totalorder %s8127_s25, %s8127_s25 }
  0xdc   : > { %p8130_p2 = pnand %p8128_p0, %p8741_p8  ;;  %p8137_p4 = por %p8136_p9, %p8135_p7 }
  0xde   : > { %p8131_p5 = pneg %p8130_p2 }
  0xe0   : > { %p8138_p10 = pnand %p8137_p4, %p8131_p5 }
  0xe2   : > { %8141 = shalt.err (!%p8138_p10)
}
  0xe3   : > { %7278 = dma.hbm_to_vmem [thread:$0]  (!%p8725_p6), %s9768_s15, 32, %s8874_s2, [#allocation27]  }
  0xe4   : > { %s8570_s0 = smov [#allocation29]   ;;  %s8571_s14 = smov [#allocation7]  }
  0xe5   : > { %s689_s27 = sshll.u32 %s8570_s0, 4  ;;  %s504_s23 = sshll.u32 %s8571_s14, 4  ;;  %s690_s27 = int_to_ptr.vmem [resolvable:$true] %s689_s27  ;;  %s8920_s23 = int_to_ptr.vmem [resolvable:$true] %s504_s23 }
  0xe6   : > { %s8142_s16 = scalar_lea.hbm %s9770_s17, 5376 }
  0xe7   : > { %p8143_p1 = scmp.ne.s32.totalorder %s9770_s17, %s8142_s16  ;;  %p8149_p12 = scmp.lt.u32.totalorder %s8142_s16, %s9770_s17 }
  0xe9   : > { %p8145_p3 = pnand %p8143_p1, %p8741_p8 }
  0xeb   : > { %p8146_p11 = pneg %p8145_p3 }
  0xed   : > { %p8151_p13 = pnand %p8149_p12, %p8146_p11 }
  0xef   : > { %8154 = shalt.err (!%p8151_p13)
}
  0xf0   : > { %s8155_s29 = scalar_lea.vmem %s690_s27, 5376  ;;  %p8163_p7 = scmp.lt.s32.totalorder %s690_s27, %s690_s27 }
  0xf1   : > { %p8156_p0 = scmp.ne.s32.totalorder %s690_s27, %s8155_s29  ;;  %p8164_p9 = scmp.lt.s32.totalorder %s8155_s29, %s8155_s29 }
  0xf3   : > { %p8158_p2 = pnand %p8156_p0, %p8741_p8  ;;  %p8165_p4 = por %p8164_p9, %p8163_p7 }
  0xf5   : > { %p8159_p5 = pneg %p8158_p2 }
  0xf7   : > { %p8166_p10 = pnand %p8165_p4, %p8159_p5 }
  0xf9   : > { %8169 = shalt.err (!%p8166_p10)
}
  0xfa   : > { %7284 = dma.hbm_to_vmem [thread:$0]  (!%p8725_p6), %s9770_s17, 5376, %s690_s27, [#allocation30], %s9829_s19, %s9829_s19, %s9828_s30  }
  0xfb   : > { %s9830_s26 = sld [smem:[#allocation52_spill]] }
 0x101   : > { %s8170_s16 = scalar_lea.hbm %s9830_s26, 1536 }
 0x102   : > { %p8171_p1 = scmp.ne.s32.totalorder %s9830_s26, %s8170_s16  ;;  %p8177_p12 = scmp.lt.u32.totalorder %s8170_s16, %s9830_s26 }
 0x104   : > { %p8173_p3 = pnand %p8171_p1, %p8741_p8 }
 0x106   : > { %p8174_p11 = pneg %p8173_p3 }
 0x108   : > { %p8179_p13 = pnand %p8177_p12, %p8174_p11 }
 0x10a   : > { %8182 = shalt.err (!%p8179_p13)
}
 0x10b   : > { %s8183_s27 = scalar_lea.vmem %s8920_s23, 1536  ;;  %p8191_p7 = scmp.lt.s32.totalorder %s8920_s23, %s8920_s23 }
 0x10c   : > { %p8184_p0 = scmp.ne.s32.totalorder %s8920_s23, %s8183_s27  ;;  %p8192_p9 = scmp.lt.s32.totalorder %s8183_s27, %s8183_s27 }
 0x10e   : > { %p8186_p2 = pnand %p8184_p0, %p8741_p8  ;;  %p8193_p4 = por %p8192_p9, %p8191_p7 }
 0x110   : > { %p8187_p5 = pneg %p8186_p2 }
 0x112   : > { %p8194_p10 = pnand %p8193_p4, %p8187_p5 }
 0x114   : > { %8197 = shalt.err (!%p8194_p10)
}
 0x115   : > { %s9831_s22 = smov 8   ;;  %s8572_s28 = smov [#allocation10]  }
 0x116   : > { %7239 = dma.hbm_to_vmem [thread:$0]  (!%p8725_p6), %s9830_s26, 1536, %s8920_s23, [#allocation6], %s9827_s20, %s9827_s20, %s9831_s22  }
 0x117   : > { %s528_s16 = sshll.u32 %s8572_s28, 4  ;;  %s8573_s25 = smov [#allocation13]   ;;  %s529_s16 = int_to_ptr.vmem [resolvable:$true] %s528_s16 }
 0x118   : > { %s555_s21 = sshll.u32 %s8573_s25, 4  ;;  %s9832_s4 = sld [smem:[#allocation54_spill]]  ;;  %s8969_s21 = int_to_ptr.vmem [resolvable:$true] %s555_s21 }
 0x11e   : > { %s8198_s27 = scalar_lea.hbm %s9832_s4, 192 }
 0x11f   : > { %p8199_p1 = scmp.ne.s32.totalorder %s9832_s4, %s8198_s27  ;;  %p8205_p12 = scmp.lt.u32.totalorder %s8198_s27, %s9832_s4 }
 0x121   : > { %p8201_p3 = pnand %p8199_p1, %p8741_p8 }
 0x123   : > { %p8202_p11 = pneg %p8201_p3 }
 0x125   : > { %p8207_p13 = pnand %p8205_p12, %p8202_p11 }
 0x127   : > { %8210 = shalt.err (!%p8207_p13)
}
 0x128   : > { %s8211_s14 = scalar_lea.vmem %s529_s16, 192  ;;  %p8219_p7 = scmp.lt.s32.totalorder %s529_s16, %s529_s16 }
 0x129   : > { %p8212_p0 = scmp.ne.s32.totalorder %s529_s16, %s8211_s14  ;;  %p8220_p9 = scmp.lt.s32.totalorder %s8211_s14, %s8211_s14 }
 0x12b   : > { %p8214_p2 = pnand %p8212_p0, %p8741_p8  ;;  %p8221_p4 = por %p8220_p9, %p8219_p7 }
 0x12d   : > { %p8215_p5 = pneg %p8214_p2 }
 0x12f   : > { %p8222_p10 = pnand %p8221_p4, %p8215_p5 }
 0x131   : > { %8225 = shalt.err (!%p8222_p10)
}
 0x132   : > { %7245 = dma.hbm_to_vmem [thread:$0]  (!%p8725_p6), %s9832_s4, 192, %s529_s16, [#allocation9], %s9829_s19, %s9829_s19, %s9828_s30  }
 0x133   : > { %s9833_s6 = sld [smem:[#allocation56_spill]] }
 0x139   : > { %s8226_s2 = scalar_lea.hbm %s9833_s6, 32 }
 0x13a   : > { %p8227_p1 = scmp.ne.s32.totalorder %s9833_s6, %s8226_s2  ;;  %p8233_p12 = scmp.lt.u32.totalorder %s8226_s2, %s9833_s6 }
 0x13c   : > { %p8229_p3 = pnand %p8227_p1, %p8741_p8 }
 0x13e   : > { %p8230_p11 = pneg %p8229_p3 }
 0x140   : > { %p8235_p13 = pnand %p8233_p12, %p8230_p11 }
 0x142   : > { %8238 = shalt.err (!%p8235_p13)
}
 0x143   : > { %s8239_s16 = scalar_lea.vmem %s8969_s21, 32  ;;  %p8247_p7 = scmp.lt.s32.totalorder %s8969_s21, %s8969_s21 }
 0x144   : > { %p8240_p0 = scmp.ne.s32.totalorder %s8969_s21, %s8239_s16  ;;  %p8248_p9 = scmp.lt.s32.totalorder %s8239_s16, %s8239_s16 }
 0x146   : > { %p8242_p2 = pnand %p8240_p0, %p8741_p8  ;;  %p8249_p4 = por %p8248_p9, %p8247_p7 }
 0x148   : > { %p8243_p5 = pneg %p8242_p2 }
 0x14a   : > { %p8250_p10 = pnand %p8249_p4, %p8243_p5 }
 0x14c   : > { %8253 = shalt.err (!%p8250_p10)
}
 0x14d   : > { %7251 = dma.hbm_to_vmem [thread:$0]  (!%p8725_p6), %s9833_s6, 32, %s8969_s21, [#allocation12]  }
 0x14e   : > { %s8574_s1 = smov [#allocation16]   ;;  %s8575_s25 = smov [#allocation19]  }
 0x14f   : > { %s578_s28 = sshll.u32 %s8574_s1, 4  ;;  %s602_s2 = sshll.u32 %s8575_s25, 4  ;;  %s579_s28 = int_to_ptr.vmem [resolvable:$true] %s578_s28  ;;  %s9015_s2 = int_to_ptr.vmem [resolvable:$true] %s602_s2 }
 0x150   : > { %s8254_s0 = scalar_lea.hbm %s9761_s8, 12544 }
 0x151   : > { %p8255_p1 = scmp.ne.s32.totalorder %s9761_s8, %s8254_s0  ;;  %p8261_p12 = scmp.lt.u32.totalorder %s8254_s0, %s9761_s8 }
 0x153   : > { %p8257_p3 = pnand %p8255_p1, %p8741_p8 }
 0x155   : > { %p8258_p11 = pneg %p8257_p3 }
 0x157   : > { %p8263_p13 = pnand %p8261_p12, %p8258_p11 }
 0x159   : > { %8266 = shalt.err (!%p8263_p13)
}
 0x15a   : > { %s8267_s5 = scalar_lea.vmem %s579_s28, 12544  ;;  %p8275_p7 = scmp.lt.s32.totalorder %s579_s28, %s579_s28 }
 0x15b   : > { %p8268_p0 = scmp.ne.s32.totalorder %s579_s28, %s8267_s5  ;;  %p8276_p9 = scmp.lt.s32.totalorder %s8267_s5, %s8267_s5 }
 0x15d   : > { %p8270_p2 = pnand %p8268_p0, %p8741_p8  ;;  %p8277_p4 = por %p8276_p9, %p8275_p7 }
 0x15f   : > { %p8271_p5 = pneg %p8270_p2 }
 0x161   : > { %p8278_p10 = pnand %p8277_p4, %p8271_p5 }
 0x163   : > { %8281 = shalt.err (!%p8278_p10)
}
 0x164   : > { %7257 = dma.hbm_to_vmem [thread:$0]  (!%p8725_p6), %s9761_s8, 12544, %s579_s28, [#allocation15], %s9829_s19, %s9829_s19, %s9828_s30  }
 0x165   : > { %s8282_s0 = scalar_lea.hbm %s9763_s10, 448 }
 0x166   : > { %p8283_p1 = scmp.ne.s32.totalorder %s9763_s10, %s8282_s0  ;;  %p8289_p12 = scmp.lt.u32.totalorder %s8282_s0, %s9763_s10 }
 0x168   : > { %p8285_p3 = pnand %p8283_p1, %p8741_p8 }
 0x16a   : > { %p8286_p11 = pneg %p8285_p3 }
 0x16c   : > { %p8291_p13 = pnand %p8289_p12, %p8286_p11 }
 0x16e   : > { %8294 = shalt.err (!%p8291_p13)
}
 0x16f   : > { %s8295_s28 = scalar_lea.vmem %s9015_s2, 448  ;;  %p8303_p7 = scmp.lt.s32.totalorder %s9015_s2, %s9015_s2 }
 0x170   : > { %p8296_p0 = scmp.ne.s32.totalorder %s9015_s2, %s8295_s28  ;;  %p8304_p9 = scmp.lt.s32.totalorder %s8295_s28, %s8295_s28 }
 0x172   : > { %p8298_p2 = pnand %p8296_p0, %p8741_p8  ;;  %p8305_p4 = por %p8304_p9, %p8303_p7 }
 0x174   : > { %p8299_p5 = pneg %p8298_p2 }
 0x176   : > { %p8306_p10 = pnand %p8305_p4, %p8299_p5 }
 0x178   : > { %8309 = shalt.err (!%p8306_p10)
}
 0x179   : > { %7263 = dma.hbm_to_vmem [thread:$0]  (!%p8725_p6), %s9763_s10, 448, %s9015_s2, [#allocation18], %s9829_s19, %s9829_s19, %s9828_s30  }
 0x17a   : > { %s8576_s25 = smov [#allocation22]   ;;  %s8577_s27 = smov [#allocation25]  }
 0x17b   : > { %s629_s29 = sshll.u32 %s8576_s25, 4  ;;  %s652_s0 = sshll.u32 %s8577_s27, 4  ;;  %s630_s29 = int_to_ptr.vmem [resolvable:$true] %s629_s29  ;;  %s9064_s0 = int_to_ptr.vmem [resolvable:$true] %s652_s0 }
 0x17c   : > { %s8310_s14 = scalar_lea.hbm %s9765_s12, 32 }
 0x17d   : > { %p8311_p1 = scmp.ne.s32.totalorder %s9765_s12, %s8310_s14  ;;  %p8317_p12 = scmp.lt.u32.totalorder %s8310_s14, %s9765_s12 }
 0x17f   : > { %p8313_p3 = pnand %p8311_p1, %p8741_p8 }
 0x181   : > { %p8314_p11 = pneg %p8313_p3 }
 0x183   : > { %p8319_p13 = pnand %p8317_p12, %p8314_p11 }
 0x185   : > { %8322 = shalt.err (!%p8319_p13)
}
 0x186   : > { %s8323_s1 = scalar_lea.vmem %s630_s29, 32  ;;  %p8331_p7 = scmp.lt.s32.totalorder %s630_s29, %s630_s29 }
 0x187   : > { %p8324_p0 = scmp.ne.s32.totalorder %s630_s29, %s8323_s1  ;;  %p8332_p9 = scmp.lt.s32.totalorder %s8323_s1, %s8323_s1 }
 0x189   : > { %p8326_p2 = pnand %p8324_p0, %p8741_p8  ;;  %p8333_p4 = por %p8332_p9, %p8331_p7 }
 0x18b   : > { %p8327_p5 = pneg %p8326_p2 }
 0x18d   : > { %p8334_p10 = pnand %p8333_p4, %p8327_p5 }
 0x18f   : > { %8337 = shalt.err (!%p8334_p10)
}
 0x190   : > { %7269 = dma.hbm_to_vmem [thread:$0]  (!%p8725_p6), %s9765_s12, 32, %s630_s29, [#allocation21]  }
 0x191   : > { %s9834_s14 = sld [smem:[#allocation57_spill]] }
 0x197   : > { %s8338_s21 = scalar_lea.hbm %s9834_s14, 10752 }
 0x198   : > { %p8339_p1 = scmp.ne.s32.totalorder %s9834_s14, %s8338_s21  ;;  %p8345_p12 = scmp.lt.u32.totalorder %s8338_s21, %s9834_s14 }
 0x19a   : > { %p8341_p3 = pnand %p8339_p1, %p8741_p8 }
 0x19c   : > { %p8342_p11 = pneg %p8341_p3 }
 0x19e   : > { %p8347_p13 = pnand %p8345_p12, %p8342_p11 }
 0x1a0   : > { %8350 = shalt.err (!%p8347_p13)
}
 0x1a1   : > { %s8351_s29 = scalar_lea.vmem %s9064_s0, 10752  ;;  %p8359_p7 = scmp.lt.s32.totalorder %s9064_s0, %s9064_s0 }
 0x1a2   : > { %p8352_p0 = scmp.ne.s32.totalorder %s9064_s0, %s8351_s29  ;;  %p8360_p9 = scmp.lt.s32.totalorder %s8351_s29, %s8351_s29 }
 0x1a4   : > { %p8354_p2 = pnand %p8352_p0, %p8741_p8  ;;  %p8361_p4 = por %p8360_p9, %p8359_p7 }
 0x1a6   : > { %p8355_p5 = pneg %p8354_p2 }
 0x1a8   : > { %p8362_p10 = pnand %p8361_p4, %p8355_p5 }
 0x1aa   : > { %8365 = shalt.err (!%p8362_p10)
}
 0x1ab   : > { %7275 = dma.hbm_to_vmem [thread:$0]  (!%p8725_p6), %s9834_s14, 10752, %s9064_s0, [#allocation24], %s9827_s20, %s9827_s20, %s9831_s22  }
 0x1ac   : > { %s8578_s23 = smov [#allocation28]   ;;  %s8579_s21 = smov [#allocation31]  }
 0x1ad   : > { %s676_s16 = sshll.u32 %s8578_s23, 4  ;;  %s703_s28 = sshll.u32 %s8579_s21, 4  ;;  %s677_s16 = int_to_ptr.vmem [resolvable:$true] %s676_s16  ;;  %s9110_s28 = int_to_ptr.vmem [resolvable:$true] %s703_s28 }
 0x1ae   : > { %s9835_s1 = sld [smem:[#allocation58_spill]] }
 0x1b4   : > { %s8366_s29 = scalar_lea.hbm %s9835_s1, 768 }
 0x1b5   : > { %p8367_p1 = scmp.ne.s32.totalorder %s9835_s1, %s8366_s29  ;;  %p8373_p12 = scmp.lt.u32.totalorder %s8366_s29, %s9835_s1 }
 0x1b7   : > { %p8369_p3 = pnand %p8367_p1, %p8741_p8 }
 0x1b9   : > { %p8370_p11 = pneg %p8369_p3 }
 0x1bb   : > { %p8375_p13 = pnand %p8373_p12, %p8370_p11 }
 0x1bd   : > { %8378 = shalt.err (!%p8375_p13)
}
 0x1be   : > { %s8379_s27 = scalar_lea.vmem %s677_s16, 768  ;;  %p8387_p7 = scmp.lt.s32.totalorder %s677_s16, %s677_s16 }
 0x1bf   : > { %p8380_p0 = scmp.ne.s32.totalorder %s677_s16, %s8379_s27  ;;  %p8388_p9 = scmp.lt.s32.totalorder %s8379_s27, %s8379_s27 }
 0x1c1   : > { %p8382_p2 = pnand %p8380_p0, %p8741_p8  ;;  %p8389_p4 = por %p8388_p9, %p8387_p7 }
 0x1c3   : > { %p8383_p5 = pneg %p8382_p2 }
 0x1c5   : > { %p8390_p10 = pnand %p8389_p4, %p8383_p5 }
 0x1c7   : > { %8393 = shalt.err (!%p8390_p10)
}
 0x1c8   : > { %7281 = dma.hbm_to_vmem [thread:$0]  (!%p8725_p6), %s9835_s1, 768, %s677_s16, [#allocation27], %s9829_s19, %s9829_s19, %s9828_s30  }
 0x1c9   : > { %s9836_s5 = sld [smem:[#allocation59_spill]] }
 0x1cf   : > { %s8394_s2 = scalar_lea.hbm %s9836_s5, 16 }
 0x1d0   : > { %p8395_p1 = scmp.ne.s32.totalorder %s9836_s5, %s8394_s2  ;;  %p8401_p12 = scmp.lt.u32.totalorder %s8394_s2, %s9836_s5 }
 0x1d2   : > { %p8397_p3 = pnand %p8395_p1, %p8741_p8 }
 0x1d4   : > { %p8398_p11 = pneg %p8397_p3 }
 0x1d6   : > { %p8403_p13 = pnand %p8401_p12, %p8398_p11 }
 0x1d8   : > { %8406 = shalt.err (!%p8403_p13)
}
 0x1d9   : > { %s8407_s30 = scalar_lea.vmem %s9110_s28, 16  ;;  %s8414_s19 = scalar_lea.vmem %s9110_s28, 32 }
 0x1da   : > { %p8408_p0 = scmp.ne.s32.totalorder %s9110_s28, %s8407_s30  ;;  %p8415_p7 = scmp.lt.s32.totalorder %s9110_s28, %s9110_s28 }
 0x1db   : > { %p8416_p9 = scmp.lt.s32.totalorder %s8414_s19, %s8407_s30 }
 0x1dc   : > { %p8410_p2 = pnand %p8408_p0, %p8741_p8 }
 0x1dd   : > { %p8417_p4 = por %p8416_p9, %p8415_p7 }
 0x1de   : > { %p8411_p5 = pneg %p8410_p2 }
 0x1e0   : > { %p8418_p10 = pnand %p8417_p4, %p8411_p5 }
 0x1e2   : > { %8421 = shalt.err (!%p8418_p10)
}
 0x1e3   : > { %s9837_s6 = sld [smem:[#allocation47_spill]]  ;;  %s9838_s23 = sld [smem:[#allocation46_spill]] }
 0x1e4   : > { %s9839_s24 = sld [smem:[#allocation45_spill]]  ;;  %s9840_s21 = sld [smem:[#allocation44_spill]] }
 0x1e5   : > { %s9841_s2 = sld [smem:[#allocation48_spill]]  ;;  %s9847_s1 = sld [smem:[#allocation50_spill]] }
 0x1e6   : > { %7287 = dma.hbm_to_vmem [thread:$0]  (!%p8725_p6), %s9836_s5, 16, %s9110_s28, [#allocation30]  }
 0x1e9   : > { %s6460_s3 = sadd.s32 4294967294, %s9837_s6   ;;  %s9159_s29 = sadd.s32 1, %s9837_s6  }
 0x1ea   : > { %s48_s25 = ssub.s32 %s9837_s6, %s9159_s29  ;;  %s51_s0 = sadd.s32 1, %s9838_s23 }
 0x1eb   : > { %p49_p8 = scmp.eq.s32.totalorder %s48_s25, 0  ;;  %p58_p1 = scmp.ne.s32.totalorder %s9838_s23, %s9839_s24 }
 0x1ec   : > { %p59_p3 = scmp.eq.s32.totalorder %s9837_s6, 0  ;;  %p64_p11 = scmp.ne.s32.totalorder %s9839_s24, %s9840_s21 }
 0x1ed   : > { %s9170_s27 = scalar_select %p49_p8, %s9838_s23, %s51_s0  }
 0x1ee   : > { %p9172_p12 = por %p59_p3, %p58_p1  ;;  %p9843_p13 = scmp.eq.s32.totalorder %s9841_s2, 0 }
 0x1ef   : > { %p466_p0 = scmp.eq.s32.totalorder %s9841_s2, 1  ;;  %p472_p2 = scmp.eq.s32.totalorder %s6460_s3, 1 }
 0x1f0   : > { %p9178_p6 = por %p9843_p13, %p64_p11  ;;  %p7314_p5 = scmp.lt.s32.totalorder %s9837_s6, 2 }
 0x1f1   : > { %s714_s19 = sand.u32 1, %s9838_s23   ;;  %p9185_p7 = por %p466_p0, %p58_p1 }
 0x1f2   : > { %p9189_p9 = por %p472_p2, %p64_p11  ;;  %s6481_s24 = sshll.u32 %s714_s19, 5 }
 0x1f3   : > { %s9845_s16 = scalar_select %p9185_p7, 1, 0 }
 0x1f4   : > { %s9846_s4 = scalar_select %p9189_p9, 1, 0 }
 0x1f5   : > { %s6966_s21 = sshll.u32 %s9837_s6, 9  ;;  %s718_s23 = scalar_lea.vmem [#allocation2], %s6481_s24 }
 0x1f6   : > { %s9197_s5 = scalar_lea.hbm %s9847_s1, %s6966_s21  ;;  %s725_s2 = sshll.u32 %s718_s23, 4  ;;  %s9199_s2 = int_to_ptr.vmem [resolvable:$true] %s725_s2 }
 0x1f7   : > { %p9203_p4 = pnand %p7314_p5, %p9172_p12  ;;  %s9207_s6 = scalar_lea.sflag [#allocation3], %s714_s19 }
 0x1f8   : > { %s8422_s25 = scalar_lea.hbm %s9197_s5, 512  ;;  %s8427_s30 = scalar_lea.hbm %s9847_s1, 1024 }
 0x1f9   : > { %p8423_p10 = scmp.ne.s32.totalorder %s9197_s5, %s8422_s25  ;;  %p8424_p8 = pneg %p9203_p4 }
 0x1fa   : > { %p8428_p11 = scmp.lt.u32.totalorder %s9197_s5, %s9847_s1  ;;  %p8429_p12 = scmp.lt.u32.totalorder %s8427_s30, %s8422_s25 }
 0x1fb   : > { %p8425_p1 = pnand %p8424_p8, %p8423_p10  ;;  %p8431_p0 = scmp.lt.u32.totalorder %s8422_s25, %s9197_s5 }
 0x1fc   : > { %p8430_p13 = por %p8429_p12, %p8428_p11 }
 0x1fd   : > { %p8426_p3 = pneg %p8425_p1 }
 0x1fe   : > { %p8432_p2 = por %p8431_p0, %p8430_p13 }
 0x200   : > { %p8433_p5 = pnand %p8432_p2, %p8426_p3 }
 0x202   : > { %8436 = shalt.err (!%p8433_p5)
}
 0x203   : > { %s8437_s19 = scalar_lea.vmem %s9199_s2, 512  ;;  %s8580_s24 = smov [#allocation2]  }
 0x204   : > { %p8438_p10 = scmp.ne.s32.totalorder %s9199_s2, %s8437_s19  ;;  %s8442_s21 = sshll.u32 %s8580_s24, 4  ;;  %s8443_s21 = int_to_ptr.vmem [resolvable:$false] %s8442_s21 }
 0x205   : > { %s8444_s0 = scalar_lea.vmem %s8443_s21, 1024  ;;  %p8445_p7 = scmp.lt.s32.totalorder %s9199_s2, %s8443_s21 }
 0x206   : > { %p8440_p1 = pnand %p8438_p10, %p8424_p8  ;;  %p8446_p11 = scmp.lt.s32.totalorder %s8444_s0, %s8437_s19 }
 0x208   : > { %p8441_p9 = pneg %p8440_p1  ;;  %p8447_p12 = por %p8446_p11, %p8445_p7 }
 0x20a   : > { %p8448_p13 = pnand %p8447_p12, %p8441_p9 }
 0x20c   : > { %8451 = shalt.err (!%p8448_p13)
}
 0x20d   : > { %7291 = dma.hbm_to_vmem [thread:$0]  (!%p9203_p4), %s9197_s5, 512, %s9199_s2, %s9207_s6, %s9827_s20, %s9827_s20, %s9831_s22  }
 0x20e   : > { %s9849_s25 = sld [smem:[#allocation49_spill]] }
 0x214   : > { %p9850_p8 = scmp.ne.s32.totalorder %s9849_s25, 0 }
 0x215   : > { %s9851_s30 = sld [smem:[#allocation45_spill]] (!%p9850_p8) }
 0x216   : > { %737 = sbr.rel (%p9850_p8) target bundleno = 5559 (0x15b7), region = 96 }
 0x21b   : > { %s9241_s23 = sand.u32 (!%p9850_p8), 1, %s9851_s30  }
 0x21c   : > { %s6485_s19 = sshll.u32 (!%p9850_p8), %s9241_s23, 5  ;;  %s740_s24 = scalar_lea.sflag (!%p9850_p8), [#allocation3], %s9241_s23 }
 0x21d   : > { %s743_s3 = scalar_lea.vmem [#allocation2], %s6485_s19 }
 0x21e   : > { %8497 = dma.done.wait (%p9178_p6), %s740_s24, 512  }
 0x21f   : > { %8499 = vsyncadd (%p9178_p6), %s740_s24, 4294966784  ;;  %s9852_s20 = sld [smem:[#allocation48_spill]] }
 0x225   : > { %p9853_p7 = scmp.eq.s32.totalorder %s9852_s20, 0 }
 0x227   : > { %8501 = dma.done.wait (%p9853_p7), [#allocation6], 1920   ;;  %p9854_p9 = pmov %p9853_p7 }
 0x228   : > { %p9855_p4 = pmov %p9853_p7 }
 0x229   : > { %8503 = vsyncadd (%p9854_p9), [#allocation6], 4294965376 }
 0x22a   : > { %8505 = dma.done.wait (%p9855_p4), [#allocation9], 224   ;;  %p9856_p3 = pmov %p9855_p4 }
 0x22c   : > { %8507 = vsyncadd (%p9856_p3), [#allocation9], 4294967072  ;;  %p9857_p0 = pmov %p9856_p3 }
 0x22e   : > { %8509 = dma.done.wait (%p9857_p0), [#allocation12], 10784   ;;  %p9858_p2 = pmov %p9857_p0 }
 0x22f   : > { %p9859_p6 = pmov %p9857_p0 }
 0x230   : > { %8511 = vsyncadd (%p9858_p2), [#allocation12], 4294956512 }
 0x231   : > { %8513 = dma.done.wait (%p9859_p6), [#allocation15], 12656   ;;  %p9860_p5 = pmov %p9857_p0 }
 0x232   : > { %p9861_p10 = pmov %p9857_p0 }
 0x233   : > { %8515 = vsyncadd (%p9860_p5), [#allocation15], 4294954640 }
 0x234   : > { %8517 = dma.done.wait (%p9861_p10), [#allocation18], 464   ;;  %p9862_p1 = pmov %p9857_p0 }
 0x235   : > { %p9863_p11 = pmov %p9857_p0 }
 0x236   : > { %8519 = vsyncadd (%p9862_p1), [#allocation18], 4294966832 }
 0x237   : > { %8521 = dma.done.wait (%p9863_p11), [#allocation21], 7200   ;;  %p9864_p12 = pmov %p9857_p0 }
 0x238   : > { %p9865_p13 = pmov %p9857_p0 }
 0x239   : > { %8523 = vsyncadd (%p9864_p12), [#allocation21], 4294960096 }
 0x23a   : > { %8525 = dma.done.wait (%p9865_p13), [#allocation24], 11136   ;;  %p9866_p8 = pmov %p9857_p0 }
 0x23b   : > { %p9867_p7 = pmov %p9857_p0 }
 0x23c   : > { %8527 = vsyncadd (%p9866_p8), [#allocation24], 4294956160 }
 0x23d   : > { %8529 = dma.done.wait (%p9867_p7), [#allocation27], 800   ;;  %p9868_p9 = pmov %p9857_p0 }
 0x23e   : > { %p9869_p4 = pmov %p9857_p0 }
 0x23f   : > { %8531 = vsyncadd (%p9868_p9), [#allocation27], 4294966496 }
 0x240   : > { %8533 = dma.done.wait (%p9869_p4), [#allocation30], 5392   ;;  %p9870_p3 = pmov %p9857_p0 }
 0x241   : > { %v8581_v0 = vmov 0.0   ;;  %vm8582_vm0 = vmmov 0   ;;  %v871_v1 = vld [vmem:[%s743_s3] sm:$0xff]  ;;  %v872_v2 = vld [vmem:[%s743_s3 + $0x8] sm:$0xff]  ;;  %v873_v3 = vld [vmem:[%s743_s3 + $0x10] sm:$0xff]  ;;  %vm889_vm1 = vcmask 1045504  }
 0x242   : > { %8535 = vsyncadd (%p9870_p3), [#allocation30], 4294961904  ;;  %6991 = vmatprep.subr.bf16.mxu0 %v8581_v0  ;;  %6995 = vmatprep.mubr.msk.bf16.mxu0 %vm8582_vm0, %v8581_v0  ;;  %v875_v4 = vpack.c.bf16 %v872_v2, %v871_v1  ;;  %v874_v5 = vld [vmem:[%s743_s3 + $0x18] sm:$0xf]  ;;  %v7396_v8 = vld [vmem:[#allocation5] sm:$0x7f]  }
 0x243   : > { %v876_v6 = vpack.c.bf16 %v874_v5, %v873_v3  ;;  %v7399_v9 = vld [vmem:[#allocation7 + $0x4] ss:$8 sps:$4 sm:$0xff]   ;;  %v7401_v10 = vld [vmem:[#allocation7] ss:$8 sps:$4 sm:$0xff]   ;;  %vm885_vm2 = vcmask 228352   ;;  %v8583_v16 = vmov 0   ;;  %v1010_v5 = vlaneseq }
 0x244   : > { %6992 = vmatpush3.bf16.msra.mxu0 %v875_v4  ;;  %966 = vmatprep.subr.bf16.mxu1 %v7399_v9  ;;  %v7397_v11 = vld [vmem:[#allocation5 + $0x8] sm:$0x7f]   ;;  %v7398_v12 = vld [vmem:[#allocation5 + $0x10] sm:$0x7f]   ;;  %v7407_v17 = vld [vmem:[#allocation7 + $0x24] ss:$8 sps:$4 sm:$0xff]  }
 0x245   : > { %6993 = vmatprep.subr.bf16.mxu0 %v8581_v0  ;;  %v891_v7 = vsel %vm889_vm1, %v876_v6, 0  ;;  %967 = vmatpush1.bf16.msra.mxu1 %v7401_v10  ;;  %v7402_v13 = vld [vmem:[#allocation7 + $0x14] ss:$8 sps:$4 sm:$0x3f]   ;;  %v7405_v21 = vld [vmem:[#allocation7 + $0x20] ss:$8 sps:$4 sm:$0xff]  }
 0x246   : > { %v7404_v14 = vld [vmem:[#allocation7 + $0x10] ss:$8 sps:$4 sm:$0x3f]   ;;  %6511 = vmatprep.subr.msk.bf16.mxu1 %vm889_vm1, %v7402_v13  ;;  %998 = vmatprep.mubr.bf16.mxu1 %v8583_v16  ;;  %v7408_v22 = vld [vmem:[#allocation7 + $0x34] ss:$8 sps:$4 sm:$0x3f]  }
 0x247   : > { %v961_v15 = vsel %vm889_vm1, %v7404_v14, 0  ;;  %v7410_v25 = vld [vmem:[#allocation7 + $0x30] ss:$8 sps:$4 sm:$0x3f]   ;;  %v7413_v27 = vld [vmem:[#allocation7 + $0x44] ss:$8 sps:$4 sm:$0xff]  }
 0x248   : > { %6994 = vmatpush3.bf16.msra.mxu0 %v891_v7  ;;  %v1104_v26 = vsel %vm889_vm1, %v7410_v25, 0  ;;  %v7411_v33 = vld [vmem:[#allocation7 + $0x40] ss:$8 sps:$4 sm:$0xff]   ;;  %v7414_v34 = vld [vmem:[#allocation7 + $0x54] ss:$8 sps:$4 sm:$0x3f]  }
 0x249   : > { %6999 = vmatprep.subr.bf16.mxu0 %v8581_v0  ;;  %969 = vmatpush1.bf16.msra.mxu1 %v961_v15  ;;  %v7416_v35 = vld [vmem:[#allocation7 + $0x50] ss:$8 sps:$4 sm:$0x3f]   ;;  %v7422_v44 = vld [vmem:[#allocation11 + $0x14] ss:$8 sps:$4 sm:$0xff]   ;;  %v1011_v6 = vshrl.u32 %v1010_v5, 7 }
 0x24a   : > { %1109 = vmatprep.subr.bf16.mxu1 %v7407_v17  ;;  %v1236_v41 = vsel %vm889_vm1, %v7416_v35, 0  ;;  %v7417_v42 = vld [vmem:[#allocation11] ss:$8 sps:$4 sm:$0xff]   ;;  %v7419_v43 = vld [vmem:[#allocation11 + $0x4] ss:$8 sps:$4 sm:$0xff]   ;;  %vm1300_vm3 = vcmask 1046528  }
 0x24b   : > { %6996 = vmatmul.mubr.msk.bf16.vlgmr.msra.gmra.mrb[0].mxu0 %vm885_vm2, %v7396_v8  ;;  %v7420_v45 = vld [vmem:[#allocation11 + $0x10] ss:$8 sps:$4 sm:$0xff]   ;;  %v7425_v46 = vld [vmem:[#allocation11 + $0x24] ss:$8 sps:$4 sm:$0xff]   ;;  %v7423_v47 = vld [vmem:[#allocation11 + $0x20] ss:$8 sps:$4 sm:$0xff]  }
 0x24c   : > { %7000 = vmatpush3.bf16.msra.mxu0 %v875_v4  ;;  %7003 = vmatprep.mubr.msk.bf16.mxu0 %vm8582_vm0, %v8581_v0  ;;  %v7428_v48 = vld [vmem:[#allocation11 + $0x34] ss:$8 sps:$4 sm:$0xff]   ;;  %v7426_v49 = vld [vmem:[#allocation11 + $0x30] ss:$8 sps:$4 sm:$0xff]   ;;  %v7431_v50 = vld [vmem:[#allocation11 + $0x44] ss:$8 sps:$4 sm:$0xff]  }
 0x24d   : > { %7001 = vmatprep.subr.bf16.mxu0 %v8581_v0  ;;  %v7429_v51 = vld [vmem:[#allocation11 + $0x40] ss:$8 sps:$4 sm:$0xff]   ;;  %v7434_v52 = vld [vmem:[#allocation11 + $0x54] ss:$8 sps:$4 sm:$0xff]   ;;  %v7432_v53 = vld [vmem:[#allocation11 + $0x50] ss:$8 sps:$4 sm:$0xff]  }
 0x24e   : > { %v7437_v54 = vld [vmem:[#allocation11 + $0x64] ss:$8 sps:$4 sm:$0xff]   ;;  %v7435_v55 = vld [vmem:[#allocation11 + $0x60] ss:$8 sps:$4 sm:$0xff]   ;;  %v7440_v56 = vld [vmem:[#allocation11 + $0x74] ss:$8 sps:$4 sm:$0xff]  }
 0x24f   : > { %v7438_v57 = vld [vmem:[#allocation11 + $0x70] ss:$8 sps:$4 sm:$0xff]   ;;  %v7443_v58 = vld [vmem:[#allocation11 + $0x84] ss:$8 sps:$4 sm:$0xff]   ;;  %v7441_v59 = vld [vmem:[#allocation11 + $0x80] ss:$8 sps:$4 sm:$0xff]  }
 0x250   : > { %7002 = vmatpush3.bf16.msra.mxu0 %v891_v7  ;;  %v7446_v60 = vld [vmem:[#allocation11 + $0x94] ss:$8 sps:$4 sm:$0xff]   ;;  %v7444_v61 = vld [vmem:[#allocation11 + $0x90] ss:$8 sps:$4 sm:$0xff]   ;;  %v7449_v62 = vld [vmem:[#allocation11 + $0xa4] ss:$8 sps:$4 sm:$0xff]  }
 0x251   : > { %7007 = vmatprep.subr.bf16.mxu0 %v8581_v0  ;;  %v7447_v63 = vld [vmem:[#allocation11 + $0xa0] ss:$8 sps:$4 sm:$0xff]   ;;  %v7452_v1 = vld [vmem:[#allocation11 + $0xb4] ss:$8 sps:$4 sm:$0xff]   ;;  %v7450_v2 = vld [vmem:[#allocation11 + $0xb0] ss:$8 sps:$4 sm:$0xff]  }
 0x252   : > { %v7455_v3 = vld [vmem:[#allocation11 + $0xc4] ss:$8 sps:$4 sm:$0xff]   ;;  %v877_v8 = vld [vmem:[#allocation8] sm:$0x3]  ;;  %v9318_v9 = vsub.s32 1, %v1011_v6  ;;  %vm1296_vm4 = vcmask 113664  }
 0x253   : > { %7004 = vmatmul.mubr.msk.bf16.vlgmr.msra.gmra.mrb[4].mxu0 %vm885_vm2, %v7397_v11  ;;  %vm1518_vm5 = vcmask 785408   ;;  %v7491_v5 = vld [vmem:[#allocation11 + $0x184] ss:$8 sps:$4 sm:$0xff]   ;;  %vm2112_vm6 = vcmask 1042432   ;;  %vm2113_vm7 = vcmask 1043456   ;;  %vm2108_vm8 = vcmask 56320  }
 0x254   : > { %7008 = vmatpush3.bf16.msra.mxu0 %v875_v4  ;;  %7011 = vmatprep.mubr.msk.bf16.mxu0 %vm8582_vm0, %v8581_v0  ;;  %v7453_v4 = vld [vmem:[#allocation11 + $0xc0] ss:$8 sps:$4 sm:$0xff]   ;;  %v1017_v11 = vrot.slane %v877_v8, %v9318_v9  ;;  %vm3558_vm9 = vcmask 1040384   ;;  %vm3554_vm10 = vcmask 7168   ;;  %vm3653_vm11 = vcmask 523264   ;;  %s869_s22 = scalar_lea.vmem [#allocation32], %s6485_s19 }
 0x255   : > { %7009 = vmatprep.subr.bf16.mxu0 %v8581_v0  ;;  %s6967_s5 = sshll.u32 %s9852_s20, 9  ;;  %s6216_s28 = sshll.u32 %s869_s22, 4  ;;  %vm6200_vm12 = vcmask 224256   ;;  %s9708_s28 = int_to_ptr.vmem [resolvable:$true] %s6216_s28 }
 0x256   : > { %s9871_s21 = sld [smem:[#allocation60_spill]]  ;;  %s6203_s30 = scalar_lea.sflag [#allocation4], %s9241_s23 }
 0x257   : > { %s8452_s19 = scalar_lea.vmem %s9708_s28, 512  ;;  %p9873_p2 = scmp.ne.s32.totalorder %s9845_s16, 0 }
 0x258   : > { %7010 = vmatpush3.bf16.msra.mxu0 %v891_v7  ;;  %v9316_v7 = vsub.s32 0, %v1011_v6  ;;  %v7489_v6 = vld [vmem:[#allocation11 + $0x180] ss:$8 sps:$4 sm:$0xff]   ;;  %p8453_p0 = scmp.ne.s32.totalorder %s9708_s28, %s8452_s19  ;;  %s8585_s24 = smov [#allocation32]  }
 0x259   : > { %s8456_s3 = sshll.u32 %s8585_s24, 4  ;;  %s8457_s3 = int_to_ptr.vmem [resolvable:$false] %s8456_s3 }
 0x25a   : > { %v1013_v10 = vrot.slane %v877_v8, %v9316_v7  ;;  %v7494_v8 = vld [vmem:[#allocation11 + $0x194] ss:$8 sps:$4 sm:$0xff]   ;;  %p8454_p6 = pnand %p8453_p0, %p9873_p2  ;;  %s8458_s20 = scalar_lea.vmem %s8457_s3, 1024 }
 0x25b   : > { %7012 = vmatmul.mubr.msk.bf16.vlgmr.msra.gmra.mrb[8].mxu0 %vm885_vm2, %v7398_v12  ;;  %p8459_p10 = scmp.lt.s32.totalorder %s9708_s28, %s8457_s3  ;;  %p8460_p1 = scmp.lt.s32.totalorder %s8458_s20, %s8452_s19 }
 0x25c   : > { %1339 = vmatprep.mubr.bf16.mxu0 %v8583_v16  ;;  %s9872_s25 = smov %s9871_s21  ;;  %s9706_s0 = scalar_lea.hbm %s9871_s21, %s6967_s5 }
 0x25d   : > { %p8455_p5 = pneg %p8454_p6  ;;  %p8461_p11 = por %p8460_p1, %p8459_p10 }
 0x25f   : > { %p8462_p12 = pnand %p8461_p11, %p8455_p5 }
 0x31e   : > { %v927_v18 = vpop.f32.mrb[0].mxu0 }
 0x31f   : > { %v6997_v19 = vpop.f32.mrb[1].mxu0 }
 0x320   : > { %v930_v20 = vpop.f32.mrb[2].mxu0 }
 0x321   : > { %v934_v23 = vpack.c.bf16 %v930_v20, %v927_v18  ;;  %v6998_v24 = vpop.f32.mrb[3].mxu0 }
 0x323   : > { %6512 = vmatmul.mubr.msk.bf16.vlgmr.msra.gmra.mrb[0].mxu1 %vm885_vm2, %v934_v23 }
 0x324   : > { %1110 = vmatpush1.bf16.msra.mxu1 %v7405_v21  ;;  %1141 = vmatprep.mubr.bf16.mxu1 %v8583_v16 }
 0x325   : > { %6519 = vmatprep.subr.msk.bf16.mxu1 %vm889_vm1, %v7408_v22 }
 0x326   : > { %v1069_v28 = vpop.f32.mrb[4].mxu0 }
 0x327   : > { %v7005_v29 = vpop.f32.mrb[5].mxu0 }
 0x328   : > { %v1072_v30 = vpop.f32.mrb[6].mxu0  ;;  %1112 = vmatpush1.bf16.msra.mxu1 %v1104_v26  ;;  %v1577_v29 = vld [vmem:[#allocation10 + $0x4] sm:$0xf] }
 0x329   : > { %v1076_v31 = vpack.c.bf16 %v1072_v30, %v1069_v28  ;;  %v7006_v32 = vpop.f32.mrb[7].mxu0  ;;  %1241 = vmatprep.subr.bf16.mxu1 %v7413_v27  ;;  %v1295_v28 = vld [vmem:[#allocation10] sm:$0xf]  ;;  %v1840_v30 = vld [vmem:[#allocation10 + $0x8] sm:$0xf] }
 0x32a   : > { %v7456_v32 = vld [vmem:[#allocation11 + $0xd0] ss:$8 sps:$4 sm:$0xff]  }
 0x32e   : > { %v1201_v36 = vpop.f32.mrb[8].mxu0 }
 0x32f   : > { %6520 = vmatmul.mubr.msk.bf16.vlgmr.msra.gmra.mrb[0].mxu1 %vm885_vm2, %v1076_v31  ;;  %v7013_v37 = vpop.f32.mrb[9].mxu0  ;;  %v7458_v31 = vld [vmem:[#allocation11 + $0xd4] ss:$8 sps:$4 sm:$0xff]  }
 0x330   : > { %1242 = vmatpush1.bf16.msra.mxu1 %v7411_v33  ;;  %v1204_v38 = vpop.f32.mrb[10].mxu0  ;;  %1273 = vmatprep.mubr.bf16.mxu1 %v8583_v16  ;;  %v7461_v33 = vld [vmem:[#allocation11 + $0xe4] ss:$8 sps:$4 sm:$0xff]  }
 0x331   : > { %v1208_v39 = vpack.c.bf16 %v1204_v38, %v1201_v36  ;;  %v7014_v40 = vpop.f32.mrb[11].mxu0  ;;  %6527 = vmatprep.subr.msk.bf16.mxu1 %vm889_vm1, %v7414_v34  ;;  %v7459_v38 = vld [vmem:[#allocation11 + $0xe0] ss:$8 sps:$4 sm:$0xff]  }
 0x334   : > { %1244 = vmatpush1.bf16.msra.mxu1 %v1236_v41  ;;  %v7464_v41 = vld [vmem:[#allocation11 + $0xf4] ss:$8 sps:$4 sm:$0xff]  }
 0x335   : > { %1522 = vmatprep.subr.bf16.mxu1 %v7419_v43  ;;  %v7467_v43 = vld [vmem:[#allocation11 + $0x104] ss:$8 sps:$4 sm:$0xff]  }
 0x33b   : > { %6528 = vmatmul.mubr.msk.bf16.vlgmr.msra.gmra.mrb[0].mxu1 %vm885_vm2, %v1208_v39 }
 0x33c   : > { %1523 = vmatpush1.bf16.msra.mxu1 %v7417_v42  ;;  %v7462_v42 = vld [vmem:[#allocation11 + $0xf0] ss:$8 sps:$4 sm:$0xff]  }
 0x33d   : > { %1524 = vmatprep.subr.bf16.mxu1 %v7422_v44 }
 0x340   : > { %1525 = vmatpush1.bf16.msra.mxu1 %v7420_v45 }
 0x341   : > { %1526 = vmatprep.subr.bf16.mxu1 %v7425_v46  ;;  %v7465_v46 = vld [vmem:[#allocation11 + $0x100] ss:$8 sps:$4 sm:$0xff]  }
 0x344   : > { %1527 = vmatpush1.bf16.msra.mxu1 %v7423_v47 }
 0x345   : > { %1528 = vmatprep.subr.bf16.mxu1 %v7428_v48 }
 0x348   : > { %1529 = vmatpush1.bf16.msra.mxu1 %v7426_v49  ;;  %v7470_v49 = vld [vmem:[#allocation11 + $0x114] ss:$8 sps:$4 sm:$0xff]  }
 0x349   : > { %1530 = vmatprep.subr.bf16.mxu1 %v7431_v50 }
 0x34c   : > { %1531 = vmatpush1.bf16.msra.mxu1 %v7429_v51  ;;  %v7468_v51 = vld [vmem:[#allocation11 + $0x110] ss:$8 sps:$4 sm:$0xff]  }
 0x34d   : > { %1532 = vmatprep.subr.bf16.mxu1 %v7434_v52  ;;  %v7473_v52 = vld [vmem:[#allocation11 + $0x124] ss:$8 sps:$4 sm:$0xff]  }
 0x350   : > { %1533 = vmatpush1.bf16.msra.mxu1 %v7432_v53 }
 0x351   : > { %1534 = vmatprep.subr.bf16.mxu1 %v7437_v54 }
 0x354   : > { %1535 = vmatpush1.bf16.msra.mxu1 %v7435_v55  ;;  %v7471_v55 = vld [vmem:[#allocation11 + $0x120] ss:$8 sps:$4 sm:$0xff]  }
 0x355   : > { %1536 = vmatprep.subr.bf16.mxu1 %v7440_v56 }
 0x358   : > { %1537 = vmatpush1.bf16.msra.mxu1 %v7438_v57  ;;  %v7476_v57 = vld [vmem:[#allocation11 + $0x134] ss:$8 sps:$4 sm:$0xff]  }
 0x359   : > { %1538 = vmatprep.subr.bf16.mxu1 %v7443_v58 }
 0x35c   : > { %1539 = vmatpush1.bf16.msra.mxu1 %v7441_v59  ;;  %v7474_v59 = vld [vmem:[#allocation11 + $0x130] ss:$8 sps:$4 sm:$0xff]  }
 0x35d   : > { %1540 = vmatprep.subr.bf16.mxu1 %v7446_v60  ;;  %v7479_v60 = vld [vmem:[#allocation11 + $0x144] ss:$8 sps:$4 sm:$0xff]  }
 0x360   : > { %1541 = vmatpush1.bf16.msra.mxu1 %v7444_v61  ;;  %v7477_v61 = vld [vmem:[#allocation11 + $0x140] ss:$8 sps:$4 sm:$0xff]  }
 0x361   : > { %1542 = vmatprep.subr.bf16.mxu1 %v7449_v62  ;;  %v7482_v62 = vld [vmem:[#allocation11 + $0x154] ss:$8 sps:$4 sm:$0xff]  }
 0x364   : > { %1543 = vmatpush1.bf16.msra.mxu1 %v7447_v63  ;;  %v7480_v63 = vld [vmem:[#allocation11 + $0x150] ss:$8 sps:$4 sm:$0xff]  }
 0x365   : > { %1544 = vmatprep.subr.bf16.mxu1 %v7452_v1  ;;  %v7485_v1 = vld [vmem:[#allocation11 + $0x164] ss:$8 sps:$4 sm:$0xff]  }
 0x368   : > { %1545 = vmatpush1.bf16.msra.mxu1 %v7450_v2  ;;  %v7483_v2 = vld [vmem:[#allocation11 + $0x160] ss:$8 sps:$4 sm:$0xff]  }
 0x369   : > { %1546 = vmatprep.subr.bf16.mxu1 %v7455_v3  ;;  %v7488_v3 = vld [vmem:[#allocation11 + $0x174] ss:$8 sps:$4 sm:$0xff]  }
 0x36c   : > { %1547 = vmatpush1.bf16.msra.mxu1 %v7453_v4  ;;  %v7486_v4 = vld [vmem:[#allocation11 + $0x170] ss:$8 sps:$4 sm:$0xff]  }
 0x36d   : > { %1548 = vmatprep.subr.bf16.mxu1 %v7458_v31  ;;  %v7519_v31 = vld [vmem:[#allocation11 + $0x220] ss:$8 sps:$4 sm:$0xff]  }
 0x370   : > { %1549 = vmatpush1.bf16.msra.mxu1 %v7456_v32  ;;  %v7524_v32 = vld [vmem:[#allocation11 + $0x234] ss:$8 sps:$4 sm:$0xff]  }
 0x371   : > { %1796 = vmatprep.subr.bf16.mxu1 %v7461_v33  ;;  %v7522_v33 = vld [vmem:[#allocation11 + $0x230] ss:$8 sps:$4 sm:$0xff]  }
 0x40e   : > { %v1275_v12 = vpop.f32.mrb[0].mxu1 }
 0x40f   : > { %v7057_v13 = vadd.f32 %v1275_v12, %v1013_v10  ;;  %v1277_v14 = vpop.f32.mrb[1].mxu1  ;;  %v7495_v12 = vld [vmem:[#allocation11 + $0x1a0] ss:$8 sps:$4 sm:$0xff]  }
 0x410   : > { %v7058_v15 = vadd.f32 %v1277_v14, %v1017_v11  ;;  %v1279_v17 = vpop.f32.mrb[2].mxu1  ;;  %v7498_v14 = vld [vmem:[#allocation11 + $0x1b0] ss:$8 sps:$4 sm:$0xff]  }
 0x411   : > { %v7059_v18 = vadd.f32 %v1279_v17, %v1013_v10  ;;  %v1281_v19 = vpop.f32.mrb[3].mxu1  ;;  %v1288_v21 = vmax.f32 %v7057_v13, 0.0  ;;  %v7492_v10 = vld [vmem:[#allocation11 + $0x190] ss:$8 sps:$4 sm:$0xff]   ;;  %v7500_v13 = vld [vmem:[#allocation11 + $0x1b4] ss:$8 sps:$4 sm:$0xff]  }
 0x412   : > { %v7060_v20 = vadd.f32 %v1281_v19, %v1017_v11  ;;  %v1289_v23 = vmax.f32 %v7058_v15, 0.0  ;;  %v7497_v11 = vld [vmem:[#allocation11 + $0x1a4] ss:$8 sps:$4 sm:$0xff]  }
 0x413   : > { %v1290_v22 = vmax.f32 %v7059_v18, 0.0  ;;  %v7503_v15 = vld [vmem:[#allocation11 + $0x1c4] ss:$8 sps:$4 sm:$0xff]   ;;  %v7501_v18 = vld [vmem:[#allocation11 + $0x1c0] ss:$8 sps:$4 sm:$0xff]  }
 0x414   : > { %v1291_v24 = vmax.f32 %v7060_v20, 0.0  ;;  %v7506_v20 = vld [vmem:[#allocation11 + $0x1d4] ss:$8 sps:$4 sm:$0xff]  }
 0x415   : > { %v1292_v25 = vpack.c.bf16 %v1290_v22, %v1288_v21  ;;  %v7504_v21 = vld [vmem:[#allocation11 + $0x1d0] ss:$8 sps:$4 sm:$0xff]   ;;  %v7509_v22 = vld [vmem:[#allocation11 + $0x1e4] ss:$8 sps:$4 sm:$0xff]  }
 0x416   : > { %v1293_v26 = vpack.c.bf16 %v1291_v24, %v1289_v23  ;;  %v7507_v23 = vld [vmem:[#allocation11 + $0x1e0] ss:$8 sps:$4 sm:$0xff]   ;;  %v7512_v24 = vld [vmem:[#allocation11 + $0x1f4] ss:$8 sps:$4 sm:$0xff]  }
 0x417   : > { %v1302_v27 = vsel %vm1300_vm3, %v1292_v25, 0  ;;  %v7510_v25 = vld [vmem:[#allocation11 + $0x1f0] ss:$8 sps:$4 sm:$0xff]  }
 0x418   : > { %6529 = vmatprep.subr.msk.bf16.mxu0 %vm1300_vm3, %v1293_v26 }
 0x419   : > { %1308 = vmatpush1.bf16.msra.mxu0 %v1302_v27 }
 0x41a   : > { %6560 = vmatprep.subr.msk.bf16.mxu0 %vm1300_vm3, %v1293_v26 }
 0x41c   : > { %6530 = vmatmul.mubr.msk.bf16.vlgmr.msra.gmra.mrb[12].mxu0 %vm1296_vm4, %v1295_v28  ;;  %v7518_v28 = vld [vmem:[#allocation11 + $0x214] ss:$8 sps:$4 sm:$0xff]  }
 0x41d   : > { %1582 = vmatpush1.bf16.msra.mxu0 %v1302_v27  ;;  %1613 = vmatprep.mubr.bf16.mxu0 %v8583_v16 }
 0x41e   : > { %6591 = vmatprep.subr.msk.bf16.mxu0 %vm1300_vm3, %v1293_v26  ;;  %v7515_v26 = vld [vmem:[#allocation11 + $0x204] ss:$8 sps:$4 sm:$0xff]  }
 0x424   : > { %6561 = vmatmul.mubr.msk.bf16.vlgmr.msra.gmra.mrb[16].mxu0 %vm1296_vm4, %v1577_v29  ;;  %v7516_v29 = vld [vmem:[#allocation11 + $0x210] ss:$8 sps:$4 sm:$0xff]  }
 0x425   : > { %1845 = vmatpush1.bf16.msra.mxu0 %v1302_v27  ;;  %1876 = vmatprep.mubr.bf16.mxu0 %v8583_v16  ;;  %v7513_v27 = vld [vmem:[#allocation11 + $0x200] ss:$8 sps:$4 sm:$0xff]  }
 0x42c   : > { %6592 = vmatmul.mubr.msk.bf16.vlgmr.msra.gmra.mrb[20].mxu0 %vm1296_vm4, %v1840_v30  ;;  %v7521_v30 = vld [vmem:[#allocation11 + $0x224] ss:$8 sps:$4 sm:$0xff]  }
 0x42d   : > { %2154 = vmatprep.mubr.bf16.mxu0 %v8583_v16 }
 0x4ef   : > { %v1341_v34 = vpop.f32.mrb[12].mxu0 }
 0x4f0   : > { %v1343_v35 = vpop.f32.mrb[13].mxu0  ;;  %v1348_v39 = vpack.c.bf16 %v1341_v34, %v1341_v34  ;;  %v7527_v34 = vld [vmem:[#allocation11 + $0x244] ss:$8 sps:$4 sm:$0xff]  }
 0x4f1   : > { %v1349_v36 = vpack.c.bf16 %v1343_v35, %v1343_v35  ;;  %v1345_v37 = vpop.f32.mrb[14].mxu0  ;;  %v7525_v35 = vld [vmem:[#allocation11 + $0x240] ss:$8 sps:$4 sm:$0xff]  }
 0x4f2   : > { %v1346_v40 = vpop.f32.mrb[15].mxu0  ;;  %v7528_v37 = vld [vmem:[#allocation11 + $0x250] ss:$8 sps:$4 sm:$0xff]  }
 0x4f3   : > { %6559 = vmatprep.mubr.msk.bf16.mxu1 %vm1518_vm5, %v1349_v36  ;;  %v7530_v36 = vld [vmem:[#allocation11 + $0x254] ss:$8 sps:$4 sm:$0xff]  }
 0x4f4   : > { %1555 = vmatmul.mubr.bf16.vlgmr.msra.gmra.mrb[4].mxu1 %v1348_v39  ;;  %v7531_v39 = vld [vmem:[#allocation11 + $0x260] ss:$8 sps:$4 sm:$0xff]   ;;  %v7536_v40 = vld [vmem:[#allocation11 + $0x274] ss:$8 sps:$4 sm:$0xff]  }
 0x4f5   : > { %1797 = vmatpush1.bf16.msra.mxu1 %v7459_v38  ;;  %v7533_v38 = vld [vmem:[#allocation11 + $0x264] ss:$8 sps:$4 sm:$0xff]  }
 0x4f6   : > { %1798 = vmatprep.subr.bf16.mxu1 %v7464_v41  ;;  %v7534_v41 = vld [vmem:[#allocation11 + $0x270] ss:$8 sps:$4 sm:$0xff]  }
 0x4f7   : > { %v9333_v44 = vpop.f32.mrb[16].mxu0 }
 0x4f8   : > { %v1617_v45 = vpop.f32.mrb[17].mxu0  ;;  %v1622_v17 = vpack.c.bf16 %v9333_v44, %v9333_v44  ;;  %v7542_v44 = vld [vmem:[#allocation11 + $0x294] ss:$8 sps:$4 sm:$0xff]  }
 0x4f9   : > { %1799 = vmatpush1.bf16.msra.mxu1 %v7462_v42  ;;  %v1623_v47 = vpack.c.bf16 %v1617_v45, %v1617_v45  ;;  %v1619_v48 = vpop.f32.mrb[18].mxu0  ;;  %v7539_v42 = vld [vmem:[#allocation11 + $0x284] ss:$8 sps:$4 sm:$0xff]   ;;  %v7540_v45 = vld [vmem:[#allocation11 + $0x290] ss:$8 sps:$4 sm:$0xff]  }
 0x4fa   : > { %1800 = vmatprep.subr.bf16.mxu1 %v7467_v43  ;;  %v1620_v50 = vpop.f32.mrb[19].mxu0  ;;  %v7537_v43 = vld [vmem:[#allocation11 + $0x280] ss:$8 sps:$4 sm:$0xff]   ;;  %v7544_v48 = vld [vmem:[#allocation16 + $0x8] sm:$0xff]  }
 0x4fb   : > { %6590 = vmatprep.mubr.msk.bf16.mxu1 %vm1518_vm5, %v1623_v47  ;;  %v7546_v50 = vld [vmem:[#allocation16 + $0x18] sm:$0xff]  }
 0x4fd   : > { %1801 = vmatpush1.bf16.msra.mxu1 %v7465_v46  ;;  %v7543_v46 = vld [vmem:[#allocation16] sm:$0xff]  }
 0x4fe   : > { %1802 = vmatprep.subr.bf16.mxu1 %v7470_v49  ;;  %v7545_v49 = vld [vmem:[#allocation16 + $0x10] sm:$0xff]  }
 0x4ff   : > { %v9336_v53 = vpop.f32.mrb[20].mxu0 }
 0x500   : > { %v1880_v54 = vpop.f32.mrb[21].mxu0  ;;  %v1885_v47 = vpack.c.bf16 %v9336_v53, %v9336_v53  ;;  %v7549_v53 = vld [vmem:[#allocation16 + $0x30] sm:$0xff]  }
 0x501   : > { %1803 = vmatpush1.bf16.msra.mxu1 %v7468_v51  ;;  %v1882_v56 = vpop.f32.mrb[22].mxu0  ;;  %v1886_v19 = vpack.c.bf16 %v1880_v54, %v1880_v54  ;;  %v7547_v51 = vld [vmem:[#allocation16 + $0x20] sm:$0xff]   ;;  %v7550_v54 = vld [vmem:[#allocation16 + $0x38] sm:$0xff]  }
 0x502   : > { %1804 = vmatprep.subr.bf16.mxu1 %v7473_v52  ;;  %v1883_v58 = vpop.f32.mrb[23].mxu0  ;;  %v7548_v52 = vld [vmem:[#allocation16 + $0x28] sm:$0xff]  }
 0x503   : > { %v7552_v56 = vld [vmem:[#allocation16 + $0x48] sm:$0xff]   ;;  %v7554_v58 = vld [vmem:[#allocation16 + $0x58] sm:$0xff]  }
 0x505   : > { %1805 = vmatpush1.bf16.msra.mxu1 %v7471_v55  ;;  %v7551_v55 = vld [vmem:[#allocation16 + $0x40] sm:$0xff]  }
 0x506   : > { %1806 = vmatprep.subr.bf16.mxu1 %v7476_v57  ;;  %v7553_v57 = vld [vmem:[#allocation16 + $0x50] sm:$0xff]  }
 0x509   : > { %1807 = vmatpush1.bf16.msra.mxu1 %v7474_v59  ;;  %v7555_v59 = vld [vmem:[#allocation16 + $0x60] sm:$0xff]  }
 0x50a   : > { %1808 = vmatprep.subr.bf16.mxu1 %v7479_v60  ;;  %v7556_v60 = vld [vmem:[#allocation16 + $0x68] sm:$0xff]  }
 0x50d   : > { %1809 = vmatpush1.bf16.msra.mxu1 %v7477_v61  ;;  %v1294_v61 = vld [vmem:[#allocation13] sm:$0x3] }
 0x50e   : > { %1810 = vmatprep.subr.bf16.mxu1 %v7482_v62  ;;  %v1567_v62 = vrot.slane %v1294_v61, %v9316_v7 }
 0x511   : > { %1811 = vmatpush1.bf16.msra.mxu1 %v7480_v63  ;;  %v1571_v63 = vrot.slane %v1294_v61, %v9318_v9  ;;  %v7581_v61 = vld [vmem:[#allocation16 + $0x130] sm:$0xff]  }
 0x512   : > { %1812 = vmatprep.subr.bf16.mxu1 %v7485_v1 }
 0x515   : > { %1813 = vmatpush1.bf16.msra.mxu1 %v7483_v2 }
 0x516   : > { %1814 = vmatprep.subr.bf16.mxu1 %v7488_v3 }
 0x519   : > { %1815 = vmatpush1.bf16.msra.mxu1 %v7486_v4  ;;  %v8584_v4 = vmov 65535  }
 0x51a   : > { %1816 = vmatprep.subr.bf16.mxu1 %v7491_v5  ;;  %v2114_v5 = vsel %vm2112_vm6, 4294967295, %v8584_v4 }
 0x51d   : > { %1817 = vmatpush1.bf16.msra.mxu1 %v7489_v6 }
 0x51e   : > { %1818 = vmatprep.subr.bf16.mxu1 %v7494_v8 }
 0x521   : > { %1819 = vmatpush1.bf16.msra.mxu1 %v7492_v10 }
 0x522   : > { %1820 = vmatprep.subr.bf16.mxu1 %v7497_v11 }
 0x525   : > { %1821 = vmatpush1.bf16.msra.mxu1 %v7495_v12 }
 0x526   : > { %1822 = vmatprep.subr.bf16.mxu1 %v7500_v13 }
 0x529   : > { %1823 = vmatpush1.bf16.msra.mxu1 %v7498_v14  ;;  %v9359_v14 = vsel %vm2113_vm7, %v2114_v5, 0 }
 0x52a   : > { %2059 = vmatprep.subr.bf16.mxu1 %v7503_v15 }
 0x52c   : > { %1829 = vmatmul.mubr.bf16.vlgmr.msra.gmra.mrb[4].mxu1 %v1622_v17 }
 0x52d   : > { %2060 = vmatpush1.bf16.msra.mxu1 %v7501_v18  ;;  %6621 = vmatprep.mubr.msk.bf16.mxu1 %vm1518_vm5, %v1886_v19  ;;  %v2107_v19 = vld [vmem:[#allocation14] sm:$0x1] }
 0x52e   : > { %2061 = vmatprep.subr.bf16.mxu1 %v7506_v20  ;;  %v2322_v20 = vld [vmem:[#allocation14 + $0x1] sm:$0x1] }
 0x531   : > { %2062 = vmatpush1.bf16.msra.mxu1 %v7504_v21  ;;  %v7557_v21 = vld [vmem:[#allocation16 + $0x70] sm:$0xff]  }
 0x532   : > { %2063 = vmatprep.subr.bf16.mxu1 %v7509_v22  ;;  %v7558_v22 = vld [vmem:[#allocation16 + $0x78] sm:$0xff]  }
 0x535   : > { %2064 = vmatpush1.bf16.msra.mxu1 %v7507_v23  ;;  %v7559_v23 = vld [vmem:[#allocation16 + $0x80] sm:$0xff]  }
 0x536   : > { %2065 = vmatprep.subr.bf16.mxu1 %v7512_v24  ;;  %v7560_v24 = vld [vmem:[#allocation16 + $0x88] sm:$0xff]  }
 0x539   : > { %2066 = vmatpush1.bf16.msra.mxu1 %v7510_v25  ;;  %v7561_v25 = vld [vmem:[#allocation16 + $0x90] sm:$0xff]  }
 0x53a   : > { %2067 = vmatprep.subr.bf16.mxu1 %v7515_v26  ;;  %v7562_v26 = vld [vmem:[#allocation16 + $0x98] sm:$0xff]  }
 0x53d   : > { %2068 = vmatpush1.bf16.msra.mxu1 %v7513_v27  ;;  %v7563_v27 = vld [vmem:[#allocation16 + $0xa0] sm:$0xff]  }
 0x53e   : > { %2069 = vmatprep.subr.bf16.mxu1 %v7518_v28  ;;  %v7564_v28 = vld [vmem:[#allocation16 + $0xa8] sm:$0xff]  }
 0x541   : > { %2070 = vmatpush1.bf16.msra.mxu1 %v7516_v29  ;;  %v7565_v29 = vld [vmem:[#allocation16 + $0xb0] sm:$0xff]  }
 0x542   : > { %2071 = vmatprep.subr.bf16.mxu1 %v7521_v30  ;;  %v7566_v30 = vld [vmem:[#allocation16 + $0xb8] sm:$0xff]  }
 0x545   : > { %2072 = vmatpush1.bf16.msra.mxu1 %v7519_v31  ;;  %v7567_v31 = vld [vmem:[#allocation16 + $0xc0] sm:$0xff]  }
 0x546   : > { %2073 = vmatprep.subr.bf16.mxu1 %v7524_v32  ;;  %v7568_v32 = vld [vmem:[#allocation16 + $0xc8] sm:$0xff]  }
 0x549   : > { %2074 = vmatpush1.bf16.msra.mxu1 %v7522_v33  ;;  %v7569_v33 = vld [vmem:[#allocation16 + $0xd0] sm:$0xff]  }
 0x54a   : > { %2075 = vmatprep.subr.bf16.mxu1 %v7527_v34  ;;  %v7570_v34 = vld [vmem:[#allocation16 + $0xd8] sm:$0xff]  }
 0x54d   : > { %2076 = vmatpush1.bf16.msra.mxu1 %v7525_v35 }
 0x54e   : > { %2077 = vmatprep.subr.bf16.mxu1 %v7530_v36 }
 0x551   : > { %2078 = vmatpush1.bf16.msra.mxu1 %v7528_v37 }
 0x552   : > { %2079 = vmatprep.subr.bf16.mxu1 %v7533_v38 }
 0x555   : > { %2080 = vmatpush1.bf16.msra.mxu1 %v7531_v39 }
 0x556   : > { %2081 = vmatprep.subr.bf16.mxu1 %v7536_v40 }
 0x559   : > { %2082 = vmatpush1.bf16.msra.mxu1 %v7534_v41 }
 0x55a   : > { %2083 = vmatprep.subr.bf16.mxu1 %v7539_v42 }
 0x55d   : > { %2084 = vmatpush1.bf16.msra.mxu1 %v7537_v43 }
 0x55e   : > { %2085 = vmatprep.subr.bf16.mxu1 %v7542_v44 }
 0x561   : > { %2086 = vmatpush1.bf16.msra.mxu1 %v7540_v45  ;;  %v2732_v45 = vld [vmem:[#allocation14 + $0x3] sm:$0x1] }
 0x562   : > { %2280 = vmatprep.subr.bf16.mxu1 %v8583_v16 }
 0x564   : > { %2092 = vmatmul.mubr.bf16.vlgmr.msra.gmra.mrb[4].mxu1 %v1885_v47 }
 0x565   : > { %2281 = vmatpush1.bf16.msra.mxu1 %v7543_v46 }
 0x566   : > { %2282 = vmatprep.subr.bf16.mxu1 %v8583_v16 }
 0x569   : > { %2283 = vmatpush1.bf16.msra.mxu1 %v7544_v48  ;;  %v2527_v48 = vld [vmem:[#allocation14 + $0x2] sm:$0x1] }
 0x56a   : > { %2284 = vmatprep.subr.bf16.mxu1 %v8583_v16 }
 0x56d   : > { %2285 = vmatpush1.bf16.msra.mxu1 %v7545_v49  ;;  %v2937_v49 = vld [vmem:[#allocation14 + $0x4] sm:$0x1] }
 0x56e   : > { %2286 = vmatprep.subr.bf16.mxu1 %v8583_v16 }
 0x571   : > { %2287 = vmatpush1.bf16.msra.mxu1 %v7546_v50  ;;  %v7571_v50 = vld [vmem:[#allocation16 + $0xe0] sm:$0xff]  }
 0x572   : > { %2288 = vmatprep.subr.bf16.mxu1 %v8583_v16 }
 0x575   : > { %2289 = vmatpush1.bf16.msra.mxu1 %v7547_v51  ;;  %v7572_v51 = vld [vmem:[#allocation16 + $0xe8] sm:$0xff]  }
 0x576   : > { %2290 = vmatprep.subr.bf16.mxu1 %v8583_v16 }
 0x579   : > { %2291 = vmatpush1.bf16.msra.mxu1 %v7548_v52  ;;  %v3142_v52 = vld [vmem:[#allocation14 + $0x5] sm:$0x1] }
 0x57a   : > { %2292 = vmatprep.subr.bf16.mxu1 %v8583_v16 }
 0x57d   : > { %2293 = vmatpush1.bf16.msra.mxu1 %v7549_v53  ;;  %v7573_v53 = vld [vmem:[#allocation16 + $0xf0] sm:$0xff]  }
 0x57e   : > { %2294 = vmatprep.subr.bf16.mxu1 %v8583_v16 }
 0x581   : > { %2295 = vmatpush1.bf16.msra.mxu1 %v7550_v54  ;;  %v7574_v54 = vld [vmem:[#allocation16 + $0xf8] sm:$0xff]  }
 0x582   : > { %2296 = vmatprep.subr.bf16.mxu1 %v8583_v16 }
 0x585   : > { %2297 = vmatpush1.bf16.msra.mxu1 %v7551_v55  ;;  %v7575_v55 = vld [vmem:[#allocation16 + $0x100] sm:$0xff]  }
 0x586   : > { %2298 = vmatprep.subr.bf16.mxu1 %v8583_v16 }
 0x589   : > { %2299 = vmatpush1.bf16.msra.mxu1 %v7552_v56  ;;  %v7576_v56 = vld [vmem:[#allocation16 + $0x108] sm:$0xff]  }
 0x58a   : > { %2300 = vmatprep.subr.bf16.mxu1 %v8583_v16 }
 0x58d   : > { %2301 = vmatpush1.bf16.msra.mxu1 %v7553_v57  ;;  %v7577_v57 = vld [vmem:[#allocation16 + $0x110] sm:$0xff]  }
 0x58e   : > { %2302 = vmatprep.subr.bf16.mxu1 %v8583_v16 }
 0x591   : > { %2303 = vmatpush1.bf16.msra.mxu1 %v7554_v58  ;;  %v7578_v58 = vld [vmem:[#allocation16 + $0x118] sm:$0xff]  }
 0x592   : > { %2304 = vmatprep.subr.bf16.mxu1 %v8583_v16 }
 0x595   : > { %2305 = vmatpush1.bf16.msra.mxu1 %v7555_v59  ;;  %v7579_v59 = vld [vmem:[#allocation16 + $0x120] sm:$0xff]  }
 0x596   : > { %2306 = vmatprep.subr.bf16.mxu1 %v8583_v16 }
 0x599   : > { %2307 = vmatpush1.bf16.msra.mxu1 %v7556_v60  ;;  %v7580_v60 = vld [vmem:[#allocation16 + $0x128] sm:$0xff]  }
 0x637   : > { %v2093_v1 = vpop.f32.mrb[4].mxu1 }
 0x638   : > { %v7061_v2 = vadd.f32 %v2093_v1, %v1567_v62  ;;  %v2095_v3 = vpop.f32.mrb[5].mxu1  ;;  %v7582_v62 = vld [vmem:[#allocation16 + $0x138] sm:$0xff]   ;;  %v7584_v1 = vld [vmem:[#allocation16 + $0x148] sm:$0xff]  }
 0x639   : > { %v7062_v6 = vadd.f32 %v2095_v3, %v1571_v63  ;;  %v2097_v8 = vpop.f32.mrb[6].mxu1  ;;  %v7583_v63 = vld [vmem:[#allocation16 + $0x140] sm:$0xff]  }
 0x63a   : > { %v2102_v10 = vmax.f32 %v7061_v2, 0.0  ;;  %v2098_v11 = vpop.f32.mrb[7].mxu1  ;;  %v3347_v2 = vld [vmem:[#allocation14 + $0x6] sm:$0x1] }
 0x63b   : > { %v2103_v12 = vmax.f32 %v7062_v6, 0.0 }
 0x63c   : > { %v2104_v13 = vpack.c.bf16 %v2102_v10, %v2102_v10 }
 0x63d   : > { %v2105_v15 = vpack.c.bf16 %v2103_v12, %v2103_v12 }
 0x63e   : > { %v9365_v18 = vand.u32 %v9359_v14, %v2104_v13 }
 0x63f   : > { %v9362_v17 = vand.u32 %v9359_v14, %v2105_v15 }
 0x641   : > { %2122 = vmatprep.subr.bf16.mxu0 %v9362_v17  ;;  %2736 = vmatprep.subr.bf16.mxu1 %v9362_v17 }
 0x642   : > { %2123 = vmatpush1.bf16.msra.mxu0 %v9365_v18 }
 0x643   : > { %2326 = vmatprep.subr.bf16.mxu0 %v9362_v17 }
 0x645   : > { %6622 = vmatmul.mubr.msk.bf16.vlgmr.msra.gmra.mrb[24].mxu0 %vm2108_vm8, %v2107_v19 }
 0x646   : > { %2327 = vmatpush1.bf16.msra.mxu0 %v9365_v18  ;;  %2358 = vmatprep.mubr.bf16.mxu0 %v8583_v16 }
 0x647   : > { %2485 = vmatprep.subr.bf16.mxu0 %v8583_v16 }
 0x64d   : > { %6638 = vmatmul.mubr.msk.bf16.vlgmr.msra.gmra.mrb[28].mxu0 %vm2108_vm8, %v2322_v20 }
 0x64e   : > { %2486 = vmatpush1.bf16.msra.mxu0 %v7557_v21  ;;  %v7585_v21 = vld [vmem:[#allocation16 + $0x150] sm:$0xff]  }
 0x64f   : > { %2487 = vmatprep.subr.bf16.mxu0 %v8583_v16 }
 0x652   : > { %2488 = vmatpush1.bf16.msra.mxu0 %v7558_v22 }
 0x653   : > { %2489 = vmatprep.subr.bf16.mxu0 %v8583_v16 }
 0x656   : > { %2490 = vmatpush1.bf16.msra.mxu0 %v7559_v23 }
 0x657   : > { %2491 = vmatprep.subr.bf16.mxu0 %v8583_v16 }
 0x65a   : > { %2492 = vmatpush1.bf16.msra.mxu0 %v7560_v24 }
 0x65b   : > { %2493 = vmatprep.subr.bf16.mxu0 %v8583_v16 }
 0x65e   : > { %2494 = vmatpush1.bf16.msra.mxu0 %v7561_v25 }
 0x65f   : > { %2495 = vmatprep.subr.bf16.mxu0 %v8583_v16 }
 0x662   : > { %2496 = vmatpush1.bf16.msra.mxu0 %v7562_v26 }
 0x663   : > { %2497 = vmatprep.subr.bf16.mxu0 %v8583_v16 }
 0x666   : > { %2498 = vmatpush1.bf16.msra.mxu0 %v7563_v27  ;;  %v7586_v27 = vld [vmem:[#allocation16 + $0x158] sm:$0xff]  }
 0x667   : > { %2499 = vmatprep.subr.bf16.mxu0 %v8583_v16 }
 0x66a   : > { %2500 = vmatpush1.bf16.msra.mxu0 %v7564_v28  ;;  %v7587_v28 = vld [vmem:[#allocation16 + $0x160] sm:$0xff]  }
 0x66b   : > { %2501 = vmatprep.subr.bf16.mxu0 %v8583_v16 }
 0x66e   : > { %2502 = vmatpush1.bf16.msra.mxu0 %v7565_v29  ;;  %v7588_v29 = vld [vmem:[#allocation16 + $0x168] sm:$0xff]  }
 0x66f   : > { %2503 = vmatprep.subr.bf16.mxu0 %v8583_v16 }
 0x672   : > { %2504 = vmatpush1.bf16.msra.mxu0 %v7566_v30  ;;  %v7589_v30 = vld [vmem:[#allocation16 + $0x170] sm:$0xff]  }
 0x673   : > { %2505 = vmatprep.subr.bf16.mxu0 %v8583_v16 }
 0x676   : > { %2506 = vmatpush1.bf16.msra.mxu0 %v7567_v31  ;;  %v7590_v31 = vld [vmem:[#allocation16 + $0x178] sm:$0xff]  }
 0x677   : > { %2507 = vmatprep.subr.bf16.mxu0 %v8583_v16 }
 0x67a   : > { %2508 = vmatpush1.bf16.msra.mxu0 %v7568_v32  ;;  %v7591_v32 = vld [vmem:[#allocation16 + $0x180] sm:$0xff]  }
 0x67b   : > { %2509 = vmatprep.subr.bf16.mxu0 %v8583_v16 }
 0x67e   : > { %2510 = vmatpush1.bf16.msra.mxu0 %v7569_v33  ;;  %v7592_v33 = vld [vmem:[#allocation16 + $0x188] sm:$0xff]  }
 0x67f   : > { %2511 = vmatprep.subr.bf16.mxu0 %v8583_v16 }
 0x682   : > { %2512 = vmatpush1.bf16.msra.mxu0 %v7570_v34  ;;  %v7593_v34 = vld [vmem:[#allocation16 + $0x190] sm:$0xff]  }
 0x683   : > { %2531 = vmatprep.subr.bf16.mxu0 %v9362_v17 }
 0x718   : > { %v2156_v35 = vpop.f32.mrb[24].mxu0 }
 0x719   : > { %v2158_v36 = vpop.f32.mrb[25].mxu0  ;;  %v2163_v39 = vpack.c.bf16 %v2156_v35, %v2156_v35 }
 0x71a   : > { %v2164_v37 = vpack.c.bf16 %v2158_v36, %v2158_v36  ;;  %v2160_v38 = vpop.f32.mrb[26].mxu0  ;;  %v7594_v36 = vld [vmem:[#allocation16 + $0x198] sm:$0xff]  }
 0x71b   : > { %v2161_v40 = vpop.f32.mrb[27].mxu0 }
 0x71c   : > { %6637 = vmatprep.mubr.msk.bf16.mxu1 %vm1518_vm5, %v2164_v37  ;;  %v7595_v40 = vld [vmem:[#allocation16 + $0x1a0] sm:$0xff]  }
 0x71d   : > { %2313 = vmatmul.mubr.bf16.vlgmr.msra.gmra.mrb[8].mxu1 %v2163_v39 }
 0x71e   : > { %2737 = vmatpush1.bf16.msra.mxu1 %v9365_v18  ;;  %2768 = vmatprep.mubr.bf16.mxu1 %v8583_v16 }
 0x71f   : > { %2941 = vmatprep.subr.bf16.mxu1 %v9362_v17 }
 0x720   : > { %v2360_v41 = vpop.f32.mrb[28].mxu0 }
 0x721   : > { %v2362_v42 = vpop.f32.mrb[29].mxu0  ;;  %v2367_v46 = vpack.c.bf16 %v2360_v41, %v2360_v41  ;;  %v7596_v41 = vld [vmem:[#allocation16 + $0x1a8] sm:$0xff]  }
 0x722   : > { %v2368_v43 = vpack.c.bf16 %v2362_v42, %v2362_v42  ;;  %v2364_v44 = vpop.f32.mrb[30].mxu0  ;;  %v7597_v42 = vld [vmem:[#allocation16 + $0x1b0] sm:$0xff]  }
 0x723   : > { %v2365_v47 = vpop.f32.mrb[31].mxu0 }
 0x724   : > { %6653 = vmatprep.mubr.msk.bf16.mxu0 %vm1518_vm5, %v2368_v43  ;;  %v7598_v43 = vld [vmem:[#allocation16 + $0x1b8] sm:$0xff]   ;;  %v7600_v47 = vld [vmem:[#allocation16 + $0x1c8] sm:$0xff]  }
 0x725   : > { %2518 = vmatmul.mubr.bf16.vlgmr.msra.gmra.mrb[32].mxu0 %v2367_v46  ;;  %6670 = vmatmul.mubr.msk.bf16.vlgmr.msra.gmra.mrb[12].mxu1 %vm2108_vm8, %v2732_v45  ;;  %v7599_v45 = vld [vmem:[#allocation16 + $0x1c0] sm:$0xff]  }
 0x726   : > { %2532 = vmatpush1.bf16.msra.mxu0 %v9365_v18  ;;  %2942 = vmatpush1.bf16.msra.mxu1 %v9365_v18 }
 0x727   : > { %3146 = vmatprep.subr.bf16.mxu1 %v9362_v17  ;;  %2563 = vmatprep.mubr.bf16.mxu0 %v8583_v16 }
 0x728   : > { %2973 = vmatprep.mubr.bf16.mxu1 %v8583_v16  ;;  %2690 = vmatprep.subr.bf16.mxu0 %v8583_v16 }
 0x72d   : > { %6654 = vmatmul.mubr.msk.bf16.vlgmr.msra.gmra.mrb[36].mxu0 %vm2108_vm8, %v2527_v48  ;;  %6686 = vmatmul.mubr.msk.bf16.vlgmr.msra.gmra.mrb[16].mxu1 %vm2108_vm8, %v2937_v49  ;;  %v7601_v48 = vld [vmem:[#allocation16 + $0x1d0] sm:$0xff]   ;;  %v7602_v49 = vld [vmem:[#allocation16 + $0x1d8] sm:$0xff]  }
 0x72e   : > { %3147 = vmatpush1.bf16.msra.mxu1 %v9365_v18  ;;  %3178 = vmatprep.mubr.bf16.mxu1 %v8583_v16 }
 0x72f   : > { %3351 = vmatprep.subr.bf16.mxu1 %v9362_v17  ;;  %2691 = vmatpush1.bf16.msra.mxu0 %v7571_v50  ;;  %v7603_v50 = vld [vmem:[#allocation16 + $0x1e0] sm:$0xff]  }
 0x730   : > { %2692 = vmatprep.subr.bf16.mxu0 %v8583_v16 }
 0x733   : > { %2693 = vmatpush1.bf16.msra.mxu0 %v7572_v51  ;;  %v7604_v51 = vld [vmem:[#allocation16 + $0x1e8] sm:$0xff]  }
 0x734   : > { %2694 = vmatprep.subr.bf16.mxu0 %v8583_v16 }
 0x735   : > { %6702 = vmatmul.mubr.msk.bf16.vlgmr.msra.gmra.mrb[20].mxu1 %vm2108_vm8, %v3142_v52  ;;  %v7605_v52 = vld [vmem:[#allocation16 + $0x1f0] sm:$0xff]  }
 0x736   : > { %3352 = vmatpush1.bf16.msra.mxu1 %v9365_v18  ;;  %3383 = vmatprep.mubr.bf16.mxu1 %v8583_v16 }
 0x737   : > { %2695 = vmatpush1.bf16.msra.mxu0 %v7573_v53  ;;  %7015 = vmatprep.subr.bf16.mxu1 %v8581_v0  ;;  %v7606_v53 = vld [vmem:[#allocation16 + $0x1f8] sm:$0xff]  }
 0x738   : > { %2696 = vmatprep.subr.bf16.mxu0 %v8583_v16 }
 0x73b   : > { %2697 = vmatpush1.bf16.msra.mxu0 %v7574_v54  ;;  %v7607_v54 = vld [vmem:[#allocation16 + $0x200] sm:$0xff]  }
 0x73c   : > { %2698 = vmatprep.subr.bf16.mxu0 %v8583_v16 }
 0x73d   : > { %6718 = vmatmul.mubr.msk.bf16.vlgmr.msra.gmra.mrb[24].mxu1 %vm2108_vm8, %v3347_v2  ;;  %v7613_v2 = vld [vmem:[#allocation16 + $0x230] sm:$0xff]  }
 0x73e   : > { %7017 = vmatprep.mubr.msk.bf16.mxu1 %vm8582_vm0, %v8581_v0 }
 0x73f   : > { %2699 = vmatpush1.bf16.msra.mxu0 %v7575_v55 }
 0x740   : > { %2700 = vmatprep.subr.bf16.mxu0 %v8583_v16 }
 0x743   : > { %2701 = vmatpush1.bf16.msra.mxu0 %v7576_v56  ;;  %v7608_v56 = vld [vmem:[#allocation16 + $0x208] sm:$0xff]  }
 0x744   : > { %2702 = vmatprep.subr.bf16.mxu0 %v8583_v16 }
 0x747   : > { %2703 = vmatpush1.bf16.msra.mxu0 %v7577_v57 }
 0x748   : > { %2704 = vmatprep.subr.bf16.mxu0 %v8583_v16 }
 0x74b   : > { %2705 = vmatpush1.bf16.msra.mxu0 %v7578_v58 }
 0x74c   : > { %2706 = vmatprep.subr.bf16.mxu0 %v8583_v16 }
 0x74f   : > { %2707 = vmatpush1.bf16.msra.mxu0 %v7579_v59 }
 0x750   : > { %2708 = vmatprep.subr.bf16.mxu0 %v8583_v16 }
 0x753   : > { %2709 = vmatpush1.bf16.msra.mxu0 %v7580_v60  ;;  %v7609_v60 = vld [vmem:[#allocation16 + $0x210] sm:$0xff]  }
 0x754   : > { %2710 = vmatprep.subr.bf16.mxu0 %v8583_v16 }
 0x757   : > { %2711 = vmatpush1.bf16.msra.mxu0 %v7581_v61  ;;  %v7610_v61 = vld [vmem:[#allocation16 + $0x218] sm:$0xff]  }
 0x758   : > { %2712 = vmatprep.subr.bf16.mxu0 %v8583_v16 }
 0x75b   : > { %2713 = vmatpush1.bf16.msra.mxu0 %v7582_v62  ;;  %v7611_v62 = vld [vmem:[#allocation16 + $0x220] sm:$0xff]  }
 0x75c   : > { %2714 = vmatprep.subr.bf16.mxu0 %v8583_v16 }
 0x75f   : > { %2715 = vmatpush1.bf16.msra.mxu0 %v7583_v63  ;;  %v7612_v63 = vld [vmem:[#allocation16 + $0x228] sm:$0xff]  }
 0x760   : > { %2716 = vmatprep.subr.bf16.mxu0 %v8583_v16 }
 0x763   : > { %2717 = vmatpush1.bf16.msra.mxu0 %v7584_v1 }
 0x764   : > { %2895 = vmatprep.subr.bf16.mxu0 %v8583_v16 }
 0x7f0   : > { %v9428_v3 = vpop.f32.mrb[8].mxu1 }
 0x7f1   : > { %v2316_v4 = vpop.f32.mrb[9].mxu1 }
 0x7f2   : > { %v2317_v5 = vpop.f32.mrb[10].mxu1 }
 0x7f3   : > { %v2318_v6 = vpop.f32.mrb[11].mxu1  ;;  %v7614_v5 = vld [vmem:[#allocation16 + $0x238] sm:$0xff]  }
 0x7f4   : > { %v7615_v6 = vld [vmem:[#allocation16 + $0x240] sm:$0xff]  }
 0x7f8   : > { %v9430_v8 = vpop.f32.mrb[12].mxu1 }
 0x7f9   : > { %v2772_v10 = vpop.f32.mrb[13].mxu1  ;;  %v2777_v44 = vpack.c.bf16 %v9430_v8, %v9430_v8  ;;  %v7616_v8 = vld [vmem:[#allocation16 + $0x248] sm:$0xff]  }
 0x7fa   : > { %v2774_v11 = vpop.f32.mrb[14].mxu1  ;;  %v2778_v22 = vpack.c.bf16 %v2772_v10, %v2772_v10  ;;  %v7617_v10 = vld [vmem:[#allocation16 + $0x250] sm:$0xff]  }
 0x7fb   : > { %v2775_v12 = vpop.f32.mrb[15].mxu1  ;;  %v7618_v11 = vld [vmem:[#allocation16 + $0x258] sm:$0xff]  }
 0x7fc   : > { %v7619_v12 = vld [vmem:[#allocation16 + $0x260] sm:$0xff]  }
 0x800   : > { %v2565_v13 = vpop.f32.mrb[36].mxu0  ;;  %v9432_v15 = vpop.f32.mrb[16].mxu1 }
 0x801   : > { %v2567_v17 = vpop.f32.mrb[37].mxu0  ;;  %v9434_v18 = vpop.f32.mrb[17].mxu1  ;;  %v2572_v24 = vpack.c.bf16 %v2565_v13, %v2565_v13  ;;  %v2982_v1 = vpack.c.bf16 %v9432_v15, %v9432_v15  ;;  %v7620_v13 = vld [vmem:[#allocation16 + $0x268] sm:$0xff]   ;;  %v7621_v15 = vld [vmem:[#allocation16 + $0x270] sm:$0xff]  }
 0x802   : > { %v2573_v19 = vpack.c.bf16 %v2567_v17, %v2567_v17  ;;  %v2569_v20 = vpop.f32.mrb[38].mxu0  ;;  %v2979_v23 = vpop.f32.mrb[18].mxu1  ;;  %v2983_v46 = vpack.c.bf16 %v9434_v18, %v9434_v18  ;;  %v7622_v17 = vld [vmem:[#allocation16 + $0x278] sm:$0xff]   ;;  %v7623_v18 = vld [vmem:[#allocation16 + $0x280] sm:$0xff]  }
 0x803   : > { %v2570_v25 = vpop.f32.mrb[39].mxu0  ;;  %v2980_v26 = vpop.f32.mrb[19].mxu1  ;;  %v7625_v20 = vld [vmem:[#allocation16 + $0x290] sm:$0xff]   ;;  %v7627_v23 = vld [vmem:[#allocation16 + $0x2a0] sm:$0xff]  }
 0x804   : > { %6669 = vmatprep.mubr.msk.bf16.mxu0 %vm1518_vm5, %v2573_v19  ;;  %v7624_v19 = vld [vmem:[#allocation16 + $0x288] sm:$0xff]   ;;  %v7629_v26 = vld [vmem:[#allocation16 + $0x2b0] sm:$0xff]  }
 0x805   : > { %2723 = vmatmul.mubr.bf16.vlgmr.msra.gmra.mrb[32].mxu0 %v2572_v24  ;;  %v7628_v25 = vld [vmem:[#allocation16 + $0x2a8] sm:$0xff]  }
 0x806   : > { %2896 = vmatpush1.bf16.msra.mxu0 %v7585_v21  ;;  %6685 = vmatprep.mubr.msk.bf16.mxu0 %vm1518_vm5, %v2778_v22  ;;  %v7626_v21 = vld [vmem:[#allocation16 + $0x298] sm:$0xff]  }
 0x807   : > { %2897 = vmatprep.subr.bf16.mxu0 %v8583_v16 }
 0x808   : > { %v9446_v35 = vpop.f32.mrb[20].mxu1 }
 0x809   : > { %v9448_v37 = vpop.f32.mrb[21].mxu1  ;;  %v3187_v22 = vpack.c.bf16 %v9446_v35, %v9446_v35  ;;  %v7638_v35 = vld [vmem:[#allocation16 + $0x2f8] sm:$0xff]  }
 0x80a   : > { %2898 = vmatpush1.bf16.msra.mxu0 %v7586_v27  ;;  %v3184_v38 = vpop.f32.mrb[22].mxu1  ;;  %v3188_v4 = vpack.c.bf16 %v9448_v37, %v9448_v37  ;;  %v7630_v27 = vld [vmem:[#allocation16 + $0x2b8] sm:$0xff]   ;;  %v7640_v37 = vld [vmem:[#allocation16 + $0x308] sm:$0xff]  }
 0x80b   : > { %2899 = vmatprep.subr.bf16.mxu0 %v8583_v16  ;;  %v3185_v39 = vpop.f32.mrb[23].mxu1 }
 0x80c   : > { %v7641_v39 = vld [vmem:[#allocation20] ss:$8 sps:$4 sm:$0xff]  }
 0x80e   : > { %2900 = vmatpush1.bf16.msra.mxu0 %v7587_v28  ;;  %v7631_v28 = vld [vmem:[#allocation16 + $0x2c0] sm:$0xff]  }
 0x80f   : > { %2901 = vmatprep.subr.bf16.mxu0 %v8583_v16 }
 0x810   : > { %v9469_v55 = vpop.f32.mrb[24].mxu1 }
 0x811   : > { %v9471_v57 = vpop.f32.mrb[25].mxu1  ;;  %v3392_v38 = vpack.c.bf16 %v9469_v55, %v9469_v55 }
 0x812   : > { %2902 = vmatpush1.bf16.msra.mxu0 %v7588_v29  ;;  %v3389_v58 = vpop.f32.mrb[26].mxu1  ;;  %v3393_v24 = vpack.c.bf16 %v9471_v57, %v9471_v57  ;;  %v7632_v29 = vld [vmem:[#allocation16 + $0x2c8] sm:$0xff]   ;;  %v3553_v57 = vld [vmem:[#allocation19] sm:$0xf] }
 0x813   : > { %2903 = vmatprep.subr.bf16.mxu0 %v8583_v16  ;;  %v3390_v59 = vpop.f32.mrb[27].mxu1  ;;  %v7649_v58 = vld [vmem:[#allocation20 + $0x44] ss:$8 sps:$4 sm:$0xff]  }
 0x814   : > { %v7647_v59 = vld [vmem:[#allocation20 + $0x40] ss:$8 sps:$4 sm:$0xff]  }
 0x816   : > { %2904 = vmatpush1.bf16.msra.mxu0 %v7589_v30  ;;  %v7633_v30 = vld [vmem:[#allocation16 + $0x2d0] sm:$0xff]  }
 0x817   : > { %2905 = vmatprep.subr.bf16.mxu0 %v8583_v16 }
 0x81a   : > { %2906 = vmatpush1.bf16.msra.mxu0 %v7590_v31  ;;  %v7634_v31 = vld [vmem:[#allocation16 + $0x2d8] sm:$0xff]  }
 0x81b   : > { %2907 = vmatprep.subr.bf16.mxu0 %v8583_v16 }
 0x81e   : > { %2908 = vmatpush1.bf16.msra.mxu0 %v7591_v32  ;;  %v7635_v32 = vld [vmem:[#allocation16 + $0x2e0] sm:$0xff]  }
 0x81f   : > { %2909 = vmatprep.subr.bf16.mxu0 %v8583_v16 }
 0x822   : > { %2910 = vmatpush1.bf16.msra.mxu0 %v7592_v33  ;;  %v7636_v33 = vld [vmem:[#allocation16 + $0x2e8] sm:$0xff]  }
 0x823   : > { %2911 = vmatprep.subr.bf16.mxu0 %v8583_v16 }
 0x826   : > { %2912 = vmatpush1.bf16.msra.mxu0 %v7593_v34  ;;  %v7637_v34 = vld [vmem:[#allocation16 + $0x2f0] sm:$0xff]  }
 0x827   : > { %2913 = vmatprep.subr.bf16.mxu0 %v8583_v16 }
 0x82a   : > { %2914 = vmatpush1.bf16.msra.mxu0 %v7594_v36  ;;  %v7639_v36 = vld [vmem:[#allocation16 + $0x300] sm:$0xff]  }
 0x82b   : > { %2915 = vmatprep.subr.bf16.mxu0 %v8583_v16 }
 0x82e   : > { %2916 = vmatpush1.bf16.msra.mxu0 %v7595_v40  ;;  %v7643_v40 = vld [vmem:[#allocation20 + $0x4] ss:$8 sps:$4 sm:$0xff]  }
 0x82f   : > { %2917 = vmatprep.subr.bf16.mxu0 %v8583_v16 }
 0x832   : > { %2918 = vmatpush1.bf16.msra.mxu0 %v7596_v41  ;;  %v7646_v41 = vld [vmem:[#allocation20 + $0x14] ss:$8 sps:$4 sm:$0xff]  }
 0x833   : > { %2919 = vmatprep.subr.bf16.mxu0 %v8583_v16 }
 0x836   : > { %2920 = vmatpush1.bf16.msra.mxu0 %v7597_v42  ;;  %v7644_v42 = vld [vmem:[#allocation20 + $0x10] ss:$8 sps:$4 sm:$0xff]  }
 0x837   : > { %2921 = vmatprep.subr.bf16.mxu0 %v8583_v16 }
 0x83a   : > { %2922 = vmatpush1.bf16.msra.mxu0 %v7598_v43  ;;  %v7652_v43 = vld [vmem:[#allocation20 + $0x24] ss:$8 sps:$4 sm:$0xff]  }
 0x83b   : > { %3100 = vmatprep.subr.bf16.mxu0 %v8583_v16 }
 0x83d   : > { %2928 = vmatmul.mubr.bf16.vlgmr.msra.gmra.mrb[32].mxu0 %v2777_v44  ;;  %v7650_v44 = vld [vmem:[#allocation20 + $0x20] ss:$8 sps:$4 sm:$0xff]  }
 0x83e   : > { %3101 = vmatpush1.bf16.msra.mxu0 %v7599_v45  ;;  %6701 = vmatprep.mubr.msk.bf16.mxu0 %vm1518_vm5, %v2983_v46  ;;  %v7658_v45 = vld [vmem:[#allocation20 + $0x34] ss:$8 sps:$4 sm:$0xff]   ;;  %v7656_v46 = vld [vmem:[#allocation20 + $0x30] ss:$8 sps:$4 sm:$0xff]  }
 0x83f   : > { %3102 = vmatprep.subr.bf16.mxu0 %v8583_v16 }
 0x842   : > { %3103 = vmatpush1.bf16.msra.mxu0 %v7600_v47  ;;  %v2106_v47 = vld [vmem:[#allocation17] sm:$0x1] }
 0x843   : > { %3104 = vmatprep.subr.bf16.mxu0 %v8583_v16 }
 0x846   : > { %3105 = vmatpush1.bf16.msra.mxu0 %v7601_v48  ;;  %v2320_v48 = vadd.f32 %v9428_v3, %v2106_v47  ;;  %v3712_v3 = vld [vmem:[#allocation19 + $0x4] sm:$0xf] }
 0x847   : > { %3106 = vmatprep.subr.bf16.mxu0 %v8583_v16 }
 0x84a   : > { %3107 = vmatpush1.bf16.msra.mxu0 %v7602_v49 }
 0x84b   : > { %3108 = vmatprep.subr.bf16.mxu0 %v8583_v16 }
 0x84e   : > { %3109 = vmatpush1.bf16.msra.mxu0 %v7603_v50 }
 0x84f   : > { %3110 = vmatprep.subr.bf16.mxu0 %v8583_v16 }
 0x852   : > { %3111 = vmatpush1.bf16.msra.mxu0 %v7604_v51 }
 0x853   : > { %3112 = vmatprep.subr.bf16.mxu0 %v8583_v16 }
 0x856   : > { %3113 = vmatpush1.bf16.msra.mxu0 %v7605_v52  ;;  %v3560_v52 = vsel %vm3558_vm9, 65535, %v8583_v16 }
 0x857   : > { %3114 = vmatprep.subr.bf16.mxu0 %v8583_v16 }
 0x85a   : > { %3115 = vmatpush1.bf16.msra.mxu0 %v7606_v53 }
 0x85b   : > { %3116 = vmatprep.subr.bf16.mxu0 %v8583_v16 }
 0x85e   : > { %3117 = vmatpush1.bf16.msra.mxu0 %v7607_v54 }
 0x85f   : > { %3118 = vmatprep.subr.bf16.mxu0 %v8583_v16 }
 0x862   : > { %3119 = vmatpush1.bf16.msra.mxu0 %v7608_v56 }
 0x863   : > { %3120 = vmatprep.subr.bf16.mxu0 %v8583_v16 }
 0x866   : > { %3121 = vmatpush1.bf16.msra.mxu0 %v7609_v60  ;;  %v7655_v60 = vld [vmem:[#allocation20 + $0x54] ss:$8 sps:$4 sm:$0xff]  }
 0x867   : > { %3122 = vmatprep.subr.bf16.mxu0 %v8583_v16 }
 0x86a   : > { %3123 = vmatpush1.bf16.msra.mxu0 %v7610_v61  ;;  %v7653_v61 = vld [vmem:[#allocation20 + $0x50] ss:$8 sps:$4 sm:$0xff]  }
 0x86b   : > { %3124 = vmatprep.subr.bf16.mxu0 %v8583_v16 }
 0x86e   : > { %3125 = vmatpush1.bf16.msra.mxu0 %v7611_v62  ;;  %v7661_v62 = vld [vmem:[#allocation20 + $0x64] ss:$8 sps:$4 sm:$0xff]  }
 0x86f   : > { %3126 = vmatprep.subr.bf16.mxu0 %v8583_v16 }
 0x872   : > { %3127 = vmatpush1.bf16.msra.mxu0 %v7612_v63  ;;  %v7659_v63 = vld [vmem:[#allocation20 + $0x60] ss:$8 sps:$4 sm:$0xff]  }
 0x873   : > { %3305 = vmatprep.subr.bf16.mxu0 %v8583_v16 }
 0x875   : > { %3133 = vmatmul.mubr.bf16.vlgmr.msra.gmra.mrb[32].mxu0 %v2982_v1  ;;  %v7662_v1 = vld [vmem:[#allocation20 + $0x70] ss:$8 sps:$4 sm:$0xff]  }
 0x876   : > { %3306 = vmatpush1.bf16.msra.mxu0 %v7613_v2  ;;  %6717 = vmatprep.mubr.msk.bf16.mxu0 %vm1518_vm5, %v3188_v4  ;;  %v7664_v2 = vld [vmem:[#allocation20 + $0x74] ss:$8 sps:$4 sm:$0xff]  }
 0x877   : > { %3307 = vmatprep.subr.bf16.mxu0 %v8583_v16 }
 0x87a   : > { %3308 = vmatpush1.bf16.msra.mxu0 %v7614_v5 }
 0x87b   : > { %3309 = vmatprep.subr.bf16.mxu0 %v8583_v16 }
 0x87e   : > { %3310 = vmatpush1.bf16.msra.mxu0 %v7615_v6 }
 0x87f   : > { %3311 = vmatprep.subr.bf16.mxu0 %v8583_v16 }
 0x882   : > { %3312 = vmatpush1.bf16.msra.mxu0 %v7616_v8 }
 0x883   : > { %3313 = vmatprep.subr.bf16.mxu0 %v8583_v16 }
 0x886   : > { %3314 = vmatpush1.bf16.msra.mxu0 %v7617_v10 }
 0x887   : > { %3315 = vmatprep.subr.bf16.mxu0 %v8583_v16 }
 0x88a   : > { %3316 = vmatpush1.bf16.msra.mxu0 %v7618_v11 }
 0x88b   : > { %3317 = vmatprep.subr.bf16.mxu0 %v8583_v16 }
 0x88e   : > { %3318 = vmatpush1.bf16.msra.mxu0 %v7619_v12 }
 0x88f   : > { %3319 = vmatprep.subr.bf16.mxu0 %v8583_v16 }
 0x892   : > { %3320 = vmatpush1.bf16.msra.mxu0 %v7620_v13 }
 0x893   : > { %3321 = vmatprep.subr.bf16.mxu0 %v8583_v16 }
 0x896   : > { %3322 = vmatpush1.bf16.msra.mxu0 %v7621_v15 }
 0x897   : > { %3323 = vmatprep.subr.bf16.mxu0 %v8583_v16 }
 0x89a   : > { %3324 = vmatpush1.bf16.msra.mxu0 %v7622_v17 }
 0x89b   : > { %3325 = vmatprep.subr.bf16.mxu0 %v8583_v16 }
 0x89e   : > { %3326 = vmatpush1.bf16.msra.mxu0 %v7623_v18  ;;  %v3853_v18 = vld [vmem:[#allocation19 + $0x8] sm:$0xf] }
 0x89f   : > { %3327 = vmatprep.subr.bf16.mxu0 %v8583_v16 }
 0x8a2   : > { %3328 = vmatpush1.bf16.msra.mxu0 %v7624_v19  ;;  %v7667_v19 = vld [vmem:[#allocation20 + $0x84] ss:$8 sps:$4 sm:$0xff]  }
 0x8a3   : > { %3329 = vmatprep.subr.bf16.mxu0 %v8583_v16 }
 0x8a6   : > { %3330 = vmatpush1.bf16.msra.mxu0 %v7625_v20  ;;  %v7665_v20 = vld [vmem:[#allocation20 + $0x80] ss:$8 sps:$4 sm:$0xff]  }
 0x8a7   : > { %3331 = vmatprep.subr.bf16.mxu0 %v8583_v16 }
 0x8aa   : > { %3332 = vmatpush1.bf16.msra.mxu0 %v7626_v21  ;;  %v7670_v21 = vld [vmem:[#allocation20 + $0x94] ss:$8 sps:$4 sm:$0xff]  }
 0x8ab   : > { %3510 = vmatprep.subr.bf16.mxu0 %v8583_v16 }
 0x8ad   : > { %3338 = vmatmul.mubr.bf16.vlgmr.msra.gmra.mrb[32].mxu0 %v3187_v22  ;;  %v7668_v22 = vld [vmem:[#allocation20 + $0x90] ss:$8 sps:$4 sm:$0xff]  }
 0x8ae   : > { %3511 = vmatpush1.bf16.msra.mxu0 %v7627_v23  ;;  %6733 = vmatprep.mubr.msk.bf16.mxu0 %vm1518_vm5, %v3393_v24  ;;  %v7673_v23 = vld [vmem:[#allocation20 + $0xa4] ss:$8 sps:$4 sm:$0xff]   ;;  %v7671_v24 = vld [vmem:[#allocation20 + $0xa0] ss:$8 sps:$4 sm:$0xff]  }
 0x8af   : > { %3512 = vmatprep.subr.bf16.mxu0 %v8583_v16 }
 0x8b2   : > { %3513 = vmatpush1.bf16.msra.mxu0 %v7628_v25  ;;  %v7676_v25 = vld [vmem:[#allocation20 + $0xb4] ss:$8 sps:$4 sm:$0xff]  }
 0x8b3   : > { %3514 = vmatprep.subr.bf16.mxu0 %v8583_v16 }
 0x8b6   : > { %3515 = vmatpush1.bf16.msra.mxu0 %v7629_v26  ;;  %v7674_v26 = vld [vmem:[#allocation20 + $0xb0] ss:$8 sps:$4 sm:$0xff]  }
 0x8b7   : > { %3516 = vmatprep.subr.bf16.mxu0 %v8583_v16 }
 0x8ba   : > { %3517 = vmatpush1.bf16.msra.mxu0 %v7630_v27 }
 0x8bb   : > { %3518 = vmatprep.subr.bf16.mxu0 %v8583_v16 }
 0x8be   : > { %3519 = vmatpush1.bf16.msra.mxu0 %v7631_v28 }
 0x8bf   : > { %3520 = vmatprep.subr.bf16.mxu0 %v8583_v16 }
 0x8c2   : > { %3521 = vmatpush1.bf16.msra.mxu0 %v7632_v29 }
 0x8c3   : > { %3522 = vmatprep.subr.bf16.mxu0 %v8583_v16 }
 0x8c6   : > { %3523 = vmatpush1.bf16.msra.mxu0 %v7633_v30 }
 0x8c7   : > { %3524 = vmatprep.subr.bf16.mxu0 %v8583_v16 }
 0x8ca   : > { %3525 = vmatpush1.bf16.msra.mxu0 %v7634_v31 }
 0x8cb   : > { %3526 = vmatprep.subr.bf16.mxu0 %v8583_v16 }
 0x8ce   : > { %3527 = vmatpush1.bf16.msra.mxu0 %v7635_v32 }
 0x8cf   : > { %3528 = vmatprep.subr.bf16.mxu0 %v8583_v16 }
 0x8d2   : > { %3529 = vmatpush1.bf16.msra.mxu0 %v7636_v33 }
 0x8d3   : > { %3530 = vmatprep.subr.bf16.mxu0 %v8583_v16 }
 0x8d6   : > { %3531 = vmatpush1.bf16.msra.mxu0 %v7637_v34  ;;  %v7679_v34 = vld [vmem:[#allocation20 + $0xc4] ss:$8 sps:$4 sm:$0xff]  }
 0x8d7   : > { %3532 = vmatprep.subr.bf16.mxu0 %v8583_v16 }
 0x8da   : > { %3533 = vmatpush1.bf16.msra.mxu0 %v7638_v35 }
 0x8db   : > { %3534 = vmatprep.subr.bf16.mxu0 %v8583_v16 }
 0x8de   : > { %3535 = vmatpush1.bf16.msra.mxu0 %v7639_v36 }
 0x8df   : > { %3536 = vmatprep.subr.bf16.mxu0 %v8583_v16 }
 0x8e2   : > { %3537 = vmatpush1.bf16.msra.mxu0 %v7640_v37  ;;  %v3994_v37 = vld [vmem:[#allocation19 + $0xc] sm:$0xf] }
 0x8e3   : > { %3657 = vmatprep.subr.bf16.mxu0 %v7643_v40  ;;  %v7680_v40 = vld [vmem:[#allocation20 + $0xd0] ss:$8 sps:$4 sm:$0xff]  }
 0x8e5   : > { %3543 = vmatmul.mubr.bf16.vlgmr.msra.gmra.mrb[32].mxu0 %v3392_v38  ;;  %v7677_v38 = vld [vmem:[#allocation20 + $0xc0] ss:$8 sps:$4 sm:$0xff]  }
 0x8e6   : > { %3689 = vmatprep.mubr.bf16.mxu0 %v8583_v16  ;;  %3658 = vmatpush1.bf16.msra.mxu0 %v7641_v39  ;;  %v7682_v39 = vld [vmem:[#allocation20 + $0xd4] ss:$8 sps:$4 sm:$0xff]  }
 0x8e7   : > { %3659 = vmatprep.subr.bf16.mxu0 %v7646_v41  ;;  %v7685_v41 = vld [vmem:[#allocation20 + $0xe4] ss:$8 sps:$4 sm:$0xff]  }
 0x8ea   : > { %3660 = vmatpush1.bf16.msra.mxu0 %v7644_v42  ;;  %v7683_v42 = vld [vmem:[#allocation20 + $0xe0] ss:$8 sps:$4 sm:$0xff]  }
 0x8eb   : > { %3661 = vmatprep.subr.bf16.mxu0 %v7652_v43  ;;  %v7688_v43 = vld [vmem:[#allocation20 + $0xf4] ss:$8 sps:$4 sm:$0xff]  }
 0x8ee   : > { %3662 = vmatpush1.bf16.msra.mxu0 %v7650_v44  ;;  %v7686_v44 = vld [vmem:[#allocation20 + $0xf0] ss:$8 sps:$4 sm:$0xff]  }
 0x8ef   : > { %3663 = vmatprep.subr.bf16.mxu0 %v7658_v45 }
 0x8f2   : > { %3664 = vmatpush1.bf16.msra.mxu0 %v7656_v46 }
 0x9b8   : > { %v3544_v49 = vpop.f32.mrb[32].mxu0 }
 0x9b9   : > { %v7064_v50 = vadd.f32 %v3544_v49, %v2320_v48  ;;  %v3546_v51 = vpop.f32.mrb[33].mxu0  ;;  %v7691_v48 = vld [vmem:[#allocation20 + $0x104] ss:$8 sps:$4 sm:$0xff]  }
 0x9ba   : > { %v3547_v53 = vpop.f32.mrb[34].mxu0  ;;  %v4135_v51 = vld [vmem:[#allocation19 + $0x10] sm:$0xf] }
 0x9bb   : > { %v3551_v54 = vpack.c.bf16 %v7064_v50, %v7064_v50  ;;  %v3548_v55 = vpop.f32.mrb[35].mxu0  ;;  %v7694_v53 = vld [vmem:[#allocation20 + $0x114] ss:$8 sps:$4 sm:$0xff]  }
 0x9bc   : > { %v7697_v55 = vld [vmem:[#allocation20 + $0x124] ss:$8 sps:$4 sm:$0xff]  }
 0x9bd   : > { %v9521_v56 = vand.u32 %v3560_v52, %v3551_v54  ;;  %v7689_v52 = vld [vmem:[#allocation20 + $0x100] ss:$8 sps:$4 sm:$0xff]   ;;  %v7692_v54 = vld [vmem:[#allocation20 + $0x110] ss:$8 sps:$4 sm:$0xff]  }
 0x9bf   : > { %7016 = vmatpush3.bf16.msra.mxu1 %v9521_v56 }
 0x9c0   : > { %7021 = vmatprep.subr.bf16.mxu1 %v8581_v0 }
 0x9c2   : > { %7018 = vmatmul.mubr.msk.bf16.vlgmr.msra.gmra.mrb[28].mxu1 %vm3554_vm10, %v3553_v57  ;;  %v7695_v57 = vld [vmem:[#allocation20 + $0x120] ss:$8 sps:$4 sm:$0xff]  }
 0x9c3   : > { %7022 = vmatpush3.bf16.msra.mxu1 %v9521_v56  ;;  %7023 = vmatprep.mubr.msk.bf16.mxu1 %vm8582_vm0, %v8581_v0 }
 0x9c4   : > { %3809 = vmatprep.subr.bf16.mxu1 %v7649_v58  ;;  %v7700_v58 = vld [vmem:[#allocation20 + $0x134] ss:$8 sps:$4 sm:$0xff]  }
 0x9ca   : > { %7024 = vmatmul.mubr.msk.bf16.vlgmr.msra.gmra.mrb[32].mxu1 %vm3554_vm10, %v3712_v3  ;;  %v7698_v3 = vld [vmem:[#allocation20 + $0x130] ss:$8 sps:$4 sm:$0xff]  }
 0x9cb   : > { %3810 = vmatpush1.bf16.msra.mxu1 %v7647_v59  ;;  %3841 = vmatprep.mubr.bf16.mxu1 %v8583_v16 }
 0x9cc   : > { %3811 = vmatprep.subr.bf16.mxu1 %v7655_v60 }
 0x9cf   : > { %3812 = vmatpush1.bf16.msra.mxu1 %v7653_v61 }
 0x9d0   : > { %3813 = vmatprep.subr.bf16.mxu1 %v7661_v62  ;;  %v7703_v62 = vld [vmem:[#allocation20 + $0x144] ss:$8 sps:$4 sm:$0xff]  }
 0x9d3   : > { %3814 = vmatpush1.bf16.msra.mxu1 %v7659_v63 }
 0x9d4   : > { %3815 = vmatprep.subr.bf16.mxu1 %v7664_v2  ;;  %v4276_v2 = vld [vmem:[#allocation19 + $0x14] sm:$0xf] }
 0x9d7   : > { %3816 = vmatpush1.bf16.msra.mxu1 %v7662_v1 }
 0x9d8   : > { %7027 = vmatprep.subr.bf16.mxu1 %v8581_v0 }
 0xa95   : > { %v3598_v4 = vpop.f32.mrb[28].mxu1 }
 0xa96   : > { %v3604_v5 = vpack.c.bf16 %v3598_v4, %v3598_v4  ;;  %v7019_v6 = vpop.f32.mrb[29].mxu1  ;;  %v7701_v4 = vld [vmem:[#allocation20 + $0x140] ss:$8 sps:$4 sm:$0xff]  }
 0xa97   : > { %v3601_v8 = vpop.f32.mrb[30].mxu1  ;;  %v7704_v6 = vld [vmem:[#allocation20 + $0x150] ss:$8 sps:$4 sm:$0xff]  }
 0xa98   : > { %v7020_v10 = vpop.f32.mrb[31].mxu1  ;;  %6743 = vmatmul.mubr.msk.bf16.vlgmr.msra.gmra.mrb[40].mxu0 %vm3653_vm11, %v3604_v5  ;;  %v7706_v5 = vld [vmem:[#allocation20 + $0x154] ss:$8 sps:$4 sm:$0xff]   ;;  %v7709_v8 = vld [vmem:[#allocation20 + $0x164] ss:$8 sps:$4 sm:$0xff]  }
 0xa99   : > { %5170 = vmatprep.mubr.bf16.mxu0 %v8583_v16  ;;  %v7707_v10 = vld [vmem:[#allocation20 + $0x160] ss:$8 sps:$4 sm:$0xff]  }
 0xa9d   : > { %v3750_v11 = vpop.f32.mrb[32].mxu1 }
 0xa9e   : > { %v3756_v12 = vpack.c.bf16 %v3750_v11, %v3750_v11  ;;  %v7025_v13 = vpop.f32.mrb[33].mxu1  ;;  %v7712_v11 = vld [vmem:[#allocation20 + $0x174] ss:$8 sps:$4 sm:$0xff]  }
 0xa9f   : > { %v3753_v15 = vpop.f32.mrb[34].mxu1 }
 0xaa0   : > { %v7026_v17 = vpop.f32.mrb[35].mxu1  ;;  %6753 = vmatmul.mubr.msk.bf16.vlgmr.msra.gmra.mrb[36].mxu1 %vm3653_vm11, %v3756_v12  ;;  %v7710_v12 = vld [vmem:[#allocation20 + $0x170] ss:$8 sps:$4 sm:$0xff]  }
 0xaa1   : > { %7028 = vmatpush3.bf16.msra.mxu1 %v9521_v56  ;;  %7029 = vmatprep.mubr.msk.bf16.mxu1 %vm8582_vm0, %v8581_v0 }
 0xaa2   : > { %3950 = vmatprep.subr.bf16.mxu1 %v7667_v19 }
 0xaa8   : > { %7030 = vmatmul.mubr.msk.bf16.vlgmr.msra.gmra.mrb[40].mxu1 %vm3554_vm10, %v3853_v18  ;;  %v7715_v18 = vld [vmem:[#allocation20 + $0x184] ss:$8 sps:$4 sm:$0xff]  }
 0xaa9   : > { %3982 = vmatprep.mubr.bf16.mxu1 %v8583_v16  ;;  %3951 = vmatpush1.bf16.msra.mxu1 %v7665_v20 }
 0xaaa   : > { %3952 = vmatprep.subr.bf16.mxu1 %v7670_v21  ;;  %v4417_v21 = vld [vmem:[#allocation19 + $0x18] sm:$0xf] }
 0xaad   : > { %3953 = vmatpush1.bf16.msra.mxu1 %v7668_v22  ;;  %v7713_v22 = vld [vmem:[#allocation20 + $0x180] ss:$8 sps:$4 sm:$0xff]  }
 0xaae   : > { %3954 = vmatprep.subr.bf16.mxu1 %v7673_v23  ;;  %v7718_v23 = vld [vmem:[#allocation20 + $0x194] ss:$8 sps:$4 sm:$0xff]  }
 0xab1   : > { %3955 = vmatpush1.bf16.msra.mxu1 %v7671_v24  ;;  %v7716_v24 = vld [vmem:[#allocation20 + $0x190] ss:$8 sps:$4 sm:$0xff]  }
 0xab2   : > { %3956 = vmatprep.subr.bf16.mxu1 %v7676_v25  ;;  %v7721_v25 = vld [vmem:[#allocation20 + $0x1a4] ss:$8 sps:$4 sm:$0xff]  }
 0xab5   : > { %3957 = vmatpush1.bf16.msra.mxu1 %v7674_v26  ;;  %v7719_v26 = vld [vmem:[#allocation20 + $0x1a0] ss:$8 sps:$4 sm:$0xff]  }
 0xab6   : > { %7033 = vmatprep.subr.bf16.mxu1 %v8581_v0 }
 0xb6b   : > { %v9541_v27 = vpop.f32.mrb[40].mxu0 }
 0xb6c   : > { %v9543_v28 = vpop.f32.mrb[41].mxu0 }
 0xb6d   : > { %v3695_v29 = vpop.f32.mrb[42].mxu0 }
 0xb6e   : > { %v3696_v30 = vpop.f32.mrb[43].mxu0  ;;  %v7724_v29 = vld [vmem:[#allocation20 + $0x1b4] ss:$8 sps:$4 sm:$0xff]  }
 0xb7b   : > { %v3891_v31 = vpop.f32.mrb[40].mxu1 }
 0xb7c   : > { %v3897_v32 = vpack.c.bf16 %v3891_v31, %v3891_v31  ;;  %v7031_v33 = vpop.f32.mrb[41].mxu1 }
 0xb7d   : > { %v3894_v35 = vpop.f32.mrb[42].mxu1 }
 0xb7e   : > { %v7032_v36 = vpop.f32.mrb[43].mxu1  ;;  %6763 = vmatmul.mubr.msk.bf16.vlgmr.msra.gmra.mrb[36].mxu1 %vm3653_vm11, %v3897_v32 }
 0xb7f   : > { %7034 = vmatpush3.bf16.msra.mxu1 %v9521_v56  ;;  %7035 = vmatprep.mubr.msk.bf16.mxu1 %vm8582_vm0, %v8581_v0 }
 0xb80   : > { %4091 = vmatprep.subr.bf16.mxu1 %v7679_v34  ;;  %v3552_v34 = vld [vmem:[#allocation22] sm:$0x3] }
 0xb81   : > { %v3702_v35 = vrot.slane %v3552_v34, %v9316_v7  ;;  %v3706_v36 = vrot.slane %v3552_v34, %v9318_v9  ;;  %v7779_v34 = vld [vmem:[#allocation25 + $0x110] ss:$8 sps:$4 sm:$0xff]  }
 0xb86   : > { %7036 = vmatmul.mubr.msk.bf16.vlgmr.msra.gmra.mrb[44].mxu1 %vm3554_vm10, %v3994_v37  ;;  %v3709_v37 = vadd.f32 %v3702_v35, %v9541_v27  ;;  %v7725_v27 = vld [vmem:[#allocation23] sm:$0x7f]  }
 0xb87   : > { %4092 = vmatpush1.bf16.msra.mxu1 %v7677_v38  ;;  %4123 = vmatprep.mubr.bf16.mxu1 %v8583_v16  ;;  %v3710_v38 = vadd.f32 %v3706_v36, %v9543_v28  ;;  %v7726_v28 = vld [vmem:[#allocation25] ss:$8 sps:$4 sm:$0xff]   ;;  %v7784_v35 = vld [vmem:[#allocation25 + $0x124] ss:$8 sps:$4 sm:$0xff]  }
 0xb88   : > { %4093 = vmatprep.subr.bf16.mxu1 %v7682_v39  ;;  %v7782_v36 = vld [vmem:[#allocation25 + $0x120] ss:$8 sps:$4 sm:$0xff]  }
 0xb8b   : > { %4094 = vmatpush1.bf16.msra.mxu1 %v7680_v40 }
 0xb8c   : > { %4095 = vmatprep.subr.bf16.mxu1 %v7685_v41 }
 0xb8f   : > { %4096 = vmatpush1.bf16.msra.mxu1 %v7683_v42 }
 0xb90   : > { %4097 = vmatprep.subr.bf16.mxu1 %v7688_v43 }
 0xb93   : > { %4098 = vmatpush1.bf16.msra.mxu1 %v7686_v44 }
 0xb94   : > { %7039 = vmatprep.subr.bf16.mxu1 %v8581_v0 }
 0xc59   : > { %v4032_v45 = vpop.f32.mrb[44].mxu1 }
 0xc5a   : > { %v4038_v46 = vpack.c.bf16 %v4032_v45, %v4032_v45  ;;  %v7037_v47 = vpop.f32.mrb[45].mxu1 }
 0xc5b   : > { %v4035_v49 = vpop.f32.mrb[46].mxu1 }
 0xc5c   : > { %v7038_v50 = vpop.f32.mrb[47].mxu1  ;;  %6773 = vmatmul.mubr.msk.bf16.vlgmr.msra.gmra.mrb[36].mxu1 %vm3653_vm11, %v4038_v46 }
 0xc5d   : > { %7040 = vmatpush3.bf16.msra.mxu1 %v9521_v56  ;;  %7041 = vmatprep.mubr.msk.bf16.mxu1 %vm8582_vm0, %v8581_v0  ;;  %v7728_v50 = vld [vmem:[#allocation25 + $0x4] ss:$8 sps:$4 sm:$0xff]  }
 0xc5e   : > { %4232 = vmatprep.subr.bf16.mxu1 %v7691_v48 }
 0xc64   : > { %7042 = vmatmul.mubr.msk.bf16.vlgmr.msra.gmra.mrb[48].mxu1 %vm3554_vm10, %v4135_v51 }
 0xc65   : > { %4233 = vmatpush1.bf16.msra.mxu1 %v7689_v52  ;;  %4264 = vmatprep.mubr.bf16.mxu1 %v8583_v16  ;;  %v7731_v52 = vld [vmem:[#allocation25 + $0x14] ss:$8 sps:$4 sm:$0xff]  }
 0xc66   : > { %4234 = vmatprep.subr.bf16.mxu1 %v7694_v53  ;;  %v7729_v53 = vld [vmem:[#allocation25 + $0x10] ss:$8 sps:$4 sm:$0xff]  }
 0xc69   : > { %4235 = vmatpush1.bf16.msra.mxu1 %v7692_v54  ;;  %v7734_v54 = vld [vmem:[#allocation25 + $0x24] ss:$8 sps:$4 sm:$0xff]  }
 0xc6a   : > { %4236 = vmatprep.subr.bf16.mxu1 %v7697_v55  ;;  %v7737_v55 = vld [vmem:[#allocation25 + $0x34] ss:$8 sps:$4 sm:$0xff]  }
 0xc6d   : > { %4237 = vmatpush1.bf16.msra.mxu1 %v7695_v57  ;;  %v7735_v57 = vld [vmem:[#allocation25 + $0x30] ss:$8 sps:$4 sm:$0xff]  }
 0xc6e   : > { %4238 = vmatprep.subr.bf16.mxu1 %v7700_v58  ;;  %v7740_v58 = vld [vmem:[#allocation25 + $0x44] ss:$8 sps:$4 sm:$0xff]  }
 0xc71   : > { %4239 = vmatpush1.bf16.msra.mxu1 %v7698_v3  ;;  %v7738_v3 = vld [vmem:[#allocation25 + $0x40] ss:$8 sps:$4 sm:$0xff]  }
 0xc72   : > { %7045 = vmatprep.subr.bf16.mxu1 %v8581_v0 }
 0xd37   : > { %v4173_v59 = vpop.f32.mrb[48].mxu1 }
 0xd38   : > { %v4179_v60 = vpack.c.bf16 %v4173_v59, %v4173_v59  ;;  %v7043_v61 = vpop.f32.mrb[49].mxu1  ;;  %v7743_v59 = vld [vmem:[#allocation25 + $0x54] ss:$8 sps:$4 sm:$0xff]  }
 0xd39   : > { %v4176_v63 = vpop.f32.mrb[50].mxu1  ;;  %v7746_v61 = vld [vmem:[#allocation25 + $0x64] ss:$8 sps:$4 sm:$0xff]  }
 0xd3a   : > { %v7044_v1 = vpop.f32.mrb[51].mxu1  ;;  %6783 = vmatmul.mubr.msk.bf16.vlgmr.msra.gmra.mrb[36].mxu1 %vm3653_vm11, %v4179_v60  ;;  %v7741_v60 = vld [vmem:[#allocation25 + $0x50] ss:$8 sps:$4 sm:$0xff]   ;;  %v7749_v63 = vld [vmem:[#allocation25 + $0x74] ss:$8 sps:$4 sm:$0xff]  }
 0xd3b   : > { %7046 = vmatpush3.bf16.msra.mxu1 %v9521_v56  ;;  %7047 = vmatprep.mubr.msk.bf16.mxu1 %vm8582_vm0, %v8581_v0  ;;  %v7747_v1 = vld [vmem:[#allocation25 + $0x70] ss:$8 sps:$4 sm:$0xff]  }
 0xd3c   : > { %4373 = vmatprep.subr.bf16.mxu1 %v7703_v62  ;;  %v7744_v62 = vld [vmem:[#allocation25 + $0x60] ss:$8 sps:$4 sm:$0xff]  }
 0xd42   : > { %7048 = vmatmul.mubr.msk.bf16.vlgmr.msra.gmra.mrb[52].mxu1 %vm3554_vm10, %v4276_v2  ;;  %v7752_v2 = vld [vmem:[#allocation25 + $0x84] ss:$8 sps:$4 sm:$0xff]  }
 0xd43   : > { %4374 = vmatpush1.bf16.msra.mxu1 %v7701_v4  ;;  %4405 = vmatprep.mubr.bf16.mxu1 %v8583_v16  ;;  %v7750_v4 = vld [vmem:[#allocation25 + $0x80] ss:$8 sps:$4 sm:$0xff]  }
 0xd44   : > { %4375 = vmatprep.subr.bf16.mxu1 %v7706_v5  ;;  %v7755_v5 = vld [vmem:[#allocation25 + $0x94] ss:$8 sps:$4 sm:$0xff]  }
 0xd47   : > { %4376 = vmatpush1.bf16.msra.mxu1 %v7704_v6  ;;  %v7753_v6 = vld [vmem:[#allocation25 + $0x90] ss:$8 sps:$4 sm:$0xff]  }
 0xd48   : > { %4377 = vmatprep.subr.bf16.mxu1 %v7709_v8  ;;  %v7758_v8 = vld [vmem:[#allocation25 + $0xa4] ss:$8 sps:$4 sm:$0xff]  }
 0xd4b   : > { %4378 = vmatpush1.bf16.msra.mxu1 %v7707_v10  ;;  %v7756_v10 = vld [vmem:[#allocation25 + $0xa0] ss:$8 sps:$4 sm:$0xff]  }
 0xd4c   : > { %4379 = vmatprep.subr.bf16.mxu1 %v7712_v11  ;;  %v7761_v11 = vld [vmem:[#allocation25 + $0xb4] ss:$8 sps:$4 sm:$0xff]  }
 0xd4f   : > { %4380 = vmatpush1.bf16.msra.mxu1 %v7710_v12  ;;  %v7759_v12 = vld [vmem:[#allocation25 + $0xb0] ss:$8 sps:$4 sm:$0xff]  }
 0xd50   : > { %7051 = vmatprep.subr.bf16.mxu1 %v8581_v0 }
 0xe15   : > { %v4314_v13 = vpop.f32.mrb[52].mxu1 }
 0xe16   : > { %v4320_v15 = vpack.c.bf16 %v4314_v13, %v4314_v13  ;;  %v7049_v17 = vpop.f32.mrb[53].mxu1  ;;  %v7764_v13 = vld [vmem:[#allocation25 + $0xc4] ss:$8 sps:$4 sm:$0xff]  }
 0xe17   : > { %v4317_v19 = vpop.f32.mrb[54].mxu1  ;;  %v7767_v17 = vld [vmem:[#allocation25 + $0xd4] ss:$8 sps:$4 sm:$0xff]  }
 0xe18   : > { %v7050_v20 = vpop.f32.mrb[55].mxu1  ;;  %6793 = vmatmul.mubr.msk.bf16.vlgmr.msra.gmra.mrb[36].mxu1 %vm3653_vm11, %v4320_v15  ;;  %v7762_v15 = vld [vmem:[#allocation25 + $0xc0] ss:$8 sps:$4 sm:$0xff]   ;;  %v7769_v19 = vld [vmem:[#allocation23 + $0x10] sm:$0x7f]  }
 0xe19   : > { %7052 = vmatpush3.bf16.msra.mxu1 %v9521_v56  ;;  %7053 = vmatprep.mubr.msk.bf16.mxu1 %vm8582_vm0, %v8581_v0  ;;  %v7722_v56 = vld [vmem:[#allocation20 + $0x1b0] ss:$8 sps:$4 sm:$0xff]  }
 0xe1a   : > { %4514 = vmatprep.subr.bf16.mxu1 %v7715_v18  ;;  %v7765_v18 = vld [vmem:[#allocation25 + $0xd0] ss:$8 sps:$4 sm:$0xff]  }
 0xe20   : > { %7054 = vmatmul.mubr.msk.bf16.vlgmr.msra.gmra.mrb[56].mxu1 %vm3554_vm10, %v4417_v21 }
 0xe21   : > { %4515 = vmatpush1.bf16.msra.mxu1 %v7713_v22  ;;  %4546 = vmatprep.mubr.bf16.mxu1 %v8583_v16 }
 0xe22   : > { %4516 = vmatprep.subr.bf16.mxu1 %v7718_v23 }
 0xe25   : > { %4517 = vmatpush1.bf16.msra.mxu1 %v7716_v24 }
 0xe26   : > { %4518 = vmatprep.subr.bf16.mxu1 %v7721_v25 }
 0xe29   : > { %4519 = vmatpush1.bf16.msra.mxu1 %v7719_v26  ;;  %v7772_v26 = vld [vmem:[#allocation25 + $0xe4] ss:$8 sps:$4 sm:$0xff]  }
 0xe2a   : > { %4520 = vmatprep.subr.bf16.mxu1 %v7724_v29  ;;  %v7768_v29 = vld [vmem:[#allocation23 + $0x8] sm:$0x7f]  }
 0xe2d   : > { %4521 = vmatpush1.bf16.msra.mxu1 %v7722_v56  ;;  %v7770_v56 = vld [vmem:[#allocation25 + $0xe0] ss:$8 sps:$4 sm:$0xff]  }
 0xef3   : > { %v4455_v0 = vpop.f32.mrb[56].mxu1 }
 0xef4   : > { %v4461_v30 = vpack.c.bf16 %v4455_v0, %v4455_v0  ;;  %v7055_v31 = vpop.f32.mrb[57].mxu1  ;;  %v7775_v0 = vld [vmem:[#allocation25 + $0xf4] ss:$8 sps:$4 sm:$0xff]  }
 0xef5   : > { %v4458_v32 = vpop.f32.mrb[58].mxu1  ;;  %v7778_v31 = vld [vmem:[#allocation25 + $0x104] ss:$8 sps:$4 sm:$0xff]  }
 0xef6   : > { %v7056_v33 = vpop.f32.mrb[59].mxu1  ;;  %6803 = vmatmul.mubr.msk.bf16.vlgmr.msra.gmra.mrb[36].mxu1 %vm3653_vm11, %v4461_v30  ;;  %v7773_v30 = vld [vmem:[#allocation25 + $0xf0] ss:$8 sps:$4 sm:$0xff]   ;;  %v7776_v32 = vld [vmem:[#allocation25 + $0x100] ss:$8 sps:$4 sm:$0xff]  }
 0xef7   : > { %4610 = vmatprep.mubr.bf16.mxu1 %v8583_v16  ;;  %v7781_v33 = vld [vmem:[#allocation25 + $0x114] ss:$8 sps:$4 sm:$0xff]  }
 0xfc9   : > { %v4548_v39 = vpop.f32.mrb[36].mxu1 }
 0xfca   : > { %v7066_v40 = vadd.f32 %v4548_v39, %v3709_v37  ;;  %v4550_v41 = vpop.f32.mrb[37].mxu1  ;;  %v7787_v37 = vld [vmem:[#allocation25 + $0x134] ss:$8 sps:$4 sm:$0xff]   ;;  %v7790_v39 = vld [vmem:[#allocation25 + $0x144] ss:$8 sps:$4 sm:$0xff]  }
 0xfcb   : > { %v7068_v42 = vadd.f32 %v4550_v41, %v3710_v38  ;;  %v4552_v43 = vpop.f32.mrb[38].mxu1  ;;  %v7785_v38 = vld [vmem:[#allocation25 + $0x130] ss:$8 sps:$4 sm:$0xff]   ;;  %v7793_v41 = vld [vmem:[#allocation25 + $0x154] ss:$8 sps:$4 sm:$0xff]  }
 0xfcc   : > { %v4557_v44 = vmax.f32 %v7066_v40, 0.0  ;;  %v4553_v45 = vpop.f32.mrb[39].mxu1  ;;  %v7788_v40 = vld [vmem:[#allocation25 + $0x140] ss:$8 sps:$4 sm:$0xff]   ;;  %v7796_v43 = vld [vmem:[#allocation25 + $0x164] ss:$8 sps:$4 sm:$0xff]  }
 0xfcd   : > { %v4558_v46 = vmax.f32 %v7068_v42, 0.0  ;;  %v7791_v42 = vld [vmem:[#allocation25 + $0x150] ss:$8 sps:$4 sm:$0xff]   ;;  %v7799_v45 = vld [vmem:[#allocation25 + $0x174] ss:$8 sps:$4 sm:$0xff]  }
 0xfce   : > { %v4559_v47 = vpack.c.bf16 %v4557_v44, %v4557_v44  ;;  %v7794_v44 = vld [vmem:[#allocation25 + $0x160] ss:$8 sps:$4 sm:$0xff]  }
 0xfcf   : > { %v4560_v48 = vpack.c.bf16 %v4558_v46, %v4558_v46  ;;  %v7797_v46 = vld [vmem:[#allocation25 + $0x170] ss:$8 sps:$4 sm:$0xff]  }
 0xfd0   : > { %v9582_v51 = vand.u32 %v4559_v47, %v9359_v14  ;;  %v7802_v47 = vld [vmem:[#allocation25 + $0x184] ss:$8 sps:$4 sm:$0xff]  }
 0xfd1   : > { %v9579_v49 = vand.u32 %v4560_v48, %v9359_v14  ;;  %v7732_v14 = vld [vmem:[#allocation25 + $0x20] ss:$8 sps:$4 sm:$0xff]  }
 0xfd2   : > { %v7800_v48 = vld [vmem:[#allocation25 + $0x180] ss:$8 sps:$4 sm:$0xff]  }
 0xfd3   : > { %4578 = vmatprep.subr.bf16.mxu1 %v9579_v49  ;;  %5138 = vmatprep.subr.bf16.mxu0 %v9579_v49 }
 0xfd4   : > { %4579 = vmatpush1.bf16.msra.mxu1 %v9582_v51  ;;  %5139 = vmatpush1.bf16.msra.mxu0 %v9582_v51 }
 0xfd5   : > { %4794 = vmatprep.subr.bf16.mxu1 %v7728_v50  ;;  %v7803_v50 = vld [vmem:[#allocation25 + $0x190] ss:$8 sps:$4 sm:$0xff]  }
 0xfd7   : > { %6805 = vmatmul.mubr.msk.bf16.vlgmr.msra.gmra.mrb[60].mxu1 %vm2108_vm8, %v7725_v27  ;;  %6867 = vmatmul.mubr.msk.bf16.vlgmr.msra.gmra.mrb[44].mxu0 %vm2108_vm8, %v7769_v19  ;;  %v7806_v27 = vld [vmem:[#allocation25 + $0x1a0] ss:$8 sps:$4 sm:$0xff]  }
 0xfd8   : > { %4795 = vmatpush1.bf16.msra.mxu1 %v7726_v28  ;;  %5467 = vmatprep.mubr.bf16.mxu0 %v8583_v16  ;;  %v7811_v28 = vld [vmem:[#allocation25 + $0x1b4] ss:$8 sps:$4 sm:$0xff]   ;;  %v7830_v19 = vld [vmem:[#allocation25 + $0x220] ss:$8 sps:$4 sm:$0xff]  }
 0xfd9   : > { %4796 = vmatprep.subr.bf16.mxu1 %v7731_v52  ;;  %v7809_v52 = vld [vmem:[#allocation25 + $0x1b0] ss:$8 sps:$4 sm:$0xff]  }
 0xfdc   : > { %4797 = vmatpush1.bf16.msra.mxu1 %v7729_v53  ;;  %v7814_v53 = vld [vmem:[#allocation25 + $0x1c4] ss:$8 sps:$4 sm:$0xff]  }
 0xfdd   : > { %4798 = vmatprep.subr.bf16.mxu1 %v7734_v54 }
 0xfe0   : > { %4799 = vmatpush1.bf16.msra.mxu1 %v7732_v14 }
 0xfe1   : > { %4800 = vmatprep.subr.bf16.mxu1 %v7737_v55 }
 0xfe4   : > { %4801 = vmatpush1.bf16.msra.mxu1 %v7735_v57 }
 0xfe5   : > { %4802 = vmatprep.subr.bf16.mxu1 %v7740_v58 }
 0xfe8   : > { %4803 = vmatpush1.bf16.msra.mxu1 %v7738_v3 }
 0xfe9   : > { %4804 = vmatprep.subr.bf16.mxu1 %v7743_v59 }
 0xfec   : > { %4805 = vmatpush1.bf16.msra.mxu1 %v7741_v60 }
 0xfed   : > { %4806 = vmatprep.subr.bf16.mxu1 %v7746_v61 }
 0xff0   : > { %4807 = vmatpush1.bf16.msra.mxu1 %v7744_v62 }
 0xff1   : > { %4808 = vmatprep.subr.bf16.mxu1 %v7749_v63 }
 0xff4   : > { %4809 = vmatpush1.bf16.msra.mxu1 %v7747_v1 }
 0xff5   : > { %4810 = vmatprep.subr.bf16.mxu1 %v7752_v2  ;;  %v7812_v2 = vld [vmem:[#allocation25 + $0x1c0] ss:$8 sps:$4 sm:$0xff]  }
 0xff8   : > { %4811 = vmatpush1.bf16.msra.mxu1 %v7750_v4  ;;  %v7817_v4 = vld [vmem:[#allocation25 + $0x1d4] ss:$8 sps:$4 sm:$0xff]  }
 0xff9   : > { %4812 = vmatprep.subr.bf16.mxu1 %v7755_v5  ;;  %v7815_v5 = vld [vmem:[#allocation25 + $0x1d0] ss:$8 sps:$4 sm:$0xff]  }
 0xffc   : > { %4813 = vmatpush1.bf16.msra.mxu1 %v7753_v6  ;;  %v7820_v6 = vld [vmem:[#allocation25 + $0x1e4] ss:$8 sps:$4 sm:$0xff]  }
 0xffd   : > { %4814 = vmatprep.subr.bf16.mxu1 %v7758_v8  ;;  %v7818_v8 = vld [vmem:[#allocation25 + $0x1e0] ss:$8 sps:$4 sm:$0xff]  }
0x1000   : > { %4815 = vmatpush1.bf16.msra.mxu1 %v7756_v10  ;;  %v7823_v10 = vld [vmem:[#allocation25 + $0x1f4] ss:$8 sps:$4 sm:$0xff]  }
0x1001   : > { %4816 = vmatprep.subr.bf16.mxu1 %v7761_v11  ;;  %v7821_v11 = vld [vmem:[#allocation25 + $0x1f0] ss:$8 sps:$4 sm:$0xff]  }
0x1004   : > { %4817 = vmatpush1.bf16.msra.mxu1 %v7759_v12  ;;  %v7826_v12 = vld [vmem:[#allocation25 + $0x204] ss:$8 sps:$4 sm:$0xff]  }
0x1005   : > { %4818 = vmatprep.subr.bf16.mxu1 %v7764_v13  ;;  %v7824_v13 = vld [vmem:[#allocation25 + $0x200] ss:$8 sps:$4 sm:$0xff]  }
0x1008   : > { %4819 = vmatpush1.bf16.msra.mxu1 %v7762_v15  ;;  %v7829_v15 = vld [vmem:[#allocation25 + $0x214] ss:$8 sps:$4 sm:$0xff]  }
0x1009   : > { %4820 = vmatprep.subr.bf16.mxu1 %v7767_v17  ;;  %v7827_v17 = vld [vmem:[#allocation25 + $0x210] ss:$8 sps:$4 sm:$0xff]  }
0x100c   : > { %4821 = vmatpush1.bf16.msra.mxu1 %v7765_v18  ;;  %v7832_v18 = vld [vmem:[#allocation25 + $0x224] ss:$8 sps:$4 sm:$0xff]  }
0x100d   : > { %4863 = vmatprep.subr.bf16.mxu1 %v9579_v49  ;;  %v7805_v49 = vld [vmem:[#allocation25 + $0x194] ss:$8 sps:$4 sm:$0xff]  }
0x10aa   : > { %v4612_v20 = vpop.f32.mrb[60].mxu1  ;;  %v9596_v54 = vpop.f32.mrb[44].mxu0 }
0x10ab   : > { %v4614_v21 = vpop.f32.mrb[61].mxu1  ;;  %v5174_v14 = vpop.f32.mrb[45].mxu0 }
0x10ac   : > { %v4616_v22 = vpop.f32.mrb[62].mxu1  ;;  %v9598_v55 = vpop.f32.mrb[46].mxu0 }
0x10ad   : > { %v4621_v23 = vpack.c.bf16 %v4616_v22, %v4612_v20  ;;  %v4618_v24 = vpop.f32.mrb[63].mxu1  ;;  %v5181_v57 = vpack.c.bf16 %v9598_v55, %v9596_v54  ;;  %v5178_v58 = vpop.f32.mrb[47].mxu0  ;;  %v7835_v20 = vld [vmem:[#allocation25 + $0x234] ss:$8 sps:$4 sm:$0xff]   ;;  %v7838_v22 = vld [vmem:[#allocation25 + $0x244] ss:$8 sps:$4 sm:$0xff]  }
0x10ae   : > { %v4622_v25 = vpack.c.bf16 %v4618_v24, %v4614_v21  ;;  %v5182_v3 = vpack.c.bf16 %v5178_v58, %v5174_v14  ;;  %v7833_v21 = vld [vmem:[#allocation25 + $0x230] ss:$8 sps:$4 sm:$0xff]   ;;  %v7841_v24 = vld [vmem:[#allocation25 + $0x254] ss:$8 sps:$4 sm:$0xff]   ;;  %v7862_v55 = vld [vmem:[#allocation29 + $0x30] sm:$0xff]  }
0x10af   : > { %v7860_v54 = vld [vmem:[#allocation29 + $0x20] sm:$0xff]   ;;  %v7861_v14 = vld [vmem:[#allocation29 + $0x28] sm:$0xff]  }
0x10b0   : > { %6834 = vmatprep.mubr.msk.bf16.mxu1 %vm1518_vm5, %v4622_v25  ;;  %v7839_v25 = vld [vmem:[#allocation25 + $0x250] ss:$8 sps:$4 sm:$0xff]  }
0x10b1   : > { %4827 = vmatmul.mubr.bf16.vlgmr.msra.gmra.mrb[64].mxu1 %v4621_v23  ;;  %v7836_v23 = vld [vmem:[#allocation25 + $0x240] ss:$8 sps:$4 sm:$0xff]   ;;  %v7864_v58 = vld [vmem:[#allocation29 + $0x40] sm:$0xff]  }
0x10b2   : > { %4864 = vmatpush1.bf16.msra.mxu1 %v9582_v51  ;;  %4895 = vmatprep.mubr.bf16.mxu1 %v8583_v16  ;;  %v7808_v51 = vld [vmem:[#allocation25 + $0x1a4] ss:$8 sps:$4 sm:$0xff]  }
0x10b3   : > { %5080 = vmatprep.subr.bf16.mxu1 %v7772_v26  ;;  %v7844_v26 = vld [vmem:[#allocation25 + $0x264] ss:$8 sps:$4 sm:$0xff]  }
0x10b9   : > { %6836 = vmatmul.mubr.msk.bf16.vlgmr.msra.gmra.mrb[68].mxu1 %vm2108_vm8, %v7768_v29  ;;  %v7842_v29 = vld [vmem:[#allocation25 + $0x260] ss:$8 sps:$4 sm:$0xff]  }
0x10ba   : > { %5081 = vmatpush1.bf16.msra.mxu1 %v7770_v56  ;;  %v7847_v56 = vld [vmem:[#allocation25 + $0x274] ss:$8 sps:$4 sm:$0xff]  }
0x10bb   : > { %5082 = vmatprep.subr.bf16.mxu1 %v7775_v0  ;;  %v7845_v0 = vld [vmem:[#allocation25 + $0x270] ss:$8 sps:$4 sm:$0xff]  }
0x10be   : > { %5083 = vmatpush1.bf16.msra.mxu1 %v7773_v30  ;;  %v7850_v30 = vld [vmem:[#allocation25 + $0x284] ss:$8 sps:$4 sm:$0xff]  }
0x10bf   : > { %5084 = vmatprep.subr.bf16.mxu1 %v7778_v31  ;;  %v7848_v31 = vld [vmem:[#allocation25 + $0x280] ss:$8 sps:$4 sm:$0xff]  }
0x10c2   : > { %5085 = vmatpush1.bf16.msra.mxu1 %v7776_v32  ;;  %v7853_v32 = vld [vmem:[#allocation25 + $0x294] ss:$8 sps:$4 sm:$0xff]  }
0x10c3   : > { %5086 = vmatprep.subr.bf16.mxu1 %v7781_v33  ;;  %v7851_v33 = vld [vmem:[#allocation25 + $0x290] ss:$8 sps:$4 sm:$0xff]  }
0x10c6   : > { %5087 = vmatpush1.bf16.msra.mxu1 %v7779_v34  ;;  %v4561_v34 = vld [vmem:[#allocation26] sm:$0x3] }
0x10c7   : > { %5088 = vmatprep.subr.bf16.mxu1 %v7784_v35  ;;  %v4841_v35 = vrot.slane %v4561_v34, %v9316_v7  ;;  %v7854_v7 = vld [vmem:[#allocation28] sm:$0xff]  }
0x10ca   : > { %5089 = vmatpush1.bf16.msra.mxu1 %v7782_v36  ;;  %v4845_v36 = vrot.slane %v4561_v34, %v9318_v9  ;;  %v7855_v9 = vld [vmem:[#allocation29] sm:$0xff]   ;;  %v7887_v34 = vld [vmem:[#allocation29 + $0xd8] sm:$0xff]  }
0x10cb   : > { %5090 = vmatprep.subr.bf16.mxu1 %v7787_v37 }
0x10ce   : > { %5091 = vmatpush1.bf16.msra.mxu1 %v7785_v38 }
0x10cf   : > { %5092 = vmatprep.subr.bf16.mxu1 %v7790_v39 }
0x10d2   : > { %5093 = vmatpush1.bf16.msra.mxu1 %v7788_v40 }
0x10d3   : > { %5094 = vmatprep.subr.bf16.mxu1 %v7793_v41 }
0x10d6   : > { %5095 = vmatpush1.bf16.msra.mxu1 %v7791_v42 }
0x10d7   : > { %5096 = vmatprep.subr.bf16.mxu1 %v7796_v43 }
0x10da   : > { %5097 = vmatpush1.bf16.msra.mxu1 %v7794_v44 }
0x10db   : > { %5098 = vmatprep.subr.bf16.mxu1 %v7799_v45 }
0x10de   : > { %5099 = vmatpush1.bf16.msra.mxu1 %v7797_v46 }
0x10df   : > { %5100 = vmatprep.subr.bf16.mxu1 %v7802_v47 }
0x10e2   : > { %5101 = vmatpush1.bf16.msra.mxu1 %v7800_v48 }
0x10e3   : > { %5102 = vmatprep.subr.bf16.mxu1 %v7805_v49 }
0x10e6   : > { %5103 = vmatpush1.bf16.msra.mxu1 %v7803_v50 }
0x10e7   : > { %5104 = vmatprep.subr.bf16.mxu1 %v7808_v51 }
0x10ea   : > { %5105 = vmatpush1.bf16.msra.mxu1 %v7806_v27  ;;  %v7856_v27 = vld [vmem:[#allocation29 + $0x8] sm:$0xff]  }
0x10eb   : > { %5106 = vmatprep.subr.bf16.mxu1 %v7811_v28  ;;  %v7857_v28 = vld [vmem:[#allocation28 + $0x8] sm:$0x3f]  }
0x10ee   : > { %5107 = vmatpush1.bf16.msra.mxu1 %v7809_v52  ;;  %v7858_v52 = vld [vmem:[#allocation29 + $0x10] sm:$0xff]  }
0x10ef   : > { %5355 = vmatprep.subr.bf16.mxu1 %v7814_v53  ;;  %v7859_v53 = vld [vmem:[#allocation29 + $0x18] sm:$0xff]  }
0x118c   : > { %v4897_v59 = vpop.f32.mrb[68].mxu1 }
0x118d   : > { %v4899_v60 = vpop.f32.mrb[69].mxu1 }
0x118e   : > { %v4901_v61 = vpop.f32.mrb[70].mxu1 }
0x118f   : > { %v4906_v62 = vpack.c.bf16 %v4901_v61, %v4897_v59  ;;  %v4903_v63 = vpop.f32.mrb[71].mxu1  ;;  %v7866_v59 = vld [vmem:[#allocation29 + $0x50] sm:$0xff]   ;;  %v7868_v61 = vld [vmem:[#allocation29 + $0x60] sm:$0xff]  }
0x1190   : > { %v4907_v1 = vpack.c.bf16 %v4903_v63, %v4899_v60  ;;  %v7867_v60 = vld [vmem:[#allocation29 + $0x58] sm:$0xff]   ;;  %v7872_v63 = vld [vmem:[#allocation28 + $0x20] sm:$0xff]  }
0x1192   : > { %6865 = vmatprep.mubr.msk.bf16.mxu1 %vm1518_vm5, %v4907_v1  ;;  %v7873_v1 = vld [vmem:[#allocation28 + $0x28] sm:$0x3f]  }
0x1193   : > { %5113 = vmatmul.mubr.bf16.vlgmr.msra.gmra.mrb[64].mxu1 %v4906_v62  ;;  %v7869_v62 = vld [vmem:[#allocation29 + $0x68] sm:$0xff]  }
0x1194   : > { %5356 = vmatpush1.bf16.msra.mxu1 %v7812_v2  ;;  %6896 = vmatprep.mubr.msk.bf16.mxu1 %vm1518_vm5, %v5182_v3  ;;  %v7865_v3 = vld [vmem:[#allocation29 + $0x48] sm:$0xff]  }
0x1195   : > { %5357 = vmatprep.subr.bf16.mxu1 %v7817_v4 }
0x1198   : > { %5358 = vmatpush1.bf16.msra.mxu1 %v7815_v5 }
0x1199   : > { %5359 = vmatprep.subr.bf16.mxu1 %v7820_v6 }
0x119c   : > { %5360 = vmatpush1.bf16.msra.mxu1 %v7818_v8 }
0x119d   : > { %5361 = vmatprep.subr.bf16.mxu1 %v7823_v10 }
0x11a0   : > { %5362 = vmatpush1.bf16.msra.mxu1 %v7821_v11 }
0x11a1   : > { %5363 = vmatprep.subr.bf16.mxu1 %v7826_v12 }
0x11a4   : > { %5364 = vmatpush1.bf16.msra.mxu1 %v7824_v13 }
0x11a5   : > { %5365 = vmatprep.subr.bf16.mxu1 %v7829_v15 }
0x11a8   : > { %5366 = vmatpush1.bf16.msra.mxu1 %v7827_v17 }
0x11a9   : > { %5367 = vmatprep.subr.bf16.mxu1 %v7832_v18 }
0x11ac   : > { %5368 = vmatpush1.bf16.msra.mxu1 %v7830_v19  ;;  %v7870_v19 = vld [vmem:[#allocation28 + $0x10] sm:$0xff]  }
0x11ad   : > { %5369 = vmatprep.subr.bf16.mxu1 %v7835_v20  ;;  %v7874_v20 = vld [vmem:[#allocation29 + $0x70] sm:$0xff]  }
0x11b0   : > { %5370 = vmatpush1.bf16.msra.mxu1 %v7833_v21  ;;  %v7875_v21 = vld [vmem:[#allocation29 + $0x78] sm:$0xff]  }
0x11b1   : > { %5371 = vmatprep.subr.bf16.mxu1 %v7838_v22  ;;  %v7871_v22 = vld [vmem:[#allocation28 + $0x18] sm:$0x3f]  }
0x11b4   : > { %5372 = vmatpush1.bf16.msra.mxu1 %v7836_v23  ;;  %v7876_v23 = vld [vmem:[#allocation29 + $0x80] sm:$0xff]  }
0x11b5   : > { %5373 = vmatprep.subr.bf16.mxu1 %v7841_v24  ;;  %v7877_v24 = vld [vmem:[#allocation29 + $0x88] sm:$0xff]  }
0x11b8   : > { %5374 = vmatpush1.bf16.msra.mxu1 %v7839_v25  ;;  %v7878_v25 = vld [vmem:[#allocation29 + $0x90] sm:$0xff]  }
0x11b9   : > { %5375 = vmatprep.subr.bf16.mxu1 %v7844_v26  ;;  %v7879_v26 = vld [vmem:[#allocation29 + $0x98] sm:$0xff]  }
0x11bc   : > { %5376 = vmatpush1.bf16.msra.mxu1 %v7842_v29  ;;  %v7880_v29 = vld [vmem:[#allocation29 + $0xa0] sm:$0xff]  }
0x11bd   : > { %5377 = vmatprep.subr.bf16.mxu1 %v7847_v56  ;;  %v7881_v56 = vld [vmem:[#allocation29 + $0xa8] sm:$0xff]  }
0x11c0   : > { %5378 = vmatpush1.bf16.msra.mxu1 %v7845_v0  ;;  %v7882_v0 = vld [vmem:[#allocation29 + $0xb0] sm:$0xff]  }
0x11c1   : > { %5379 = vmatprep.subr.bf16.mxu1 %v7850_v30  ;;  %v7883_v30 = vld [vmem:[#allocation29 + $0xb8] sm:$0xff]  }
0x11c4   : > { %5380 = vmatpush1.bf16.msra.mxu1 %v7848_v31  ;;  %v7884_v31 = vld [vmem:[#allocation29 + $0xc0] sm:$0xff]  }
0x11c5   : > { %5381 = vmatprep.subr.bf16.mxu1 %v7853_v32  ;;  %v7885_v32 = vld [vmem:[#allocation29 + $0xc8] sm:$0xff]  }
0x11c8   : > { %5382 = vmatpush1.bf16.msra.mxu1 %v7851_v33  ;;  %v7886_v33 = vld [vmem:[#allocation29 + $0xd0] sm:$0xff]  }
0x11cb   : > { %5388 = vmatmul.mubr.bf16.vlgmr.msra.gmra.mrb[64].mxu1 %v5181_v57  ;;  %v7863_v57 = vld [vmem:[#allocation29 + $0x38] sm:$0xff]  }
0x11cc   : > { %5972 = vmatprep.mubr.bf16.mxu1 %v8583_v16 }
0x129e   : > { %v5389_v37 = vpop.f32.mrb[64].mxu1 }
0x129f   : > { %v7069_v38 = vadd.f32 %v5389_v37, %v4841_v35  ;;  %v5391_v39 = vpop.f32.mrb[65].mxu1 }
0x12a0   : > { %v7070_v40 = vadd.f32 %v5391_v39, %v4845_v36  ;;  %v5393_v41 = vpop.f32.mrb[66].mxu1 }
0x12a1   : > { %v7071_v42 = vadd.f32 %v5393_v41, %v4841_v35  ;;  %v5395_v43 = vpop.f32.mrb[67].mxu1  ;;  %v5402_v45 = vmax.f32 %v7069_v38, 0.0 }
0x12a2   : > { %v7072_v44 = vadd.f32 %v5395_v43, %v4845_v36  ;;  %v5403_v47 = vmax.f32 %v7070_v40, 0.0 }
0x12a3   : > { %v5404_v46 = vmax.f32 %v7071_v42, 0.0 }
0x12a4   : > { %v5405_v48 = vmax.f32 %v7072_v44, 0.0 }
0x12a5   : > { %v5406_v49 = vpack.c.bf16 %v5404_v46, %v5402_v45 }
0x12a6   : > { %v5407_v50 = vpack.c.bf16 %v5405_v48, %v5403_v47 }
0x12a7   : > { %v9611_v51 = vsel %vm1300_vm3, %v5406_v49, 0 }
0x12a8   : > { %6899 = vmatprep.subr.msk.bf16.mxu0 %vm1300_vm3, %v5407_v50  ;;  %6942 = vmatprep.subr.msk.bf16.mxu1 %vm1300_vm3, %v5407_v50 }
0x12a9   : > { %5436 = vmatpush1.bf16.msra.mxu0 %v9611_v51  ;;  %5941 = vmatpush1.bf16.msra.mxu1 %v9611_v51 }
0x12aa   : > { %5610 = vmatprep.subr.bf16.mxu0 %v8583_v16 }
0x12ac   : > { %6900 = vmatmul.mubr.msk.bf16.vlgmr.msra.gmra.mrb[48].mxu0 %vm1296_vm4, %v7854_v7  ;;  %6943 = vmatmul.mubr.msk.bf16.vlgmr.msra.gmra.mrb[72].mxu1 %vm1296_vm4, %v7872_v63  ;;  %v7897_v63 = vld [vmem:[#allocation29 + $0x128] sm:$0xff]  }
0x12ad   : > { %5611 = vmatpush1.bf16.msra.mxu0 %v7855_v9  ;;  %5477 = vmatprep.mubr.bf16.mxu0 %v8583_v16  ;;  %v7888_v9 = vld [vmem:[#allocation29 + $0xe0] sm:$0xff]  }
0x12ae   : > { %5612 = vmatprep.subr.bf16.mxu0 %v8583_v16  ;;  %5982 = vmatprep.mubr.bf16.mxu1 %v8583_v16 }
0x12b1   : > { %5613 = vmatpush1.bf16.msra.mxu0 %v7856_v27  ;;  %v7889_v27 = vld [vmem:[#allocation29 + $0xe8] sm:$0xff]  }
0x12b2   : > { %5614 = vmatprep.subr.bf16.mxu0 %v8583_v16 }
0x12b4   : > { %6901 = vmatmul.mubr.msk.bf16.gmra.mrb[52].mxu0 %vm1296_vm4, %v7857_v28  ;;  %6944 = vmatmul.mubr.msk.bf16.gmra.mrb[76].mxu1 %vm1296_vm4, %v7873_v1  ;;  %v7898_v1 = vld [vmem:[#allocation29 + $0x130] sm:$0xff]  }
0x12b5   : > { %5615 = vmatpush1.bf16.msra.mxu0 %v7858_v52 }
0x12b6   : > { %5616 = vmatprep.subr.bf16.mxu0 %v8583_v16 }
0x12b9   : > { %5617 = vmatpush1.bf16.msra.mxu0 %v7859_v53 }
0x12ba   : > { %5618 = vmatprep.subr.bf16.mxu0 %v8583_v16 }
0x12bd   : > { %5619 = vmatpush1.bf16.msra.mxu0 %v7860_v54 }
0x12be   : > { %5620 = vmatprep.subr.bf16.mxu0 %v8583_v16 }
0x12c1   : > { %5621 = vmatpush1.bf16.msra.mxu0 %v7861_v14 }
0x12c2   : > { %5622 = vmatprep.subr.bf16.mxu0 %v8583_v16 }
0x12c5   : > { %5623 = vmatpush1.bf16.msra.mxu0 %v7862_v55  ;;  %v7890_v55 = vld [vmem:[#allocation29 + $0xf0] sm:$0xff]  }
0x12c6   : > { %5624 = vmatprep.subr.bf16.mxu0 %v8583_v16 }
0x12c9   : > { %5625 = vmatpush1.bf16.msra.mxu0 %v7863_v57 }
0x12ca   : > { %5626 = vmatprep.subr.bf16.mxu0 %v8583_v16 }
0x12cd   : > { %5627 = vmatpush1.bf16.msra.mxu0 %v7864_v58  ;;  %v7891_v58 = vld [vmem:[#allocation29 + $0xf8] sm:$0xff]  }
0x12ce   : > { %5628 = vmatprep.subr.bf16.mxu0 %v8583_v16 }
0x12d1   : > { %5629 = vmatpush1.bf16.msra.mxu0 %v7865_v3  ;;  %v7892_v3 = vld [vmem:[#allocation29 + $0x100] sm:$0xff]  }
0x12d2   : > { %5630 = vmatprep.subr.bf16.mxu0 %v8583_v16 }
0x12d5   : > { %5631 = vmatpush1.bf16.msra.mxu0 %v7866_v59  ;;  %v7893_v59 = vld [vmem:[#allocation29 + $0x108] sm:$0xff]  }
0x12d6   : > { %5632 = vmatprep.subr.bf16.mxu0 %v8583_v16 }
0x12d9   : > { %5633 = vmatpush1.bf16.msra.mxu0 %v7867_v60  ;;  %v7894_v60 = vld [vmem:[#allocation29 + $0x110] sm:$0xff]  }
0x12da   : > { %5634 = vmatprep.subr.bf16.mxu0 %v8583_v16 }
0x12dd   : > { %5635 = vmatpush1.bf16.msra.mxu0 %v7868_v61  ;;  %v7895_v61 = vld [vmem:[#allocation29 + $0x118] sm:$0xff]  }
0x12de   : > { %5636 = vmatprep.subr.bf16.mxu0 %v8583_v16 }
0x12e1   : > { %5637 = vmatpush1.bf16.msra.mxu0 %v7869_v62  ;;  %v7896_v62 = vld [vmem:[#allocation29 + $0x120] sm:$0xff]  }
0x12e2   : > { %6921 = vmatprep.subr.msk.bf16.mxu0 %vm1300_vm3, %v5407_v50 }
0x137f   : > { %v5469_v2 = vpop.f32.mrb[48].mxu0  ;;  %v9660_v35 = vpop.f32.mrb[72].mxu1 }
0x1380   : > { %v5471_v4 = vpop.f32.mrb[49].mxu0  ;;  %v5976_v36 = vpop.f32.mrb[73].mxu1 }
0x1381   : > { %v5473_v5 = vpop.f32.mrb[50].mxu0  ;;  %v9662_v37 = vpop.f32.mrb[74].mxu1 }
0x1382   : > { %v5488_v6 = vpack.c.bf16 %v5473_v5, %v5469_v2  ;;  %v5475_v8 = vpop.f32.mrb[51].mxu0  ;;  %v5993_v38 = vpack.c.bf16 %v9662_v37, %v9660_v35  ;;  %v5980_v39 = vpop.f32.mrb[75].mxu1  ;;  %v7899_v2 = vld [vmem:[#allocation29 + $0x138] sm:$0xff]   ;;  %v7901_v5 = vld [vmem:[#allocation29 + $0x148] sm:$0xff]  }
0x1383   : > { %v5489_v10 = vpack.c.bf16 %v5475_v8, %v5471_v4  ;;  %v5994_v40 = vpack.c.bf16 %v5980_v39, %v5976_v36  ;;  %v7900_v4 = vld [vmem:[#allocation29 + $0x140] sm:$0xff]  }
0x1385   : > { %6916 = vmatprep.mubr.msk.bf16.mxu0 %vm1518_vm5, %v5489_v10 }
0x1386   : > { %5643 = vmatmul.mubr.bf16.vlgmr.msra.gmra.mrb[56].mxu0 %v5488_v6  ;;  %v6918_v6 = vld [vmem:[#allocation31] ss:$0 sm:$0xff] }
0x1387   : > { %5691 = vmatpush1.bf16.msra.mxu0 %v9611_v51  ;;  %v5479_v11 = vpop.f32.mrb[52].mxu0  ;;  %v9666_v41 = vpop.f32.mrb[76].mxu1 }
0x1388   : > { %v5481_v12 = vpop.f32.mrb[53].mxu0  ;;  %5866 = vmatprep.subr.bf16.mxu0 %v8583_v16  ;;  %v9668_v42 = vpop.f32.mrb[77].mxu1 }
0x1389   : > { %v5483_v13 = vpop.f32.mrb[54].mxu0  ;;  %v9670_v43 = vpop.f32.mrb[78].mxu1 }
0x138a   : > { %v5490_v15 = vpack.c.bf16 %v5483_v13, %v5479_v11  ;;  %v5485_v17 = vpop.f32.mrb[55].mxu0  ;;  %v5995_v44 = vpack.c.bf16 %v9670_v43, %v9666_v41  ;;  %v5990_v45 = vpop.f32.mrb[79].mxu1 }
0x138b   : > { %v5491_v18 = vpack.c.bf16 %v5485_v17, %v5481_v12  ;;  %v5996_v46 = vpack.c.bf16 %v5990_v45, %v9668_v42 }
0x138d   : > { %6917 = vmatprep.mubr.msk.bf16.mxu0 %vm1518_vm5, %v5491_v18 }
0x138e   : > { %5651 = vmatmul.mubr.bf16.gmra.mrb[60].mxu0 %v5490_v15 }
0x138f   : > { %5722 = vmatprep.mubr.bf16.mxu0 %v8583_v16 }
0x1396   : > { %6922 = vmatmul.mubr.msk.bf16.vlgmr.msra.gmra.mrb[64].mxu0 %vm1296_vm4, %v7870_v19 }
0x1397   : > { %5732 = vmatprep.mubr.bf16.mxu0 %v8583_v16  ;;  %5867 = vmatpush1.bf16.msra.mxu0 %v7874_v20 }
0x1398   : > { %5868 = vmatprep.subr.bf16.mxu0 %v8583_v16 }
0x139b   : > { %5869 = vmatpush1.bf16.msra.mxu0 %v7875_v21 }
0x139c   : > { %5870 = vmatprep.subr.bf16.mxu0 %v8583_v16 }
0x139e   : > { %6923 = vmatmul.mubr.msk.bf16.gmra.mrb[68].mxu0 %vm1296_vm4, %v7871_v22 }
0x139f   : > { %5871 = vmatpush1.bf16.msra.mxu0 %v7876_v23 }
0x13a0   : > { %5872 = vmatprep.subr.bf16.mxu0 %v8583_v16 }
0x13a3   : > { %5873 = vmatpush1.bf16.msra.mxu0 %v7877_v24 }
0x13a4   : > { %5874 = vmatprep.subr.bf16.mxu0 %v8583_v16 }
0x13a7   : > { %5875 = vmatpush1.bf16.msra.mxu0 %v7878_v25 }
0x13a8   : > { %5876 = vmatprep.subr.bf16.mxu0 %v8583_v16 }
0x13ab   : > { %5877 = vmatpush1.bf16.msra.mxu0 %v7879_v26 }
0x13ac   : > { %5878 = vmatprep.subr.bf16.mxu0 %v8583_v16 }
0x13af   : > { %5879 = vmatpush1.bf16.msra.mxu0 %v7880_v29 }
0x13b0   : > { %5880 = vmatprep.subr.bf16.mxu0 %v8583_v16 }
0x13b3   : > { %5881 = vmatpush1.bf16.msra.mxu0 %v7881_v56 }
0x13b4   : > { %5882 = vmatprep.subr.bf16.mxu0 %v8583_v16 }
0x13b7   : > { %5883 = vmatpush1.bf16.msra.mxu0 %v7882_v0 }
0x13b8   : > { %5884 = vmatprep.subr.bf16.mxu0 %v8583_v16 }
0x13bb   : > { %5885 = vmatpush1.bf16.msra.mxu0 %v7883_v30 }
0x13bc   : > { %5886 = vmatprep.subr.bf16.mxu0 %v8583_v16 }
0x13bf   : > { %5887 = vmatpush1.bf16.msra.mxu0 %v7884_v31 }
0x13c0   : > { %5888 = vmatprep.subr.bf16.mxu0 %v8583_v16 }
0x13c3   : > { %5889 = vmatpush1.bf16.msra.mxu0 %v7885_v32 }
0x13c4   : > { %5890 = vmatprep.subr.bf16.mxu0 %v8583_v16 }
0x13c7   : > { %5891 = vmatpush1.bf16.msra.mxu0 %v7886_v33 }
0x13c8   : > { %5892 = vmatprep.subr.bf16.mxu0 %v8583_v16 }
0x13cb   : > { %5893 = vmatpush1.bf16.msra.mxu0 %v7887_v34 }
0x13cc   : > { %6116 = vmatprep.subr.bf16.mxu0 %v8583_v16 }
0x1469   : > { %v5724_v47 = vpop.f32.mrb[64].mxu0 }
0x146a   : > { %v5726_v48 = vpop.f32.mrb[65].mxu0 }
0x146b   : > { %v5728_v49 = vpop.f32.mrb[66].mxu0 }
0x146c   : > { %v5743_v50 = vpack.c.bf16 %v5728_v49, %v5724_v47  ;;  %v5730_v51 = vpop.f32.mrb[67].mxu0 }
0x146d   : > { %v5744_v7 = vpack.c.bf16 %v5730_v51, %v5726_v48 }
0x146f   : > { %6938 = vmatprep.mubr.msk.bf16.mxu0 %vm1518_vm5, %v5744_v7 }
0x1470   : > { %5899 = vmatmul.mubr.bf16.vlgmr.msra.gmra.mrb[56].mxu0 %v5743_v50 }
0x1471   : > { %6117 = vmatpush1.bf16.msra.mxu0 %v7888_v9  ;;  %v5734_v28 = vpop.f32.mrb[68].mxu0 }
0x1472   : > { %6118 = vmatprep.subr.bf16.mxu0 %v8583_v16  ;;  %v5736_v52 = vpop.f32.mrb[69].mxu0 }
0x1473   : > { %v5738_v53 = vpop.f32.mrb[70].mxu0 }
0x1474   : > { %v5745_v54 = vpack.c.bf16 %v5738_v53, %v5734_v28  ;;  %v5740_v14 = vpop.f32.mrb[71].mxu0 }
0x1475   : > { %6119 = vmatpush1.bf16.msra.mxu0 %v7889_v27  ;;  %v5746_v57 = vpack.c.bf16 %v5740_v14, %v5736_v52 }
0x1476   : > { %6120 = vmatprep.subr.bf16.mxu0 %v8583_v16 }
0x1477   : > { %6939 = vmatprep.mubr.msk.bf16.mxu0 %vm1518_vm5, %v5746_v57 }
0x1478   : > { %5907 = vmatmul.mubr.bf16.gmra.mrb[60].mxu0 %v5745_v54 }
0x1479   : > { %6121 = vmatpush1.bf16.msra.mxu0 %v7890_v55  ;;  %6959 = vmatprep.mubr.msk.bf16.mxu0 %vm1518_vm5, %v5994_v40 }
0x147a   : > { %6122 = vmatprep.subr.bf16.mxu0 %v8583_v16 }
0x147d   : > { %6123 = vmatpush1.bf16.msra.mxu0 %v7891_v58 }
0x147e   : > { %6124 = vmatprep.subr.bf16.mxu0 %v8583_v16 }
0x1481   : > { %6125 = vmatpush1.bf16.msra.mxu0 %v7892_v3 }
0x1482   : > { %6126 = vmatprep.subr.bf16.mxu0 %v8583_v16 }
0x1485   : > { %6127 = vmatpush1.bf16.msra.mxu0 %v7893_v59 }
0x1486   : > { %6128 = vmatprep.subr.bf16.mxu0 %v8583_v16 }
0x1489   : > { %6129 = vmatpush1.bf16.msra.mxu0 %v7894_v60 }
0x148a   : > { %6130 = vmatprep.subr.bf16.mxu0 %v8583_v16 }
0x148d   : > { %6131 = vmatpush1.bf16.msra.mxu0 %v7895_v61 }
0x148e   : > { %6132 = vmatprep.subr.bf16.mxu0 %v8583_v16 }
0x1491   : > { %6133 = vmatpush1.bf16.msra.mxu0 %v7896_v62 }
0x1492   : > { %6134 = vmatprep.subr.bf16.mxu0 %v8583_v16 }
0x1495   : > { %6135 = vmatpush1.bf16.msra.mxu0 %v7897_v63 }
0x1496   : > { %6136 = vmatprep.subr.bf16.mxu0 %v8583_v16 }
0x1499   : > { %6137 = vmatpush1.bf16.msra.mxu0 %v7898_v1 }
0x149a   : > { %6138 = vmatprep.subr.bf16.mxu0 %v8583_v16 }
0x149d   : > { %6139 = vmatpush1.bf16.msra.mxu0 %v7899_v2 }
0x149e   : > { %6140 = vmatprep.subr.bf16.mxu0 %v8583_v16 }
0x14a1   : > { %6141 = vmatpush1.bf16.msra.mxu0 %v7900_v4 }
0x14a2   : > { %6142 = vmatprep.subr.bf16.mxu0 %v8583_v16 }
0x14a5   : > { %6143 = vmatpush1.bf16.msra.mxu0 %v7901_v5 }
0x14a8   : > { %6149 = vmatmul.mubr.bf16.vlgmr.msra.gmra.mrb[56].mxu0 %v5993_v38 }
0x14a9   : > { %6960 = vmatprep.mubr.msk.bf16.mxu0 %vm1518_vm5, %v5996_v46 }
0x14b0   : > { %6157 = vmatmul.mubr.bf16.gmra.mrb[60].mxu0 %v5995_v44 }
0x157b   : > { %v6150_v8 = vpop.f32.mrb[56].mxu0 }
0x157c   : > { %v7073_v10 = vadd.f32 %v6918_v6, %v6150_v8  ;;  %v6152_v11 = vpop.f32.mrb[57].mxu0 }
0x157d   : > { %v6153_v12 = vpop.f32.mrb[58].mxu0 }
0x157e   : > { %v6169_v13 = vsub.f32 0.0, %v7073_v10  ;;  %v7074_v15 = vadd.f32 %v6918_v6, %v6153_v12  ;;  %v6155_v17 = vpop.f32.mrb[59].mxu0 }
0x1580   : > { %v6173_v16 = vmul.f32 1.442695, %v6169_v13  ;;  %v6170_v18 = vsub.f32 0.0, %v7074_v15 }
0x1582   : > { %7902 = vpow2.f32 %v6173_v16  ;;  %v6175_v19 = vmul.f32 1.442695, %v6170_v18 }
0x1583   : > { %v6158_v20 = vpop.f32.mrb[60].mxu0 }
0x1584   : > { %7904 = vpow2.f32 %v6175_v19  ;;  %v7075_v21 = vadd.f32 %v6918_v6, %v6158_v20  ;;  %v6160_v22 = vpop.f32.mrb[61].mxu0 }
0x1585   : > { %v6161_v23 = vpop.f32.mrb[62].mxu0 }
0x1586   : > { %v6171_v24 = vsub.f32 0.0, %v7075_v21  ;;  %v7076_v25 = vadd.f32 %v6918_v6, %v6161_v23  ;;  %v6163_v26 = vpop.f32.mrb[63].mxu0 }
0x1588   : > { %v6177_v29 = vmul.f32 1.442695, %v6171_v24  ;;  %v6172_v56 = vsub.f32 0.0, %v7076_v25 }
0x158a   : > { %7906 = vpow2.f32 %v6177_v29  ;;  %v6179_v0 = vmul.f32 1.442695, %v6172_v56 }
0x158c   : > { %v7903_v30 = vpop.eup %7902  ;;  %7908 = vpow2.f32 %v6179_v0 }
0x158d   : > { %v6181_v31 = vadd.f32 1.0, %v7903_v30 }
0x158e   : > { %v7905_v32 = vpop.eup %7904 }
0x158f   : > { %7910 = vrcp.f32 %v6181_v31  ;;  %v6182_v33 = vadd.f32 1.0, %v7905_v32 }
0x1591   : > { %7912 = vrcp.f32 %v6182_v33 }
0x1594   : > { %v7907_v34 = vpop.eup %7906 }
0x1595   : > { %v6183_v35 = vadd.f32 1.0, %v7907_v34 }
0x1596   : > { %v7909_v36 = vpop.eup %7908 }
0x1597   : > { %7914 = vrcp.f32 %v6183_v35  ;;  %v6184_v37 = vadd.f32 1.0, %v7909_v36 }
0x1599   : > { %v7911_v38 = vpop.eup %7910  ;;  %7916 = vrcp.f32 %v6184_v37 }
0x159a   : > { %v6189_v39 = vmax.f32 %v7911_v38, 0.0 }
0x159b   : > { %v7913_v40 = vpop.eup %7912 }
0x159c   : > { %v6193_v41 = vmin.f32 %v6189_v39, 1.0  ;;  %v6190_v42 = vmax.f32 %v7913_v40, 0.0 }
0x159e   : > { %6197 = vst.msk [vmem:[%s869_s22] sm:$0xff] %vm885_vm2, %v6193_v41  ;;  %v6194_v43 = vmin.f32 %v6190_v42, 1.0 }
0x15a0   : > { %6198 = vst.msk [vmem:[%s869_s22 + $0x8] sm:$0xff] %vm885_vm2, %v6194_v43 }
0x15a1   : > { %v7915_v44 = vpop.eup %7914 }
0x15a2   : > { %v6191_v45 = vmax.f32 %v7915_v44, 0.0 }
0x15a3   : > { %v7917_v46 = vpop.eup %7916 }
0x15a4   : > { %v6195_v47 = vmin.f32 %v6191_v45, 1.0  ;;  %v6192_v48 = vmax.f32 %v7917_v46, 0.0 }
0x15a6   : > { %6199 = vst.msk [vmem:[%s869_s22 + $0x10] sm:$0xff] %vm885_vm2, %v6195_v47  ;;  %v6196_v49 = vmin.f32 %v6192_v48, 1.0 }
0x15a8   : > { %6201 = vst.msk [vmem:[%s869_s22 + $0x18] sm:$0xf] %vm6200_vm12, %v6196_v49 }
0x15a9   : > { %8465 = shalt.err (!%p8462_p12)
}
0x15aa   : > { %s8466_s22 = scalar_lea.hbm %s9706_s0, 512  ;;  %s8470_s6 = scalar_lea.hbm %s9872_s25, 1024 }
0x15ab   : > { %p8467_p13 = scmp.ne.s32.totalorder %s9706_s0, %s8466_s22  ;;  %p8471_p9 = scmp.lt.u32.totalorder %s9706_s0, %s9872_s25 }
0x15ac   : > { %p8472_p4 = scmp.lt.u32.totalorder %s8470_s6, %s8466_s22  ;;  %p8474_p0 = scmp.lt.u32.totalorder %s8466_s22, %s9706_s0 }
0x15ad   : > { %p8468_p8 = pnand %p8467_p13, %p9873_p2 }
0x15ae   : > { %p8473_p3 = por %p8472_p4, %p8471_p9 }
0x15af   : > { %p8469_p7 = pneg %p8468_p8 }
0x15b0   : > { %p8475_p6 = por %p8474_p0, %p8473_p3 }
0x15b2   : > { %p8476_p5 = pnand %p8475_p6, %p8469_p7 }
0x15b4   : > { %8479 = shalt.err (!%p8476_p5)
}
0x15b5   : > { %s8586_s19 = smov 128   ;;  %s8587_s3 = smov 8  }
0x15b6   : > { %7231 = dma.vmem_to_hbm [thread:$0]  (%p9873_p2), %s9708_s28, 512, %s9706_s0, %s6203_s30, %s8586_s19, %s8586_s19, %s8587_s3  }
0x15b7 PF: > { %s9874_s20 = sld [smem:[#allocation44_spill]]  ;;  %s9875_s5 = sld [smem:[#allocation47_spill]] }
0x15b8   : > { %p9876_p10 = scmp.ne.s32.totalorder %s9846_s4, 0 }
0x15bd   : > { %s6231_s2 = sand.u32 1, %s9874_s20   ;;  %p9877_p1 = scmp.ge.s32.totalorder %s9875_s5, 2 }
0x15be   : > { %s6232_s22 = scalar_lea.sflag [#allocation4], %s6231_s2 }
0x15bf   : > { %p7293_p11 = pnand %p9877_p1, %p9876_p10 }
0x15c1   : > { %8537 = dma.done.wait (!%p7293_p11), %s6232_s22, 512  }
0x15c2   : > { %8539 = vsyncadd (!%p7293_p11), %s6232_s22, 4294966784  ;;  %s9878_s0 = sld [smem:[#allocation45_spill]]  ;;  %s9879_s30 = sld [smem:[#allocation46_spill]] }
0x15c3   : > { %p41_p12 = scmp.ge.s32.totalorder %s9159_s29, 4   ;;  %s9880_s20 = smov %s9170_s27 }
0x15c4   : > { %s9881_s21 = smov %s9159_s29 }
0x15c5   :  { %43 = sbr.rel (!%p41_p12) target bundleno = 26 (0x1a), region = 253 }
0x15cc   :  { %6237 = vsyncpa [#allocation3], 1 }
0x15cd   :  { %6239 = vsyncpa [#allocation3 + $0x1], 1 }
0x15ce   :  { %6240 = vsyncpa [#allocation6], 1 }
0x15cf   :  { %6241 = vsyncpa [#allocation9], 1 }
0x15d0   :  { %6242 = vsyncpa [#allocation12], 1 }
0x15d1   :  { %6243 = vsyncpa [#allocation15], 1 }
0x15d2   :  { %6244 = vsyncpa [#allocation18], 1 }
0x15d3   :  { %6245 = vsyncpa [#allocation21], 1 }
0x15d4   :  { %6246 = vsyncpa [#allocation24], 1 }
0x15d5   :  { %6247 = vsyncpa [#allocation27], 1 }
0x15d6   :  { %6248 = vsyncpa [#allocation30], 1 }
0x15d7   :  { %6249 = vsyncpa [#allocation4], 1 }
0x15d8   :  { %6251 = vsyncpa [#allocation4 + $0x1], 1 }

</bundles_post_ra>
